<compile_context>
chip_gen: v7x
topology: tpu7x:2x2x1
jax: 0.10.0
libtpu: 0.0.40
codegen_flags: <defaults>
</compile_context>

<pallas_src>
import jax
import jax.numpy as jnp
from jax.experimental import pallas as pl
from jax.experimental.pallas import tpu as pltpu


# ----------------------------------------------------------------------------
# Fused Pallas kernel (one batch tile per grid step)
# ----------------------------------------------------------------------------
def _lenet_kernel(x_ref, a1_ref, b1_ref, s1_ref, a2_ref, b2_ref, s2_ref,
                  wf1_ref, bf1_ref, wf2_ref, bf2_ref, wf3_ref, bf3_ref,
                  o_ref):
    f32 = jnp.float32
    tb = x_ref.shape[1]                       # batch tile (sublane axis), mult of 8

    # ---- conv1 + ReLU: (28, tb, 28) -> (24, tb, 24*6), lane = w*6 + c -------
    x2 = x_ref[...].reshape(28 * tb, 28)      # rows = (h, b), lanes = w
    y = jnp.dot(x2, a1_ref[0], preferred_element_type=f32
                ).reshape(28, tb, 144)[0:24]
    for kh in range(1, 5):
        y = y + jnp.dot(x2, a1_ref[kh], preferred_element_type=f32
                        ).reshape(28, tb, 144)[kh:kh + 24]
    y = jnp.maximum(y + b1_ref[...], 0.0)                          # (24, tb, 144)

    # ---- maxpool 2x2: -> (12*tb, 12*6) ---------------------------------------
    y = y.reshape(12, 2, tb, 144)
    y = jnp.maximum(y[:, 0], y[:, 1])                              # pool over H
    y = y.reshape(12 * tb, 144)
    y = jnp.maximum(jnp.dot(y, s1_ref[0], preferred_element_type=f32),
                    jnp.dot(y, s1_ref[1], preferred_element_type=f32))  # pool W

    # ---- conv2 + ReLU: -> (8, tb, 8*16), lane = w*16 + c ---------------------
    y2 = y                                                          # (12*tb, 72)
    y = jnp.dot(y2, a2_ref[0], preferred_element_type=f32
                ).reshape(12, tb, 128)[0:8]
    for kh in range(1, 5):
        y = y + jnp.dot(y2, a2_ref[kh], preferred_element_type=f32
                        ).reshape(12, tb, 128)[kh:kh + 8]
    y = jnp.maximum(y + b2_ref[...], 0.0)                          # (8, tb, 128)

    # ---- maxpool 2x2: -> (4, tb, 4*16) ---------------------------------------
    y = y.reshape(4, 2, tb, 128)
    y = jnp.maximum(y[:, 0], y[:, 1])                              # pool over H
    y = y.reshape(4 * tb, 128)
    y = jnp.maximum(jnp.dot(y, s2_ref[0], preferred_element_type=f32),
                    jnp.dot(y, s2_ref[1], preferred_element_type=f32))  # (4*tb,64)
    y = y.reshape(4, tb, 64)

    # ---- flatten to (tb, 256), lane order (h, w, c) --------------------------
    flat = jnp.concatenate([y[h] for h in range(4)], axis=-1)

    # ---- fc1 / fc2 / fc3 (fc3 padded to 128 lanes -> lane-dense store) -------
    a = jnp.maximum(jnp.dot(flat, wf1_ref[...], preferred_element_type=f32)
                    + bf1_ref[...], 0.0)
    a = jnp.maximum(jnp.dot(a, wf2_ref[...], preferred_element_type=f32)
                    + bf2_ref[...], 0.0)
    o_ref[...] = (jnp.dot(a, wf3_ref[...], preferred_element_type=f32)
                  + bf3_ref[...]).astype(o_ref.dtype)


# ----------------------------------------------------------------------------
# Host-side (wrapper) parameter preparation — tiny, fused into the jit
# ----------------------------------------------------------------------------
def _banded_conv_mats(w_oihw, W):
    """Per-kernel-row banded matrices for a VALID stride-1 conv.

    A[kh, w*Ci+ci, j*Co+co] = w_oihw[co, ci, kh, w-j]  (0 <= w-j < K, else 0)
    so that for rows=(h, b) / lanes=(w*Ci+ci):
      conv(x)[i, b, j*Co+co] = sum_kh (x_rows @ A[kh])[i+kh, b, j*Co+co]
    """
    Co, Ci, K, _ = w_oihw.shape
    Wo = W - K + 1
    w_idx = jnp.arange(W)
    j_idx = jnp.arange(Wo)
    mats = []
    for kh in range(K):
        A = jnp.zeros((W, Ci, Wo, Co), jnp.float32)
        for kw in range(K):
            band = (w_idx[:, None] == (j_idx[None, :] + kw)).astype(jnp.float32)
            tap = jnp.transpose(w_oihw[:, :, kh, kw]).astype(jnp.float32)   # (Ci, Co)
            A = A + band[:, None, :, None] * tap[None, :, None, :]
        mats.append(A.reshape(W * Ci, Wo * Co))
    return jnp.stack(mats, axis=0)                     # (K, W*Ci, Wo*Co)


def _pool_select_mats(Wo, C):
    """0/1 matrices selecting the even / odd W columns of a (rows, Wo*C) tile."""
    w_idx = jnp.arange(Wo)
    j_idx = jnp.arange(Wo // 2)
    eye_c = jnp.eye(C, dtype=jnp.float32)
    mats = []
    for parity in (0, 1):
        sel = (w_idx[:, None] == (2 * j_idx[None, :] + parity)).astype(jnp.float32)
        S = sel[:, None, :, None] * eye_c[None, :, None, :]        # (Wo, C, Wo/2, C)
        mats.append(S.reshape(Wo * C, (Wo // 2) * C))
    return jnp.stack(mats, axis=0)                     # (2, Wo*C, (Wo/2)*C)


@jax.jit
def net_forward(params, x_nchw):
    N = x_nchw.shape[0]
    assert x_nchw.shape[1:] == (1, 28, 28), x_nchw.shape
    tb = 8 if N <= 16 else 32                          # batch tile (sublanes)
    npad = ((N + tb - 1) // tb) * tb

    # input: NCHW (N,1,28,28) -> (H=28, N, W=28): batch on sublanes, W on lanes
    xT = jnp.transpose(x_nchw.astype(jnp.float32)[:, 0, :, :], (1, 0, 2))
    if npad != N:
        xT = jnp.pad(xT, ((0, 0), (0, npad - N), (0, 0)))

    A1 = _banded_conv_mats(params["conv1_w"], W=28)    # (5, 28, 144)
    b1t = jnp.tile(params["conv1_b"], 24)[None, :]     # (1, 144)
    S1 = _pool_select_mats(Wo=24, C=6)                 # (2, 144, 72)
    A2 = _banded_conv_mats(params["conv2_w"], W=12)    # (5, 72, 128)
    b2t = jnp.tile(params["conv2_b"], 8)[None, :]      # (1, 128)
    S2 = _pool_select_mats(Wo=8, C=16)                 # (2, 128, 64)

    # fc1 rows permuted from PyTorch flatten order (c,h,w) to kernel order (h,w,c)
    g = jnp.arange(256)
    h = g // 64
    w_ = (g // 16) % 4
    c = g % 16
    wf1 = params["fc1_w"][c * 16 + h * 4 + w_, :]      # (256, 120)
    bf1 = params["fc1_b"][None, :]
    wf2 = params["fc2_w"]
    bf2 = params["fc2_b"][None, :]
    # fc3 padded to 128 output lanes for a lane-dense final store
    wf3 = jnp.zeros((84, 128), jnp.float32).at[:, :10].set(params["fc3_w"])
    bf3 = jnp.zeros((1, 128), jnp.float32).at[:, :10].set(params["fc3_b"][None, :])

    out = pl.pallas_call(
        _lenet_kernel,
        out_shape=jax.ShapeDtypeStruct((npad, 128), jnp.float32),
        grid_spec=pltpu.PrefetchScalarGridSpec(
            num_scalar_prefetch=0,
            grid=(npad // tb,),
            in_specs=[
                pl.BlockSpec((28, tb, 28), lambda b: (0, b, 0)),   # input tile
                pl.BlockSpec((5, 28, 144), lambda b: (0, 0, 0)),   # conv1 banded
                pl.BlockSpec((1, 144), lambda b: (0, 0)),          # conv1 bias
                pl.BlockSpec((2, 144, 72), lambda b: (0, 0, 0)),   # pool1 select
                pl.BlockSpec((5, 72, 128), lambda b: (0, 0, 0)),   # conv2 banded
                pl.BlockSpec((1, 128), lambda b: (0, 0)),          # conv2 bias
                pl.BlockSpec((2, 128, 64), lambda b: (0, 0, 0)),   # pool2 select
                pl.BlockSpec((256, 120), lambda b: (0, 0)),        # fc1 w
                pl.BlockSpec((1, 120), lambda b: (0, 0)),          # fc1 b
                pl.BlockSpec((120, 84), lambda b: (0, 0)),         # fc2 w
                pl.BlockSpec((1, 84), lambda b: (0, 0)),           # fc2 b
                pl.BlockSpec((84, 128), lambda b: (0, 0)),         # fc3 w (padded)
                pl.BlockSpec((1, 128), lambda b: (0, 0)),          # fc3 b (padded)
            ],
            out_specs=pl.BlockSpec((tb, 128), lambda b: (b, 0)),
        ),
        compiler_params=pltpu.CompilerParams(
            dimension_semantics=("parallel",),
        ),
    )(xT, A1, b1t, S1, A2, b2t, S2, wf1, bf1, wf2, bf2, wf3, bf3)

    return out[:N, :10]


# ----------------------------------------------------------------------------
# Parameters + pure-JAX reference (for a correctness check)
# ----------------------------------------------------------------------------
def init_params(key):
    ks = jax.random.split(key, 10)
    f = lambda k, shape, s: (s * jax.random.normal(k, shape)).astype(jnp.float32)
    return {
        "conv1_w": f(ks[0], (6, 1, 5, 5), 0.1),
        "conv1_b": f(ks[1], (6,), 0.1),
        "conv2_w": f(ks[2], (16, 6, 5, 5), 0.1),
        "conv2_b": f(ks[3], (16,), 0.1),
        "fc1_w": f(ks[4], (16 * 4 * 4, 120), 0.05),
        "fc1_b": f(ks[5], (120,), 0.05),
        "fc2_w": f(ks[6], (120, 84), 0.05),
        "fc2_b": f(ks[7], (84,), 0.05),
        "fc3_w": f(ks[8], (84, 10), 0.05),
        "fc3_b": f(ks[9], (10,), 0.05),
    }


def net_forward_ref(params, x_nchw):
    x = x_nchw.astype(jnp.float32)
    dn = ("NCHW", "OIHW", "NCHW")
    y = jax.lax.conv_general_dilated(x, params["conv1_w"], (1, 1), "VALID",
                                     dimension_numbers=dn)
    y = jax.nn.relu(y + params["conv1_b"][None, :, None, None])
    N = y.shape[0]
    y = y.reshape(N, 6, 12, 2, 12, 2).max(axis=(3, 5))
    y = jax.lax.conv_general_dilated(y, params["conv2_w"], (1, 1), "VALID",
                                     dimension_numbers=dn)
    y = jax.nn.relu(y + params["conv2_b"][None, :, None, None])
    y = y.reshape(N, 16, 4, 2, 4, 2).max(axis=(3, 5))
    y = y.reshape(N, 16 * 4 * 4)
    y = jax.nn.relu(y @ params["fc1_w"] + params["fc1_b"])
    y = jax.nn.relu(y @ params["fc2_w"] + params["fc2_b"])
    return y @ params["fc3_w"] + params["fc3_b"]


if __name__ == "__main__":
    key = jax.random.PRNGKey(0)
    pkey, xkey = jax.random.split(key)
    params = init_params(pkey)
    # LeNet input: batch=2, 1 channel, 28x28 (so the 16*4*4 flatten holds)
    x = jax.random.normal(xkey, (2, 1, 28, 28), dtype=jnp.float32)

    out = jax.block_until_ready(net_forward(params, x))

    assert out.shape == (2, 10), out.shape
    assert out.dtype == jnp.float32
    assert bool(jnp.all(jnp.isfinite(out)))

    ref = net_forward_ref(params, x)
    max_err = float(jnp.max(jnp.abs(out - ref)))
    assert jnp.allclose(out, ref, atol=5e-2, rtol=5e-2), max_err

    print("KERNEL_OK")
</pallas_src>

<mosaic_0001>
module attributes {stable_mosaic.version = 11 : i64} {
  func.func @_lenet_kernel(%arg0: i32, %arg1: memref<28x8x28xf32, #tpu.memory_space<vmem>>, %arg2: memref<5x28x144xf32, #tpu.memory_space<vmem>>, %arg3: memref<1x144xf32, #tpu.memory_space<vmem>>, %arg4: memref<2x144x72xf32, #tpu.memory_space<vmem>>, %arg5: memref<5x72x128xf32, #tpu.memory_space<vmem>>, %arg6: memref<1x128xf32, #tpu.memory_space<vmem>>, %arg7: memref<2x128x64xf32, #tpu.memory_space<vmem>>, %arg8: memref<256x120xf32, #tpu.memory_space<vmem>>, %arg9: memref<1x120xf32, #tpu.memory_space<vmem>>, %arg10: memref<120x84xf32, #tpu.memory_space<vmem>>, %arg11: memref<1x84xf32, #tpu.memory_space<vmem>>, %arg12: memref<84x128xf32, #tpu.memory_space<vmem>>, %arg13: memref<1x128xf32, #tpu.memory_space<vmem>>, %arg14: memref<8x128xf32, #tpu.memory_space<vmem>>) attributes {dimension_semantics = [#tpu.dimension_semantics<parallel>], iteration_bounds = array<i64: 1>, scalar_prefetch = 0 : i64, scratch_operands = 0 : i64, tpu.core_type = #tpu.core_type<tc>, window_params = [{transform_indices = @transform_0, window_bounds = array<i64: 28, 8, 28>}, {pipeline_mode = #tpu.pipeline_mode<synchronous>, transform_indices = @transform_1, window_bounds = array<i64: 5, 28, 144>}, {pipeline_mode = #tpu.pipeline_mode<synchronous>, transform_indices = @transform_2, window_bounds = array<i64: 1, 144>}, {pipeline_mode = #tpu.pipeline_mode<synchronous>, transform_indices = @transform_3, window_bounds = array<i64: 2, 144, 72>}, {pipeline_mode = #tpu.pipeline_mode<synchronous>, transform_indices = @transform_4, window_bounds = array<i64: 5, 72, 128>}, {pipeline_mode = #tpu.pipeline_mode<synchronous>, transform_indices = @transform_5, window_bounds = array<i64: 1, 128>}, {pipeline_mode = #tpu.pipeline_mode<synchronous>, transform_indices = @transform_6, window_bounds = array<i64: 2, 128, 64>}, {pipeline_mode = #tpu.pipeline_mode<synchronous>, transform_indices = @transform_7, window_bounds = array<i64: 256, 120>}, {pipeline_mode = #tpu.pipeline_mode<synchronous>, transform_indices = @transform_8, window_bounds = array<i64: 1, 120>}, {pipeline_mode = #tpu.pipeline_mode<synchronous>, transform_indices = @transform_9, window_bounds = array<i64: 120, 84>}, {pipeline_mode = #tpu.pipeline_mode<synchronous>, transform_indices = @transform_10, window_bounds = array<i64: 1, 84>}, {pipeline_mode = #tpu.pipeline_mode<synchronous>, transform_indices = @transform_11, window_bounds = array<i64: 84, 128>}, {pipeline_mode = #tpu.pipeline_mode<synchronous>, transform_indices = @transform_12, window_bounds = array<i64: 1, 128>}, {transform_indices = @transform_13, window_bounds = array<i64: 8, 128>}]} {
    %c0 = arith.constant 0 : index
    %c0_0 = arith.constant 0 : index
    %c0_1 = arith.constant 0 : index
    %0 = vector.load %arg1[%c0, %c0_0, %c0_1] : memref<28x8x28xf32, #tpu.memory_space<vmem>>, vector<28x8x28xf32>
    %1 = vector.shape_cast %0 : vector<28x8x28xf32> to vector<224x28xf32>
    %c0_2 = arith.constant 0 : index
    %c0_3 = arith.constant 0 : index
    %c0_4 = arith.constant 0 : index
    %2 = vector.load %arg2[%c0_2, %c0_3, %c0_4] : memref<5x28x144xf32, #tpu.memory_space<vmem>>, vector<1x28x144xf32>
    %3 = vector.shape_cast %2 : vector<1x28x144xf32> to vector<28x144xf32>
    %cst = arith.constant dense<0.000000e+00> : vector<224x144xf32>
    %4 = tpu.matmul %1, %3, %cst {dimension_numbers = #tpu.dot_dimension_numbers<[1], [0], [0], [1], [0, 0, 1, 1], [], []>} : vector<224x28xf32>, vector<28x144xf32>, vector<224x144xf32> -> vector<224x144xf32>
    %5 = vector.shape_cast %4 : vector<224x144xf32> to vector<28x8x144xf32>
    %6 = vector.extract_strided_slice %5 {offsets = [0, 0, 0], sizes = [24, 8, 144], strides = [1, 1, 1]} : vector<28x8x144xf32> to vector<24x8x144xf32>
    %c1 = arith.constant 1 : index
    %c0_5 = arith.constant 0 : index
    %c0_6 = arith.constant 0 : index
    %7 = vector.load %arg2[%c1, %c0_5, %c0_6] : memref<5x28x144xf32, #tpu.memory_space<vmem>>, vector<1x28x144xf32>
    %8 = vector.shape_cast %7 : vector<1x28x144xf32> to vector<28x144xf32>
    %cst_7 = arith.constant dense<0.000000e+00> : vector<224x144xf32>
    %9 = tpu.matmul %1, %8, %cst_7 {dimension_numbers = #tpu.dot_dimension_numbers<[1], [0], [0], [1], [0, 0, 1, 1], [], []>} : vector<224x28xf32>, vector<28x144xf32>, vector<224x144xf32> -> vector<224x144xf32>
    %10 = vector.shape_cast %9 : vector<224x144xf32> to vector<28x8x144xf32>
    %11 = vector.extract_strided_slice %10 {offsets = [1, 0, 0], sizes = [24, 8, 144], strides = [1, 1, 1]} : vector<28x8x144xf32> to vector<24x8x144xf32>
    %12 = arith.addf %6, %11 : vector<24x8x144xf32>
    %c2 = arith.constant 2 : index
    %c0_8 = arith.constant 0 : index
    %c0_9 = arith.constant 0 : index
    %13 = vector.load %arg2[%c2, %c0_8, %c0_9] : memref<5x28x144xf32, #tpu.memory_space<vmem>>, vector<1x28x144xf32>
    %14 = vector.shape_cast %13 : vector<1x28x144xf32> to vector<28x144xf32>
    %cst_10 = arith.constant dense<0.000000e+00> : vector<224x144xf32>
    %15 = tpu.matmul %1, %14, %cst_10 {dimension_numbers = #tpu.dot_dimension_numbers<[1], [0], [0], [1], [0, 0, 1, 1], [], []>} : vector<224x28xf32>, vector<28x144xf32>, vector<224x144xf32> -> vector<224x144xf32>
    %16 = vector.shape_cast %15 : vector<224x144xf32> to vector<28x8x144xf32>
    %17 = vector.extract_strided_slice %16 {offsets = [2, 0, 0], sizes = [24, 8, 144], strides = [1, 1, 1]} : vector<28x8x144xf32> to vector<24x8x144xf32>
    %18 = arith.addf %12, %17 : vector<24x8x144xf32>
    %c3 = arith.constant 3 : index
    %c0_11 = arith.constant 0 : index
    %c0_12 = arith.constant 0 : index
    %19 = vector.load %arg2[%c3, %c0_11, %c0_12] : memref<5x28x144xf32, #tpu.memory_space<vmem>>, vector<1x28x144xf32>
    %20 = vector.shape_cast %19 : vector<1x28x144xf32> to vector<28x144xf32>
    %cst_13 = arith.constant dense<0.000000e+00> : vector<224x144xf32>
    %21 = tpu.matmul %1, %20, %cst_13 {dimension_numbers = #tpu.dot_dimension_numbers<[1], [0], [0], [1], [0, 0, 1, 1], [], []>} : vector<224x28xf32>, vector<28x144xf32>, vector<224x144xf32> -> vector<224x144xf32>
    %22 = vector.shape_cast %21 : vector<224x144xf32> to vector<28x8x144xf32>
    %23 = vector.extract_strided_slice %22 {offsets = [3, 0, 0], sizes = [24, 8, 144], strides = [1, 1, 1]} : vector<28x8x144xf32> to vector<24x8x144xf32>
    %24 = arith.addf %18, %23 : vector<24x8x144xf32>
    %c4 = arith.constant 4 : index
    %c0_14 = arith.constant 0 : index
    %c0_15 = arith.constant 0 : index
    %25 = vector.load %arg2[%c4, %c0_14, %c0_15] : memref<5x28x144xf32, #tpu.memory_space<vmem>>, vector<1x28x144xf32>
    %26 = vector.shape_cast %25 : vector<1x28x144xf32> to vector<28x144xf32>
    %cst_16 = arith.constant dense<0.000000e+00> : vector<224x144xf32>
    %27 = tpu.matmul %1, %26, %cst_16 {dimension_numbers = #tpu.dot_dimension_numbers<[1], [0], [0], [1], [0, 0, 1, 1], [], []>} : vector<224x28xf32>, vector<28x144xf32>, vector<224x144xf32> -> vector<224x144xf32>
    %28 = vector.shape_cast %27 : vector<224x144xf32> to vector<28x8x144xf32>
    %29 = vector.extract_strided_slice %28 {offsets = [4, 0, 0], sizes = [24, 8, 144], strides = [1, 1, 1]} : vector<28x8x144xf32> to vector<24x8x144xf32>
    %30 = arith.addf %24, %29 : vector<24x8x144xf32>
    %c0_17 = arith.constant 0 : index
    %c0_18 = arith.constant 0 : index
    %31 = vector.load %arg3[%c0_17, %c0_18] : memref<1x144xf32, #tpu.memory_space<vmem>>, vector<1x144xf32>
    %32 = vector.shape_cast %31 : vector<1x144xf32> to vector<1x1x144xf32>
    %33 = vector.broadcast %32 : vector<1x1x144xf32> to vector<24x8x144xf32>
    %34 = arith.addf %30, %33 : vector<24x8x144xf32>
    %cst_19 = arith.constant 0.000000e+00 : f32
    %35 = vector.broadcast %cst_19 : f32 to vector<24x8x144xf32>
    %36 = arith.maximumf %34, %35 : vector<24x8x144xf32>
    %37 = vector.shape_cast %36 : vector<24x8x144xf32> to vector<12x2x8x144xf32>
    %38 = vector.extract_strided_slice %37 {offsets = [0, 0, 0, 0], sizes = [12, 1, 8, 144], strides = [1, 1, 1, 1]} : vector<12x2x8x144xf32> to vector<12x1x8x144xf32>
    %39 = vector.shape_cast %38 : vector<12x1x8x144xf32> to vector<12x8x144xf32>
    %40 = vector.extract_strided_slice %37 {offsets = [0, 1, 0, 0], sizes = [12, 1, 8, 144], strides = [1, 1, 1, 1]} : vector<12x2x8x144xf32> to vector<12x1x8x144xf32>
    %41 = vector.shape_cast %40 : vector<12x1x8x144xf32> to vector<12x8x144xf32>
    %42 = arith.maximumf %39, %41 : vector<12x8x144xf32>
    %43 = vector.shape_cast %42 : vector<12x8x144xf32> to vector<96x144xf32>
    %c0_20 = arith.constant 0 : index
    %c0_21 = arith.constant 0 : index
    %c0_22 = arith.constant 0 : index
    %44 = vector.load %arg4[%c0_20, %c0_21, %c0_22] : memref<2x144x72xf32, #tpu.memory_space<vmem>>, vector<1x144x72xf32>
    %45 = vector.shape_cast %44 : vector<1x144x72xf32> to vector<144x72xf32>
    %cst_23 = arith.constant dense<0.000000e+00> : vector<96x72xf32>
    %46 = tpu.matmul %43, %45, %cst_23 {dimension_numbers = #tpu.dot_dimension_numbers<[1], [0], [0], [1], [0, 0, 1, 1], [], []>} : vector<96x144xf32>, vector<144x72xf32>, vector<96x72xf32> -> vector<96x72xf32>
    %c1_24 = arith.constant 1 : index
    %c0_25 = arith.constant 0 : index
    %c0_26 = arith.constant 0 : index
    %47 = vector.load %arg4[%c1_24, %c0_25, %c0_26] : memref<2x144x72xf32, #tpu.memory_space<vmem>>, vector<1x144x72xf32>
    %48 = vector.shape_cast %47 : vector<1x144x72xf32> to vector<144x72xf32>
    %cst_27 = arith.constant dense<0.000000e+00> : vector<96x72xf32>
    %49 = tpu.matmul %43, %48, %cst_27 {dimension_numbers = #tpu.dot_dimension_numbers<[1], [0], [0], [1], [0, 0, 1, 1], [], []>} : vector<96x144xf32>, vector<144x72xf32>, vector<96x72xf32> -> vector<96x72xf32>
    %50 = arith.maximumf %46, %49 : vector<96x72xf32>
    %c0_28 = arith.constant 0 : index
    %c0_29 = arith.constant 0 : index
    %c0_30 = arith.constant 0 : index
    %51 = vector.load %arg5[%c0_28, %c0_29, %c0_30] : memref<5x72x128xf32, #tpu.memory_space<vmem>>, vector<1x72x128xf32>
    %52 = vector.shape_cast %51 : vector<1x72x128xf32> to vector<72x128xf32>
    %cst_31 = arith.constant dense<0.000000e+00> : vector<96x128xf32>
    %53 = tpu.matmul %50, %52, %cst_31 {dimension_numbers = #tpu.dot_dimension_numbers<[1], [0], [0], [1], [0, 0, 1, 1], [], []>} : vector<96x72xf32>, vector<72x128xf32>, vector<96x128xf32> -> vector<96x128xf32>
    %54 = vector.shape_cast %53 : vector<96x128xf32> to vector<12x8x128xf32>
    %55 = vector.extract_strided_slice %54 {offsets = [0, 0, 0], sizes = [8, 8, 128], strides = [1, 1, 1]} : vector<12x8x128xf32> to vector<8x8x128xf32>
    %c1_32 = arith.constant 1 : index
    %c0_33 = arith.constant 0 : index
    %c0_34 = arith.constant 0 : index
    %56 = vector.load %arg5[%c1_32, %c0_33, %c0_34] : memref<5x72x128xf32, #tpu.memory_space<vmem>>, vector<1x72x128xf32>
    %57 = vector.shape_cast %56 : vector<1x72x128xf32> to vector<72x128xf32>
    %cst_35 = arith.constant dense<0.000000e+00> : vector<96x128xf32>
    %58 = tpu.matmul %50, %57, %cst_35 {dimension_numbers = #tpu.dot_dimension_numbers<[1], [0], [0], [1], [0, 0, 1, 1], [], []>} : vector<96x72xf32>, vector<72x128xf32>, vector<96x128xf32> -> vector<96x128xf32>
    %59 = vector.shape_cast %58 : vector<96x128xf32> to vector<12x8x128xf32>
    %60 = vector.extract_strided_slice %59 {offsets = [1, 0, 0], sizes = [8, 8, 128], strides = [1, 1, 1]} : vector<12x8x128xf32> to vector<8x8x128xf32>
    %61 = arith.addf %55, %60 : vector<8x8x128xf32>
    %c2_36 = arith.constant 2 : index
    %c0_37 = arith.constant 0 : index
    %c0_38 = arith.constant 0 : index
    %62 = vector.load %arg5[%c2_36, %c0_37, %c0_38] : memref<5x72x128xf32, #tpu.memory_space<vmem>>, vector<1x72x128xf32>
    %63 = vector.shape_cast %62 : vector<1x72x128xf32> to vector<72x128xf32>
    %cst_39 = arith.constant dense<0.000000e+00> : vector<96x128xf32>
    %64 = tpu.matmul %50, %63, %cst_39 {dimension_numbers = #tpu.dot_dimension_numbers<[1], [0], [0], [1], [0, 0, 1, 1], [], []>} : vector<96x72xf32>, vector<72x128xf32>, vector<96x128xf32> -> vector<96x128xf32>
    %65 = vector.shape_cast %64 : vector<96x128xf32> to vector<12x8x128xf32>
    %66 = vector.extract_strided_slice %65 {offsets = [2, 0, 0], sizes = [8, 8, 128], strides = [1, 1, 1]} : vector<12x8x128xf32> to vector<8x8x128xf32>
    %67 = arith.addf %61, %66 : vector<8x8x128xf32>
    %c3_40 = arith.constant 3 : index
    %c0_41 = arith.constant 0 : index
    %c0_42 = arith.constant 0 : index
    %68 = vector.load %arg5[%c3_40, %c0_41, %c0_42] : memref<5x72x128xf32, #tpu.memory_space<vmem>>, vector<1x72x128xf32>
    %69 = vector.shape_cast %68 : vector<1x72x128xf32> to vector<72x128xf32>
    %cst_43 = arith.constant dense<0.000000e+00> : vector<96x128xf32>
    %70 = tpu.matmul %50, %69, %cst_43 {dimension_numbers = #tpu.dot_dimension_numbers<[1], [0], [0], [1], [0, 0, 1, 1], [], []>} : vector<96x72xf32>, vector<72x128xf32>, vector<96x128xf32> -> vector<96x128xf32>
    %71 = vector.shape_cast %70 : vector<96x128xf32> to vector<12x8x128xf32>
    %72 = vector.extract_strided_slice %71 {offsets = [3, 0, 0], sizes = [8, 8, 128], strides = [1, 1, 1]} : vector<12x8x128xf32> to vector<8x8x128xf32>
    %73 = arith.addf %67, %72 : vector<8x8x128xf32>
    %c4_44 = arith.constant 4 : index
    %c0_45 = arith.constant 0 : index
    %c0_46 = arith.constant 0 : index
    %74 = vector.load %arg5[%c4_44, %c0_45, %c0_46] : memref<5x72x128xf32, #tpu.memory_space<vmem>>, vector<1x72x128xf32>
    %75 = vector.shape_cast %74 : vector<1x72x128xf32> to vector<72x128xf32>
    %cst_47 = arith.constant dense<0.000000e+00> : vector<96x128xf32>
    %76 = tpu.matmul %50, %75, %cst_47 {dimension_numbers = #tpu.dot_dimension_numbers<[1], [0], [0], [1], [0, 0, 1, 1], [], []>} : vector<96x72xf32>, vector<72x128xf32>, vector<96x128xf32> -> vector<96x128xf32>
    %77 = vector.shape_cast %76 : vector<96x128xf32> to vector<12x8x128xf32>
    %78 = vector.extract_strided_slice %77 {offsets = [4, 0, 0], sizes = [8, 8, 128], strides = [1, 1, 1]} : vector<12x8x128xf32> to vector<8x8x128xf32>
    %79 = arith.addf %73, %78 : vector<8x8x128xf32>
    %c0_48 = arith.constant 0 : index
    %c0_49 = arith.constant 0 : index
    %80 = vector.load %arg6[%c0_48, %c0_49] : memref<1x128xf32, #tpu.memory_space<vmem>>, vector<1x128xf32>
    %81 = vector.shape_cast %80 : vector<1x128xf32> to vector<1x1x128xf32>
    %82 = vector.broadcast %81 : vector<1x1x128xf32> to vector<8x8x128xf32>
    %83 = arith.addf %79, %82 : vector<8x8x128xf32>
    %cst_50 = arith.constant 0.000000e+00 : f32
    %84 = vector.broadcast %cst_50 : f32 to vector<8x8x128xf32>
    %85 = arith.maximumf %83, %84 : vector<8x8x128xf32>
    %86 = vector.shape_cast %85 : vector<8x8x128xf32> to vector<4x2x8x128xf32>
    %87 = vector.extract_strided_slice %86 {offsets = [0, 0, 0, 0], sizes = [4, 1, 8, 128], strides = [1, 1, 1, 1]} : vector<4x2x8x128xf32> to vector<4x1x8x128xf32>
    %88 = vector.shape_cast %87 : vector<4x1x8x128xf32> to vector<4x8x128xf32>
    %89 = vector.extract_strided_slice %86 {offsets = [0, 1, 0, 0], sizes = [4, 1, 8, 128], strides = [1, 1, 1, 1]} : vector<4x2x8x128xf32> to vector<4x1x8x128xf32>
    %90 = vector.shape_cast %89 : vector<4x1x8x128xf32> to vector<4x8x128xf32>
    %91 = arith.maximumf %88, %90 : vector<4x8x128xf32>
    %92 = vector.shape_cast %91 : vector<4x8x128xf32> to vector<32x128xf32>
    %c0_51 = arith.constant 0 : index
    %c0_52 = arith.constant 0 : index
    %c0_53 = arith.constant 0 : index
    %93 = vector.load %arg7[%c0_51, %c0_52, %c0_53] : memref<2x128x64xf32, #tpu.memory_space<vmem>>, vector<1x128x64xf32>
    %94 = vector.shape_cast %93 : vector<1x128x64xf32> to vector<128x64xf32>
    %cst_54 = arith.constant dense<0.000000e+00> : vector<32x64xf32>
    %95 = tpu.matmul %92, %94, %cst_54 {dimension_numbers = #tpu.dot_dimension_numbers<[1], [0], [0], [1], [0, 0, 1, 1], [], []>} : vector<32x128xf32>, vector<128x64xf32>, vector<32x64xf32> -> vector<32x64xf32>
    %c1_55 = arith.constant 1 : index
    %c0_56 = arith.constant 0 : index
    %c0_57 = arith.constant 0 : index
    %96 = vector.load %arg7[%c1_55, %c0_56, %c0_57] : memref<2x128x64xf32, #tpu.memory_space<vmem>>, vector<1x128x64xf32>
    %97 = vector.shape_cast %96 : vector<1x128x64xf32> to vector<128x64xf32>
    %cst_58 = arith.constant dense<0.000000e+00> : vector<32x64xf32>
    %98 = tpu.matmul %92, %97, %cst_58 {dimension_numbers = #tpu.dot_dimension_numbers<[1], [0], [0], [1], [0, 0, 1, 1], [], []>} : vector<32x128xf32>, vector<128x64xf32>, vector<32x64xf32> -> vector<32x64xf32>
    %99 = arith.maximumf %95, %98 : vector<32x64xf32>
    %100 = vector.shape_cast %99 : vector<32x64xf32> to vector<4x8x64xf32>
    %101 = vector.extract_strided_slice %100 {offsets = [0, 0, 0], sizes = [1, 8, 64], strides = [1, 1, 1]} : vector<4x8x64xf32> to vector<1x8x64xf32>
    %102 = vector.shape_cast %101 : vector<1x8x64xf32> to vector<8x64xf32>
    %103 = vector.extract_strided_slice %100 {offsets = [1, 0, 0], sizes = [1, 8, 64], strides = [1, 1, 1]} : vector<4x8x64xf32> to vector<1x8x64xf32>
    %104 = vector.shape_cast %103 : vector<1x8x64xf32> to vector<8x64xf32>
    %105 = vector.extract_strided_slice %100 {offsets = [2, 0, 0], sizes = [1, 8, 64], strides = [1, 1, 1]} : vector<4x8x64xf32> to vector<1x8x64xf32>
    %106 = vector.shape_cast %105 : vector<1x8x64xf32> to vector<8x64xf32>
    %107 = vector.extract_strided_slice %100 {offsets = [3, 0, 0], sizes = [1, 8, 64], strides = [1, 1, 1]} : vector<4x8x64xf32> to vector<1x8x64xf32>
    %108 = vector.shape_cast %107 : vector<1x8x64xf32> to vector<8x64xf32>
    %109 = tpu.concatenate %102, %104, %106, %108 in 1 : vector<8x64xf32>, vector<8x64xf32>, vector<8x64xf32>, vector<8x64xf32> -> vector<8x256xf32>
    %c0_59 = arith.constant 0 : index
    %c0_60 = arith.constant 0 : index
    %110 = vector.load %arg8[%c0_59, %c0_60] : memref<256x120xf32, #tpu.memory_space<vmem>>, vector<256x120xf32>
    %cst_61 = arith.constant dense<0.000000e+00> : vector<8x120xf32>
    %111 = tpu.matmul %109, %110, %cst_61 {dimension_numbers = #tpu.dot_dimension_numbers<[1], [0], [0], [1], [0, 0, 1, 1], [], []>} : vector<8x256xf32>, vector<256x120xf32>, vector<8x120xf32> -> vector<8x120xf32>
    %c0_62 = arith.constant 0 : index
    %c0_63 = arith.constant 0 : index
    %112 = vector.load %arg9[%c0_62, %c0_63] : memref<1x120xf32, #tpu.memory_space<vmem>>, vector<1x120xf32>
    %113 = vector.broadcast %112 : vector<1x120xf32> to vector<8x120xf32>
    %114 = arith.addf %111, %113 : vector<8x120xf32>
    %cst_64 = arith.constant 0.000000e+00 : f32
    %115 = vector.broadcast %cst_64 : f32 to vector<8x120xf32>
    %116 = arith.maximumf %114, %115 : vector<8x120xf32>
    %c0_65 = arith.constant 0 : index
    %c0_66 = arith.constant 0 : index
    %117 = vector.load %arg10[%c0_65, %c0_66] : memref<120x84xf32, #tpu.memory_space<vmem>>, vector<120x84xf32>
    %cst_67 = arith.constant dense<0.000000e+00> : vector<8x84xf32>
    %118 = tpu.matmul %116, %117, %cst_67 {dimension_numbers = #tpu.dot_dimension_numbers<[1], [0], [0], [1], [0, 0, 1, 1], [], []>} : vector<8x120xf32>, vector<120x84xf32>, vector<8x84xf32> -> vector<8x84xf32>
    %c0_68 = arith.constant 0 : index
    %c0_69 = arith.constant 0 : index
    %119 = vector.load %arg11[%c0_68, %c0_69] : memref<1x84xf32, #tpu.memory_space<vmem>>, vector<1x84xf32>
    %120 = vector.broadcast %119 : vector<1x84xf32> to vector<8x84xf32>
    %121 = arith.addf %118, %120 : vector<8x84xf32>
    %cst_70 = arith.constant 0.000000e+00 : f32
    %122 = vector.broadcast %cst_70 : f32 to vector<8x84xf32>
    %123 = arith.maximumf %121, %122 : vector<8x84xf32>
    %c0_71 = arith.constant 0 : index
    %c0_72 = arith.constant 0 : index
    %124 = vector.load %arg12[%c0_71, %c0_72] : memref<84x128xf32, #tpu.memory_space<vmem>>, vector<84x128xf32>
    %cst_73 = arith.constant dense<0.000000e+00> : vector<8x128xf32>
    %125 = tpu.matmul %123, %124, %cst_73 {dimension_numbers = #tpu.dot_dimension_numbers<[1], [0], [0], [1], [0, 0, 1, 1], [], []>} : vector<8x84xf32>, vector<84x128xf32>, vector<8x128xf32> -> vector<8x128xf32>
    %c0_74 = arith.constant 0 : index
    %c0_75 = arith.constant 0 : index
    %126 = vector.load %arg13[%c0_74, %c0_75] : memref<1x128xf32, #tpu.memory_space<vmem>>, vector<1x128xf32>
    %127 = vector.broadcast %126 : vector<1x128xf32> to vector<8x128xf32>
    %128 = arith.addf %125, %127 : vector<8x128xf32>
    %c0_76 = arith.constant 0 : index
    %c0_77 = arith.constant 0 : index
    %129 = vector.load %arg14[%c0_76, %c0_77] : memref<8x128xf32, #tpu.memory_space<vmem>>, vector<8x128xf32>
    tpu.vector_store %arg14[%c0_76, %c0_77], %128 {strides = array<i32>} : memref<8x128xf32, #tpu.memory_space<vmem>>, vector<8x128xf32>,
    return
  }
  func.func @transform_0(%arg0: i32) -> (i32, i32, i32) {
    %c0_i32 = arith.constant 0 : i32
    %c0_i32_0 = arith.constant 0 : i32
    %c0_i32_1 = arith.constant 0 : i32
    return %c0_i32, %arg0, %c0_i32_0 : i32, i32, i32
  }
  func.func @transform_1(%arg0: i32) -> (i32, i32, i32) {
    %c0_i32 = arith.constant 0 : i32
    %c0_i32_0 = arith.constant 0 : i32
    %c0_i32_1 = arith.constant 0 : i32
    %c0_i32_2 = arith.constant 0 : i32
    return %c0_i32, %c0_i32_0, %c0_i32_1 : i32, i32, i32
  }
  func.func @transform_2(%arg0: i32) -> (i32, i32) {
    %c0_i32 = arith.constant 0 : i32
    %c0_i32_0 = arith.constant 0 : i32
    %c0_i32_1 = arith.constant 0 : i32
    return %c0_i32, %c0_i32_0 : i32, i32
  }
  func.func @transform_3(%arg0: i32) -> (i32, i32, i32) {
    %c0_i32 = arith.constant 0 : i32
    %c0_i32_0 = arith.constant 0 : i32
    %c0_i32_1 = arith.constant 0 : i32
    %c0_i32_2 = arith.constant 0 : i32
    return %c0_i32, %c0_i32_0, %c0_i32_1 : i32, i32, i32
  }
  func.func @transform_4(%arg0: i32) -> (i32, i32, i32) {
    %c0_i32 = arith.constant 0 : i32
    %c0_i32_0 = arith.constant 0 : i32
    %c0_i32_1 = arith.constant 0 : i32
    %c0_i32_2 = arith.constant 0 : i32
    return %c0_i32, %c0_i32_0, %c0_i32_1 : i32, i32, i32
  }
  func.func @transform_5(%arg0: i32) -> (i32, i32) {
    %c0_i32 = arith.constant 0 : i32
    %c0_i32_0 = arith.constant 0 : i32
    %c0_i32_1 = arith.constant 0 : i32
    return %c0_i32, %c0_i32_0 : i32, i32
  }
  func.func @transform_6(%arg0: i32) -> (i32, i32, i32) {
    %c0_i32 = arith.constant 0 : i32
    %c0_i32_0 = arith.constant 0 : i32
    %c0_i32_1 = arith.constant 0 : i32
    %c0_i32_2 = arith.constant 0 : i32
    return %c0_i32, %c0_i32_0, %c0_i32_1 : i32, i32, i32
  }
  func.func @transform_7(%arg0: i32) -> (i32, i32) {
    %c0_i32 = arith.constant 0 : i32
    %c0_i32_0 = arith.constant 0 : i32
    %c0_i32_1 = arith.constant 0 : i32
    return %c0_i32, %c0_i32_0 : i32, i32
  }
  func.func @transform_8(%arg0: i32) -> (i32, i32) {
    %c0_i32 = arith.constant 0 : i32
    %c0_i32_0 = arith.constant 0 : i32
    %c0_i32_1 = arith.constant 0 : i32
    return %c0_i32, %c0_i32_0 : i32, i32
  }
  func.func @transform_9(%arg0: i32) -> (i32, i32) {
    %c0_i32 = arith.constant 0 : i32
    %c0_i32_0 = arith.constant 0 : i32
    %c0_i32_1 = arith.constant 0 : i32
    return %c0_i32, %c0_i32_0 : i32, i32
  }
  func.func @transform_10(%arg0: i32) -> (i32, i32) {
    %c0_i32 = arith.constant 0 : i32
    %c0_i32_0 = arith.constant 0 : i32
    %c0_i32_1 = arith.constant 0 : i32
    return %c0_i32, %c0_i32_0 : i32, i32
  }
  func.func @transform_11(%arg0: i32) -> (i32, i32) {
    %c0_i32 = arith.constant 0 : i32
    %c0_i32_0 = arith.constant 0 : i32
    %c0_i32_1 = arith.constant 0 : i32
    return %c0_i32, %c0_i32_0 : i32, i32
  }
  func.func @transform_12(%arg0: i32) -> (i32, i32) {
    %c0_i32 = arith.constant 0 : i32
    %c0_i32_0 = arith.constant 0 : i32
    %c0_i32_1 = arith.constant 0 : i32
    return %c0_i32, %c0_i32_0 : i32, i32
  }
  func.func @transform_13(%arg0: i32) -> (i32, i32) {
    %c0_i32 = arith.constant 0 : i32
    %c0_i32_0 = arith.constant 0 : i32
    return %arg0, %c0_i32 : i32, i32
  }
}

</mosaic_0001>

<bundles_post_ra>
// kernel: tile.14
= control target key start
LH: loop header
LB: loop body
LE: loop exit
PB: predicated region body
PF: predicated region fallthrough
CT: control target
= control target key end

     0   :  { %vm9_vm0 = vcmask 15360   ;;  %s211_s12 = smov 126   ;;  %s212_s13 = smov 114   ;;  %vm3_vm1 = vcmask 48128   ;;  %vm13_vm2 = vcmask 31744   ;;  %vm16_vm3 = vcmask 1048560   ;;  %s325_s0 = inlined_call_operand.vmem [shape: f32[24,6], index: 0, kind: input, shape index: {}]   ;;  %s326_s1 = inlined_call_operand.vmem [shape: f32[1,144], index: 1, kind: output, shape index: {}]  }
   0x1   :  { %v163_v0 = vld [vmem:[%s325_s0 + $0x15] sm:$0x1]   ;;  %v166_v3 = vld [vmem:[%s325_s0 + $0x13] sm:$0x1]   ;;  %v165_v4 = vld [vmem:[%s325_s0 + $0x14] sm:$0x1]  }
   0x2   :  { %v164_v1 = vld [vmem:[%s325_s0 + $0x15] sm:$0x1]   ;;  %26 = vrot.lane.b32.xlu1 %v166_v3, %s212_s13  ;;  %v167_v5 = vld [vmem:[%s325_s0 + $0x12] sm:$0x1]   ;;  %s213_s18 = smov 120   ;;  %s214_s19 = smov 108  }
   0x3   :  { %v10_v2 = vsel %vm9_vm0, %v164_v1, %v163_v0  ;;  %v168_v6 = vld [vmem:[%s325_s0 + $0x11] sm:$0x1]   ;;  %v169_v7 = vld [vmem:[%s325_s0 + $0x10] sm:$0x1]   ;;  %s215_s24 = smov 102   ;;  %s216_s25 = smov 96  }
   0x4   :  { %11 = vrot.lane.b32.xlu0 %v10_v2, %s211_s12  ;;  %v170_v8 = vld [vmem:[%s325_s0 + $0xf] sm:$0x1]   ;;  %v171_v9 = vld [vmem:[%s325_s0 + $0xe] sm:$0x1]   ;;  %v2_v10 = vld [vmem:[%s325_s0] sm:$0x1]  }
   0x5   :  { %4 = vst.msk [vmem:[#allocation0] sm:$0x1] %vm3_vm1, %v2_v10   ;;  %s217_s3 = smov 90   ;;  %s218_s4 = smov 84   ;;  %v172_v11 = vld [vmem:[%s325_s0 + $0xd] sm:$0x1]  }
   0x6   :  { %32 = vrot.lane.b32.xlu1 %v167_v5, %s214_s19  ;;  %v173_v12 = vld [vmem:[%s325_s0 + $0xc] sm:$0x1]   ;;  %s219_s9 = smov 78   ;;  %s220_s10 = smov 72   ;;  %v174_v13 = vld [vmem:[%s325_s0 + $0xb] sm:$0x1]  }
   0x7   :  { %v175_v14 = vld [vmem:[%s325_s0 + $0xa] sm:$0x1]   ;;  %s221_s15 = smov 66   ;;  %s222_s16 = smov 60   ;;  %v176_v15 = vld [vmem:[%s325_s0 + $0x9] sm:$0x1]  }
   0x8   :  { %20 = vrot.lane.b32.xlu0 %v165_v4, %s213_s18  ;;  %v177_v16 = vld [vmem:[%s325_s0 + $0x8] sm:$0x1]   ;;  %s223_s21 = smov 54   ;;  %s224_s22 = smov 48   ;;  %v178_v17 = vld [vmem:[%s325_s0 + $0x7] sm:$0x1]  }
   0x9   :  { %v179_v18 = vld [vmem:[%s325_s0 + $0x6] sm:$0x1]   ;;  %s225_s27 = smov 42   ;;  %s226_s28 = smov 36   ;;  %v180_v19 = vld [vmem:[%s325_s0 + $0x5] sm:$0x1]  }
   0xa   :  { %44 = vrot.lane.b32.xlu1 %v169_v7, %s216_s25  ;;  %v181_v20 = vld [vmem:[%s325_s0 + $0x4] sm:$0x1]   ;;  %s228_s5 = smov 24   ;;  %v182_v21 = vld [vmem:[%s325_s0 + $0x3] sm:$0x1]   ;;  %s230_s11 = smov 12  }
   0xb   :  { %v183_v22 = vld [vmem:[%s325_s0 + $0x2] sm:$0x1]   ;;  %v184_v23 = vld [vmem:[%s325_s0 + $0x17] sm:$0x1]   ;;  %v185_v24 = vld [vmem:[%s325_s0 + $0x1] sm:$0x1]  }
   0xc   :  { %38 = vrot.lane.b32.xlu0 %v168_v6, %s215_s24  ;;  %s232_s17 = smov 6   ;;  %v186_v25 = vld [vmem:[%s325_s0 + $0x16] sm:$0x1]   ;;  %s233_s0 = smov 4   ;;  %vm22_vm4 = vcmask 1032128   ;;  %vm28_vm5 = vcmask 982928  }
   0xd   :  { %vm34_vm6 = vcmask 933728   ;;  %vm40_vm7 = vcmask 884528   ;;  %vm46_vm8 = vcmask 835328   ;;  %vm52_vm9 = vcmask 786128  }
   0xe   :  { %56 = vrot.lane.b32.xlu1 %v171_v9, %s218_s4  ;;  %s227_s4 = smov 30   ;;  %vm58_vm10 = vcmask 736928   ;;  %vm64_vm11 = vcmask 687728   ;;  %vm70_vm12 = vcmask 638528   ;;  %vm76_vm13 = vcmask 589328  }
   0xf   :  { %vm82_vm14 = vcmask 540128   ;;  %vm88_vm15 = vcmask 490928   ;;  %vm94_vm0 = vcmask 441728   ;;  %vm100_vm1 = vcmask 392528  }
  0x10   :  { %50 = vrot.lane.b32.xlu0 %v170_v8, %s217_s3 }
  0x12   :  { %68 = vrot.lane.b32.xlu1 %v173_v12, %s220_s10  ;;  %s229_s10 = smov 18  }
  0x14   :  { %62 = vrot.lane.b32.xlu0 %v172_v11, %s219_s9 }
  0x16   :  { %80 = vrot.lane.b32.xlu1 %v175_v14, %s222_s16  ;;  %s231_s16 = smov 10  }
  0x18   :  { %74 = vrot.lane.b32.xlu0 %v174_v13, %s221_s15 }
  0x1a   :  { %92 = vrot.lane.b32.xlu1 %v177_v16, %s224_s22 }
  0x1c   :  { %86 = vrot.lane.b32.xlu0 %v176_v15, %s223_s21 }
  0x1e   :  { %104 = vrot.lane.b32.xlu1 %v179_v18, %s226_s28 }
  0x20   :  { %98 = vrot.lane.b32.xlu0 %v178_v17, %s225_s27 }
  0x22   :  { %116 = vrot.lane.b32.xlu1 %v181_v20, %s228_s5 }
  0x24   :  { %110 = vrot.lane.b32.xlu0 %v180_v19, %s227_s4 }
  0x26   :  { %128 = vrot.lane.b32.xlu1 %v183_v22, %s230_s11 }
  0x28   :  { %122 = vrot.lane.b32.xlu0 %v182_v21, %s229_s10 }
  0x2a   :  { %141 = vrot.lane.b32.xlu1 %v185_v24, %s232_s17 }
  0x2c   :  { %134 = vrot.lane.b32.xlu0 %v184_v23, %s231_s16 }
  0x30   :  { %147 = vrot.lane.b32.xlu0 %v186_v25, %s233_s0 }
  0x74   :  { %v27_v27 = vpop.permute.xlu1 %26  }
  0x76   :  { %v12_v26 = vpop.permute.xlu0 %11  }
  0x77   :  { %15 = vst.msk [vmem:[#allocation0 + $0x8] sm:$0x1] %vm13_vm2, %v12_v26   ;;  %vm106_vm2 = vcmask 343328  }
  0x78   :  { %17 = vst.msk [vmem:[#allocation0] sm:$0x1] %vm16_vm3, %v12_v26   ;;  %v33_v29 = vpop.permute.xlu1 %32   ;;  %vm112_vm3 = vcmask 294128  }
  0x7a   :  { %v21_v28 = vpop.permute.xlu0 %20  }
  0x7b   :  { %23 = vst.msk [vmem:[#allocation0] sm:$0x1] %vm22_vm4, %v21_v28   ;;  %vm118_vm4 = vcmask 244928  }
  0x7c   :  { %29 = vst.msk [vmem:[#allocation0] sm:$0x1] %vm28_vm5, %v27_v27   ;;  %v45_v31 = vpop.permute.xlu1 %44   ;;  %vm124_vm5 = vcmask 195728  }
  0x7d   :  { %35 = vst.msk [vmem:[#allocation0] sm:$0x1] %vm34_vm6, %v33_v29   ;;  %vm130_vm6 = vcmask 146528  }
  0x7e   :  { %v39_v30 = vpop.permute.xlu0 %38  }
  0x7f   :  { %41 = vst.msk [vmem:[#allocation0] sm:$0x1] %vm40_vm7, %v39_v30   ;;  %vm136_vm7 = vcmask 130128  }
  0x80   :  { %47 = vst.msk [vmem:[#allocation0] sm:$0x1] %vm46_vm8, %v45_v31   ;;  %v57_v33 = vpop.permute.xlu1 %56   ;;  %vm143_vm8 = vcmask 97328  }
  0x82   :  { %v51_v32 = vpop.permute.xlu0 %50  }
  0x83   :  { %53 = vst.msk [vmem:[#allocation0] sm:$0x1] %vm52_vm9, %v51_v32   ;;  %vm149_vm9 = vcmask 80928  }
  0x84   :  { %59 = vst.msk [vmem:[#allocation0] sm:$0x1] %vm58_vm10, %v57_v33   ;;  %v69_v35 = vpop.permute.xlu1 %68  }
  0x86   :  { %v63_v34 = vpop.permute.xlu0 %62  }
  0x87   :  { %65 = vst.msk [vmem:[#allocation0] sm:$0x1] %vm64_vm11, %v63_v34  }
  0x88   :  { %71 = vst.msk [vmem:[#allocation0] sm:$0x1] %vm70_vm12, %v69_v35   ;;  %v81_v37 = vpop.permute.xlu1 %80  }
  0x8a   :  { %v75_v36 = vpop.permute.xlu0 %74  }
  0x8b   :  { %77 = vst.msk [vmem:[#allocation0] sm:$0x1] %vm76_vm13, %v75_v36  }
  0x8c   :  { %83 = vst.msk [vmem:[#allocation0] sm:$0x1] %vm82_vm14, %v81_v37   ;;  %v93_v39 = vpop.permute.xlu1 %92  }
  0x8e   :  { %v87_v38 = vpop.permute.xlu0 %86  }
  0x8f   :  { %89 = vst.msk [vmem:[#allocation0] sm:$0x1] %vm88_vm15, %v87_v38  }
  0x90   :  { %95 = vst.msk [vmem:[#allocation0] sm:$0x1] %vm94_vm0, %v93_v39   ;;  %v105_v41 = vpop.permute.xlu1 %104  }
  0x92   :  { %v99_v40 = vpop.permute.xlu0 %98  }
  0x93   :  { %101 = vst.msk [vmem:[#allocation0] sm:$0x1] %vm100_vm1, %v99_v40  }
  0x94   :  { %107 = vst.msk [vmem:[#allocation0] sm:$0x1] %vm106_vm2, %v105_v41   ;;  %v117_v43 = vpop.permute.xlu1 %116  }
  0x96   :  { %v111_v42 = vpop.permute.xlu0 %110  }
  0x97   :  { %113 = vst.msk [vmem:[#allocation0] sm:$0x1] %vm112_vm3, %v111_v42  }
  0x98   :  { %119 = vst.msk [vmem:[#allocation0] sm:$0x1] %vm118_vm4, %v117_v43   ;;  %v129_v45 = vpop.permute.xlu1 %128  }
  0x9a   :  { %v123_v44 = vpop.permute.xlu0 %122  }
  0x9b   :  { %125 = vst.msk [vmem:[#allocation0] sm:$0x1] %vm124_vm5, %v123_v44  }
  0x9c   :  { %131 = vst.msk [vmem:[#allocation0] sm:$0x1] %vm130_vm6, %v129_v45   ;;  %v142_v47 = vpop.permute.xlu1 %141  }
  0x9d   :  { %144 = vst.msk [vmem:[#allocation0] sm:$0x1] %vm143_vm8, %v142_v47  }
  0x9e   :  { %v135_v46 = vpop.permute.xlu0 %134  }
  0x9f   :  { %138 = vst.msk [vmem:[#allocation0 + $0x8] sm:$0x1] %vm136_vm7, %v135_v46  }
  0xa2   :  { %v148_v48 = vpop.permute.xlu0 %147  }
  0xa3   :  { %151 = vst.msk [vmem:[#allocation0 + $0x8] sm:$0x1] %vm149_vm9, %v148_v48  }
  0xa4   :  { %v155_v49 = vld [vmem:[#allocation0] sm:$0x1] }
  0xa5   :  { %157 = vst [vmem:[%s326_s1] sm:$0x1] %v155_v49 }
  0xaa   :  { %v159_v50 = vld [vmem:[#allocation0 + $0x8] sm:$0x1] }
  0xab   :  { %187 = vst [vmem:[%s326_s1 + $0x1] sm:$0x1] %v159_v50 }

// kernel: tile.18
= control target key start
LH: loop header
LB: loop body
LE: loop exit
PB: predicated region body
PF: predicated region fallthrough
CT: control target
= control target key end

     0   :  { %s22_s0 = inlined_call_operand.vmem [shape: f32[16], index: 0, kind: input, shape index: {}]   ;;  %s23_s1 = inlined_call_operand.vmem [shape: f32[8,16], index: 1, kind: output, shape index: {}]  }
   0x1   :  { %v4_v0 = vld [vmem:[%s22_s0] ss:$0 sm:$0xff] }
   0x2   :  { %5 = vst [vmem:[%s23_s1] sm:$0xff] %v4_v0 }

// kernel: tile.19
= control target key start
LH: loop header
LB: loop body
LE: loop exit
PB: predicated region body
PF: predicated region fallthrough
CT: control target
= control target key end

     0   :  { %s67_s10 = smov 112   ;;  %s68_s11 = smov 80   ;;  %vm3_vm0 = vcmask 130048   ;;  %vm9_vm1 = vcmask 1048448   ;;  %vm15_vm2 = vcmask 917248   ;;  %vm21_vm3 = vcmask 786048   ;;  %s111_s0 = inlined_call_operand.vmem [shape: f32[8,16], index: 0, kind: input, shape index: {}]   ;;  %s112_s1 = inlined_call_operand.vmem [shape: f32[1,128], index: 1, kind: output, shape index: {}]  }
   0x1   :  { %v53_v0 = vld [vmem:[%s111_s0 + $0x7] sm:$0x1]   ;;  %v55_v1 = vld [vmem:[%s111_s0 + $0x5] sm:$0x1]   ;;  %v54_v2 = vld [vmem:[%s111_s0 + $0x6] sm:$0x1]  }
   0x2   :  { %7 = vrot.lane.b32.xlu0 %v53_v0, %s67_s10  ;;  %19 = vrot.lane.b32.xlu1 %v55_v1, %s68_s11  ;;  %v56_v3 = vld [vmem:[%s111_s0 + $0x4] sm:$0x1]   ;;  %v2_v4 = vld [vmem:[%s111_s0] sm:$0x1]   ;;  %s69_s18 = smov 96   ;;  %s70_s19 = smov 64  }
   0x3   :  { %4 = vst.msk [vmem:[#allocation0] sm:$0x1] %vm3_vm0, %v2_v4   ;;  %v57_v5 = vld [vmem:[%s111_s0 + $0x3] sm:$0x1]   ;;  %v58_v6 = vld [vmem:[%s111_s0 + $0x2] sm:$0x1]  }
   0x4   :  { %s71_s24 = smov 48   ;;  %s72_s25 = smov 32   ;;  %v59_v7 = vld [vmem:[%s111_s0 + $0x1] sm:$0x1]   ;;  %vm27_vm4 = vcmask 654848   ;;  %vm33_vm5 = vcmask 523648  }
   0x5   :  { %s73_s0 = smov 16   ;;  %vm39_vm6 = vcmask 392448   ;;  %vm45_vm7 = vcmask 261248  }
   0x6   :  { %13 = vrot.lane.b32.xlu0 %v54_v2, %s69_s18  ;;  %25 = vrot.lane.b32.xlu1 %v56_v3, %s70_s19 }
   0xa   :  { %31 = vrot.lane.b32.xlu0 %v57_v5, %s71_s24  ;;  %37 = vrot.lane.b32.xlu1 %v58_v6, %s72_s25 }
   0xe   :  { %43 = vrot.lane.b32.xlu0 %v59_v7, %s73_s0 }
  0x74   :  { %v8_v8 = vpop.permute.xlu0 %7   ;;  %v20_v9 = vpop.permute.xlu1 %19  }
  0x75   :  { %10 = vst.msk [vmem:[#allocation0] sm:$0x1] %vm9_vm1, %v8_v8  }
  0x78   :  { %v14_v10 = vpop.permute.xlu0 %13   ;;  %v26_v11 = vpop.permute.xlu1 %25  }
  0x79   :  { %16 = vst.msk [vmem:[#allocation0] sm:$0x1] %vm15_vm2, %v14_v10  }
  0x7a   :  { %22 = vst.msk [vmem:[#allocation0] sm:$0x1] %vm21_vm3, %v20_v9  }
  0x7b   :  { %28 = vst.msk [vmem:[#allocation0] sm:$0x1] %vm27_vm4, %v26_v11  }
  0x7c   :  { %v32_v12 = vpop.permute.xlu0 %31   ;;  %v38_v13 = vpop.permute.xlu1 %37  }
  0x7d   :  { %34 = vst.msk [vmem:[#allocation0] sm:$0x1] %vm33_vm5, %v32_v12  }
  0x7e   :  { %40 = vst.msk [vmem:[#allocation0] sm:$0x1] %vm39_vm6, %v38_v13  }
  0x80   :  { %v44_v14 = vpop.permute.xlu0 %43  }
  0x81   :  { %46 = vst.msk [vmem:[#allocation0] sm:$0x1] %vm45_vm7, %v44_v14  }
  0x88   :  { %v50_v15 = vld [vmem:[#allocation0] sm:$0x1] }
  0x89   :  { %52 = vst [vmem:[%s112_s1] sm:$0x1] %v50_v15 }

// kernel: net_forward.1
= control target key start
LH: loop header
LB: loop body
LE: loop exit
PB: predicated region body
PF: predicated region fallthrough
CT: control target
= control target key end

     0   :  { %vm165_vm0 = vcmask 1043456   ;;  %v6516_v3 = vmov 0.0   ;;  %vm4680_vm1 = vmmov 1   ;;  %vm80_vm3 = vcmask 228352   ;;  %s4682_s16 = smov 64   ;;  %s6502_s1 = inlined_call_operand.vmem [shape: f32[5,28,144], index: 1, kind: input, shape index: {}]   ;;  %s6503_s0 = inlined_call_operand.vmem [shape: f32[28,8,28], index: 0, kind: input, shape index: {}]   ;;  %s6504_s3 = inlined_call_operand.vmem [shape: f32[2,144,72], index: 3, kind: input, shape index: {}]   ;;  %s6505_s2 = inlined_call_operand.vmem [shape: f32[1,144], index: 2, kind: input, shape index: {}]   ;;  %s6506_s4 = inlined_call_operand.vmem [shape: f32[5,72,128], index: 4, kind: input, shape index: {}]   ;;  %s6507_s6 = inlined_call_operand.vmem [shape: f32[2,128,64], index: 6, kind: input, shape index: {}]   ;;  %s6508_s5 = inlined_call_operand.vmem [shape: f32[1,128], index: 5, kind: input, shape index: {}]   ;;  %s6509_s7 = inlined_call_operand.vmem [shape: f32[256,120], index: 7, kind: input, shape index: {}]   ;;  %s6510_s9 = inlined_call_operand.vmem [shape: f32[120,84], index: 9, kind: input, shape index: {}]   ;;  %s6511_s8 = inlined_call_operand.vmem [shape: f32[1,120], index: 8, kind: input, shape index: {}]   ;;  %s6512_s11 = inlined_call_operand.vmem [shape: f32[84,128], index: 11, kind: input, shape index: {}]   ;;  %s6513_s10 = inlined_call_operand.vmem [shape: f32[1,84], index: 10, kind: input, shape index: {}]   ;;  %s6514_s12 = inlined_call_operand.vmem [shape: f32[1,128], index: 12, kind: input, shape index: {}]   ;;  %s6515_s13 = inlined_call_operand.vmem [shape: f32[8,128], index: 13, kind: output, shape index: {}]  }
   0x1   :  { %v73_v0 = vld [vmem:[%s6502_s1 + $0x8] sm:$0xff]  ;;  %v75_v1 = vld [vmem:[%s6502_s1 + $0x18] sm:$0xff]  ;;  %v72_v2 = vld [vmem:[%s6502_s1] sm:$0xff]  ;;  %236 = vmatprep.mubr.f32.mxu0 %v6516_v3  ;;  %1344 = vmatprep.mubr.f32.mxu1 %v6516_v3  ;;  %vm1699_vm4 = vcmask 130048   ;;  %vm2026_vm5 = vcmask 588800   ;;  %vm2982_vm6 = vcmask 523264  }
   0x2   :  { %v4157_v4 = vpack.c.bf16 %v75_v1, %v73_v0  ;;  %v74_v5 = vld [vmem:[%s6502_s1 + $0x10] sm:$0xff]  ;;  %v77_v6 = vld [vmem:[%s6502_s1 + $0x28] sm:$0xff]  ;;  %v79_v7 = vld [vmem:[%s6502_s1 + $0x38] sm:$0xf]  ;;  %vm4683_vm7 = vmmov 0   ;;  %vm3117_vm8 = vcmask 982016  }
   0x3   :  { %v4159_v8 = vpack.c.bf16 %v74_v5, %v72_v2  ;;  %v4161_v9 = vpack.c.bf16 %v79_v7, %v77_v6  ;;  %vm4775_vm2 = vmpackc.low %vm165_vm0, %vm4680_vm1  ;;  %v76_v11 = vld [vmem:[%s6502_s1 + $0x20] sm:$0xff]  ;;  %v78_v12 = vld [vmem:[%s6502_s1 + $0x30] sm:$0xf]  ;;  %vm3210_vm9 = vcmask 687104  }
   0x4   :  { %4158 = vmatprep.subr.bf16.mxu0 %v4157_v4  ;;  %v3323_v13 = vld [vmem:[%s6502_s1 + $0x48] sm:$0xff]  ;;  %v3325_v14 = vld [vmem:[%s6502_s1 + $0x58] sm:$0xff]  ;;  %v4164_v15 = vpack.c.bf16 %v78_v12, %v76_v11  ;;  %v3322_v17 = vld [vmem:[%s6502_s1 + $0x40] sm:$0xff] }
   0x5   :  { %4160 = vmatpush1.bf16.msra.mxu0 %v4159_v8  ;;  %v4167_v16 = vpack.c.bf16 %v3325_v14, %v3323_v13  ;;  %v3324_v18 = vld [vmem:[%s6502_s1 + $0x50] sm:$0xff]  ;;  %v4804_v19 = vld [vmem:[%s6503_s0] sm:$0xff]  ;;  %v3327_v21 = vld [vmem:[%s6502_s1 + $0x68] sm:$0xff] }
   0x6   :  { %4163 = vmatprep.subr.msk.bf16.mxu0 %vm4775_vm2, %v4161_v9  ;;  %v4169_v20 = vpack.c.bf16 %v3324_v18, %v3322_v17  ;;  %v3329_v22 = vld [vmem:[%s6502_s1 + $0x78] sm:$0xf]  ;;  %v3326_v24 = vld [vmem:[%s6502_s1 + $0x60] sm:$0xff]  ;;  %v3328_v25 = vld [vmem:[%s6502_s1 + $0x70] sm:$0xf] }
   0x7   :  { %v4171_v23 = vpack.c.bf16 %v3329_v22, %v3327_v21  ;;  %v4824_v26 = vld [vmem:[%s6503_s0 + $0x8] sm:$0xff]  ;;  %v4174_v27 = vpack.c.bf16 %v3328_v25, %v3326_v24  ;;  %v3363_v29 = vld [vmem:[%s6502_s1 + $0x98] sm:$0xff]  ;;  %v4840_v30 = vld [vmem:[%s6503_s0 + $0x10] sm:$0xff] }
   0x8   :  { %v3361_v28 = vld [vmem:[%s6502_s1 + $0x88] sm:$0xff]  ;;  %v4850_v32 = vld [vmem:[%s6503_s0 + $0x18] sm:$0xff]  ;;  %v4858_v33 = vld [vmem:[%s6503_s0 + $0x20] sm:$0xff] }
   0x9   :  { %4166 = vmatpush1.bf16.msk.msra.mxu0 %vm4775_vm2, %v4164_v15  ;;  %v4177_v31 = vpack.c.bf16 %v3363_v29, %v3361_v28  ;;  %v4866_v34 = vld [vmem:[%s6503_s0 + $0x28] sm:$0xff]  ;;  %v4874_v35 = vld [vmem:[%s6503_s0 + $0x30] sm:$0xff]  ;;  %v4882_v36 = vld [vmem:[%s6503_s0 + $0x38] sm:$0xff] }
   0xa   :  { %4168 = vmatprep.subr.bf16.mxu0 %v4167_v16  ;;  %v4890_v37 = vld [vmem:[%s6503_s0 + $0x40] sm:$0xff]  ;;  %v4898_v38 = vld [vmem:[%s6503_s0 + $0x48] sm:$0xff]  ;;  %v4906_v39 = vld [vmem:[%s6503_s0 + $0x50] sm:$0xff] }
   0xb   :  { %v4914_v40 = vld [vmem:[%s6503_s0 + $0x58] sm:$0xff]  ;;  %v4922_v41 = vld [vmem:[%s6503_s0 + $0x60] sm:$0xff]  ;;  %v4930_v42 = vld [vmem:[%s6503_s0 + $0x68] sm:$0xff] }
   0xc   :  { %3294 = vmatmul.mubr.msk.f32.vlgmr.msra.gmra.mrb[0].mxu0 %vm80_vm3, %v4804_v19  ;;  %v4938_v43 = vld [vmem:[%s6503_s0 + $0x70] sm:$0xff]  ;;  %v4946_v44 = vld [vmem:[%s6503_s0 + $0x78] sm:$0xff]  ;;  %v4954_v45 = vld [vmem:[%s6503_s0 + $0x80] sm:$0xff] }
   0xd   :  { %4170 = vmatpush1.bf16.msra.mxu0 %v4169_v20  ;;  %242 = vmatprep.mubr.f32.mxu0 %v6516_v3  ;;  %v4962_v46 = vld [vmem:[%s6503_s0 + $0x88] sm:$0xff]  ;;  %v4970_v47 = vld [vmem:[%s6503_s0 + $0x90] sm:$0xff]  ;;  %v4978_v48 = vld [vmem:[%s6503_s0 + $0x98] sm:$0xff] }
   0xe   :  { %4173 = vmatprep.subr.msk.bf16.mxu0 %vm4775_vm2, %v4171_v23  ;;  %v4986_v49 = vld [vmem:[%s6503_s0 + $0xa0] sm:$0xff]  ;;  %v4994_v50 = vld [vmem:[%s6503_s0 + $0xa8] sm:$0xff]  ;;  %v5002_v51 = vld [vmem:[%s6503_s0 + $0xb0] sm:$0xff] }
   0xf   :  { %v5010_v52 = vld [vmem:[%s6503_s0 + $0xb8] sm:$0xff]  ;;  %v5018_v53 = vld [vmem:[%s6503_s0 + $0xc0] sm:$0xff]  ;;  %v5026_v54 = vld [vmem:[%s6503_s0 + $0xc8] sm:$0xff] }
  0x10   :  { %3295 = vmatmul.mubr.msk.f32.gmra.mrb[2].mxu0 %vm80_vm3, %v4824_v26  ;;  %v5034_v55 = vld [vmem:[%s6503_s0 + $0xd0] sm:$0xff]  ;;  %v5042_v56 = vld [vmem:[%s6503_s0 + $0xd8] sm:$0xff]  ;;  %v3360_v57 = vld [vmem:[%s6502_s1 + $0x80] sm:$0xff] }
  0x11   :  { %248 = vmatprep.mubr.f32.mxu0 %v6516_v3  ;;  %4176 = vmatpush1.bf16.msk.msra.mxu0 %vm4775_vm2, %v4174_v27  ;;  %v3362_v58 = vld [vmem:[%s6502_s1 + $0x90] sm:$0xff]  ;;  %v3365_v59 = vld [vmem:[%s6502_s1 + $0xa8] sm:$0xff]  ;;  %v3367_v60 = vld [vmem:[%s6502_s1 + $0xb8] sm:$0xf] }
  0x12   :  { %4178 = vmatprep.subr.bf16.mxu0 %v4177_v31  ;;  %v4179_v61 = vpack.c.bf16 %v3362_v58, %v3360_v57  ;;  %v4181_v62 = vpack.c.bf16 %v3367_v60, %v3365_v59  ;;  %v3364_v63 = vld [vmem:[%s6502_s1 + $0xa0] sm:$0xff]  ;;  %v3366_v0 = vld [vmem:[%s6502_s1 + $0xb0] sm:$0xf]  ;;  %v3399_v1 = vld [vmem:[%s6502_s1 + $0xc8] sm:$0xff]  ;;  %v6518_v60 = vmov 0.0|0.0  }
  0x13   :  { %v3401_v2 = vld [vmem:[%s6502_s1 + $0xd8] sm:$0xff]  ;;  %v4184_v4 = vpack.c.bf16 %v3366_v0, %v3364_v63  ;;  %v3437_v6 = vld [vmem:[%s6502_s1 + $0x108] sm:$0xff]  ;;  %v3436_v9 = vld [vmem:[%s6502_s1 + $0x100] sm:$0xff] }
  0x14   :  { %3296 = vmatmul.mubr.msk.f32.gmra.mrb[4].mxu0 %vm80_vm3, %v4840_v30  ;;  %v4187_v5 = vpack.c.bf16 %v3401_v2, %v3399_v1  ;;  %v3439_v7 = vld [vmem:[%s6502_s1 + $0x118] sm:$0xff]  ;;  %v3438_v11 = vld [vmem:[%s6502_s1 + $0x110] sm:$0xff]  ;;  %v3441_v13 = vld [vmem:[%s6502_s1 + $0x128] sm:$0xff] }
  0x15   :  { %254 = vmatprep.mubr.f32.mxu0 %v6516_v3  ;;  %v4197_v8 = vpack.c.bf16 %v3439_v7, %v3437_v6  ;;  %v5153_v12 = vpack.c.bf16 %v3438_v11, %v3436_v9  ;;  %v3443_v14 = vld [vmem:[%s6502_s1 + $0x138] sm:$0xf]  ;;  %v3440_v16 = vld [vmem:[%s6502_s1 + $0x120] sm:$0xff]  ;;  %v3442_v17 = vld [vmem:[%s6502_s1 + $0x130] sm:$0xf] }
  0x16   :  { %v5165_v15 = vpack.c.bf16 %v3443_v14, %v3441_v13  ;;  %v5173_v18 = vpack.c.bf16 %v3442_v17, %v3440_v16  ;;  %v3398_v20 = vld [vmem:[%s6502_s1 + $0xc0] sm:$0xff]  ;;  %v3400_v21 = vld [vmem:[%s6502_s1 + $0xd0] sm:$0xff]  ;;  %v3403_v22 = vld [vmem:[%s6502_s1 + $0xe8] sm:$0xff] }
  0x17   :  { %4473 = vmatprep.subr.bf16.mxu1 %v4197_v8  ;;  %v3405_v23 = vld [vmem:[%s6502_s1 + $0xf8] sm:$0xf]  ;;  %v4189_v24 = vpack.c.bf16 %v3400_v21, %v3398_v20  ;;  %v3402_v27 = vld [vmem:[%s6502_s1 + $0xe0] sm:$0xff]  ;;  %v3404_v28 = vld [vmem:[%s6502_s1 + $0xf0] sm:$0xf] }
  0x18   :  { %3297 = vmatmul.mubr.msk.f32.gmra.mrb[6].mxu0 %vm80_vm3, %v4850_v32  ;;  %4475 = vmatpush1.bf16.msra.mxu1 %v5153_v12  ;;  %v4191_v25 = vpack.c.bf16 %v3405_v23, %v3403_v22  ;;  %v4194_v29 = vpack.c.bf16 %v3404_v28, %v3402_v27  ;;  %v1683_v63 = vld [vmem:[%s6504_s3 + $0x10] sm:$0xff]  ;;  %v1684_v1 = vld [vmem:[%s6504_s3 + $0x18] sm:$0xff]  ;;  %v1685_v6 = vld [vmem:[%s6504_s3 + $0x20] sm:$0xff] }
  0x19   :  { %260 = vmatprep.mubr.f32.mxu0 %v6516_v3  ;;  %4474 = vmatprep.subr.msk.bf16.mxu1 %vm4775_vm2, %v5165_v15  ;;  %v1686_v7 = vld [vmem:[%s6504_s3 + $0x28] sm:$0xff]  ;;  %v1695_v20 = vld [vmem:[%s6504_s3 + $0x70] sm:$0xff]  ;;  %v1696_v21 = vld [vmem:[%s6504_s3 + $0x78] sm:$0xff] }
  0x1a   :  { %v4214_v11 = vpack.c.bf16 %v1686_v7, %v1685_v6  ;;  %v4229_v22 = vpack.c.bf16 %v1696_v21, %v1695_v20  ;;  %v1697_v27 = vld [vmem:[%s6504_s3 + $0x80] sm:$0xff]  ;;  %v1698_v28 = vld [vmem:[%s6504_s3 + $0x88] sm:$0xff]  ;;  %v1551_v20 = vlaneseq }
  0x1c   :  { %3298 = vmatmul.mubr.msk.f32.gmra.mrb[8].mxu0 %vm80_vm3, %v4858_v33  ;;  %4476 = vmatpush1.bf16.msk.msra.mxu1 %vm4775_vm2, %v5173_v18 }
  0x1d   :  { %266 = vmatprep.mubr.f32.mxu0 %v6516_v3  ;;  %4207 = vmatprep.subr.bf16.mxu1 %v6518_v60 }
  0x1f   :  { %3447 = vmatmul.mubr.msk.f32.vlgmr.msra.gmra.mrb[0].mxu1 %vm80_vm3, %v4824_v26 }
  0x20   :  { %3299 = vmatmul.mubr.msk.f32.gmra.mrb[10].mxu0 %vm80_vm3, %v4866_v34  ;;  %1348 = vmatprep.mubr.f32.mxu1 %v6516_v3 }
  0x21   :  { %272 = vmatprep.mubr.f32.mxu0 %v6516_v3 }
  0x23   :  { %3448 = vmatmul.mubr.msk.f32.gmra.mrb[2].mxu1 %vm80_vm3, %v4840_v30 }
  0x24   :  { %3300 = vmatmul.mubr.msk.f32.gmra.mrb[12].mxu0 %vm80_vm3, %v4874_v35  ;;  %1352 = vmatprep.mubr.f32.mxu1 %v6516_v3 }
  0x25   :  { %278 = vmatprep.mubr.f32.mxu0 %v6516_v3 }
  0x27   :  { %3449 = vmatmul.mubr.msk.f32.gmra.mrb[4].mxu1 %vm80_vm3, %v4850_v32 }
  0x28   :  { %3301 = vmatmul.mubr.msk.f32.gmra.mrb[14].mxu0 %vm80_vm3, %v4882_v36  ;;  %1356 = vmatprep.mubr.f32.mxu1 %v6516_v3 }
  0x29   :  { %284 = vmatprep.mubr.f32.mxu0 %v6516_v3 }
  0x2b   :  { %3450 = vmatmul.mubr.msk.f32.gmra.mrb[6].mxu1 %vm80_vm3, %v4858_v33 }
  0x2c   :  { %3302 = vmatmul.mubr.msk.f32.gmra.mrb[16].mxu0 %vm80_vm3, %v4890_v37  ;;  %1362 = vmatprep.mubr.f32.mxu1 %v6516_v3 }
  0x2d   :  { %290 = vmatprep.mubr.f32.mxu0 %v6516_v3 }
  0x2f   :  { %3451 = vmatmul.mubr.msk.f32.gmra.mrb[8].mxu1 %vm80_vm3, %v4866_v34 }
  0x30   :  { %3303 = vmatmul.mubr.msk.f32.gmra.mrb[18].mxu0 %vm80_vm3, %v4898_v38  ;;  %1368 = vmatprep.mubr.f32.mxu1 %v6516_v3 }
  0x31   :  { %296 = vmatprep.mubr.f32.mxu0 %v6516_v3 }
  0x33   :  { %3452 = vmatmul.mubr.msk.f32.gmra.mrb[10].mxu1 %vm80_vm3, %v4874_v35 }
  0x34   :  { %3304 = vmatmul.mubr.msk.f32.gmra.mrb[20].mxu0 %vm80_vm3, %v4906_v39  ;;  %1374 = vmatprep.mubr.f32.mxu1 %v6516_v3 }
  0x35   :  { %302 = vmatprep.mubr.f32.mxu0 %v6516_v3 }
  0x37   :  { %3453 = vmatmul.mubr.msk.f32.gmra.mrb[12].mxu1 %vm80_vm3, %v4882_v36 }
  0x38   :  { %3305 = vmatmul.mubr.msk.f32.gmra.mrb[22].mxu0 %vm80_vm3, %v4914_v40  ;;  %1380 = vmatprep.mubr.f32.mxu1 %v6516_v3 }
  0x39   :  { %308 = vmatprep.mubr.f32.mxu0 %v6516_v3 }
  0x3b   :  { %3454 = vmatmul.mubr.msk.f32.gmra.mrb[14].mxu1 %vm80_vm3, %v4890_v37 }
  0x3c   :  { %3306 = vmatmul.mubr.msk.f32.gmra.mrb[24].mxu0 %vm80_vm3, %v4922_v41  ;;  %1386 = vmatprep.mubr.f32.mxu1 %v6516_v3 }
  0x3d   :  { %314 = vmatprep.mubr.f32.mxu0 %v6516_v3 }
  0x3f   :  { %3455 = vmatmul.mubr.msk.f32.gmra.mrb[16].mxu1 %vm80_vm3, %v4898_v38 }
  0x40   :  { %3307 = vmatmul.mubr.msk.f32.gmra.mrb[26].mxu0 %vm80_vm3, %v4930_v42  ;;  %1392 = vmatprep.mubr.f32.mxu1 %v6516_v3 }
  0x41   :  { %320 = vmatprep.mubr.f32.mxu0 %v6516_v3 }
  0x43   :  { %3456 = vmatmul.mubr.msk.f32.gmra.mrb[18].mxu1 %vm80_vm3, %v4906_v39 }
  0x44   :  { %3308 = vmatmul.mubr.msk.f32.gmra.mrb[28].mxu0 %vm80_vm3, %v4938_v43  ;;  %1398 = vmatprep.mubr.f32.mxu1 %v6516_v3 }
  0x45   :  { %326 = vmatprep.mubr.f32.mxu0 %v6516_v3 }
  0x47   :  { %3457 = vmatmul.mubr.msk.f32.gmra.mrb[20].mxu1 %vm80_vm3, %v4914_v40 }
  0x48   :  { %3309 = vmatmul.mubr.msk.f32.gmra.mrb[30].mxu0 %vm80_vm3, %v4946_v44  ;;  %1404 = vmatprep.mubr.f32.mxu1 %v6516_v3 }
  0x49   :  { %332 = vmatprep.mubr.f32.mxu0 %v6516_v3 }
  0x4b   :  { %3458 = vmatmul.mubr.msk.f32.gmra.mrb[22].mxu1 %vm80_vm3, %v4922_v41 }
  0x4c   :  { %3310 = vmatmul.mubr.msk.f32.gmra.mrb[32].mxu0 %vm80_vm3, %v4954_v45  ;;  %1410 = vmatprep.mubr.f32.mxu1 %v6516_v3 }
  0x4d   :  { %338 = vmatprep.mubr.f32.mxu0 %v6516_v3 }
  0x4f   :  { %3459 = vmatmul.mubr.msk.f32.gmra.mrb[24].mxu1 %vm80_vm3, %v4930_v42 }
  0x50   :  { %3311 = vmatmul.mubr.msk.f32.gmra.mrb[34].mxu0 %vm80_vm3, %v4962_v46  ;;  %1416 = vmatprep.mubr.f32.mxu1 %v6516_v3 }
  0x51   :  { %344 = vmatprep.mubr.f32.mxu0 %v6516_v3 }
  0x53   :  { %3460 = vmatmul.mubr.msk.f32.gmra.mrb[26].mxu1 %vm80_vm3, %v4938_v43 }
  0x54   :  { %3312 = vmatmul.mubr.msk.f32.gmra.mrb[36].mxu0 %vm80_vm3, %v4970_v47  ;;  %1422 = vmatprep.mubr.f32.mxu1 %v6516_v3 }
  0x55   :  { %350 = vmatprep.mubr.f32.mxu0 %v6516_v3 }
  0x57   :  { %3461 = vmatmul.mubr.msk.f32.gmra.mrb[28].mxu1 %vm80_vm3, %v4946_v44 }
  0x58   :  { %3313 = vmatmul.mubr.msk.f32.gmra.mrb[38].mxu0 %vm80_vm3, %v4978_v48  ;;  %1428 = vmatprep.mubr.f32.mxu1 %v6516_v3 }
  0x59   :  { %356 = vmatprep.mubr.f32.mxu0 %v6516_v3 }
  0x5b   :  { %3462 = vmatmul.mubr.msk.f32.gmra.mrb[30].mxu1 %vm80_vm3, %v4954_v45 }
  0x5c   :  { %3314 = vmatmul.mubr.msk.f32.gmra.mrb[40].mxu0 %vm80_vm3, %v4986_v49  ;;  %1434 = vmatprep.mubr.f32.mxu1 %v6516_v3 }
  0x5d   :  { %362 = vmatprep.mubr.f32.mxu0 %v6516_v3 }
  0x5f   :  { %3463 = vmatmul.mubr.msk.f32.gmra.mrb[32].mxu1 %vm80_vm3, %v4962_v46 }
  0x60   :  { %3315 = vmatmul.mubr.msk.f32.gmra.mrb[42].mxu0 %vm80_vm3, %v4994_v50  ;;  %1440 = vmatprep.mubr.f32.mxu1 %v6516_v3 }
  0x61   :  { %368 = vmatprep.mubr.f32.mxu0 %v6516_v3 }
  0x63   :  { %3464 = vmatmul.mubr.msk.f32.gmra.mrb[34].mxu1 %vm80_vm3, %v4970_v47 }
  0x64   :  { %3316 = vmatmul.mubr.msk.f32.gmra.mrb[44].mxu0 %vm80_vm3, %v5002_v51  ;;  %1446 = vmatprep.mubr.f32.mxu1 %v6516_v3 }
  0x65   :  { %374 = vmatprep.mubr.f32.mxu0 %v6516_v3 }
  0x67   :  { %3465 = vmatmul.mubr.msk.f32.gmra.mrb[36].mxu1 %vm80_vm3, %v4978_v48 }
  0x68   :  { %3317 = vmatmul.mubr.msk.f32.gmra.mrb[46].mxu0 %vm80_vm3, %v5010_v52  ;;  %1452 = vmatprep.mubr.f32.mxu1 %v6516_v3 }
  0x69   :  { %380 = vmatprep.mubr.f32.mxu0 %v6516_v3 }
  0x6b   :  { %3466 = vmatmul.mubr.msk.f32.gmra.mrb[38].mxu1 %vm80_vm3, %v4986_v49 }
  0x6c   :  { %3318 = vmatmul.mubr.msk.f32.gmra.mrb[48].mxu0 %vm80_vm3, %v5018_v53  ;;  %1458 = vmatprep.mubr.f32.mxu1 %v6516_v3 }
  0x6d   :  { %384 = vmatprep.mubr.f32.mxu0 %v6516_v3 }
  0x6f   :  { %3467 = vmatmul.mubr.msk.f32.gmra.mrb[40].mxu1 %vm80_vm3, %v4994_v50 }
  0x70   :  { %3319 = vmatmul.mubr.msk.f32.gmra.mrb[50].mxu0 %vm80_vm3, %v5026_v54  ;;  %1464 = vmatprep.mubr.f32.mxu1 %v6516_v3 }
  0x71   :  { %388 = vmatprep.mubr.f32.mxu0 %v6516_v3 }
  0x73   :  { %3468 = vmatmul.mubr.msk.f32.gmra.mrb[42].mxu1 %vm80_vm3, %v5002_v51 }
  0x74   :  { %3320 = vmatmul.mubr.msk.f32.gmra.mrb[52].mxu0 %vm80_vm3, %v5034_v55  ;;  %1470 = vmatprep.mubr.f32.mxu1 %v6516_v3 }
  0x75   :  { %392 = vmatprep.mubr.f32.mxu0 %v6516_v3 }
  0x77   :  { %3469 = vmatmul.mubr.msk.f32.gmra.mrb[44].mxu1 %vm80_vm3, %v5010_v52 }
  0x78   :  { %3321 = vmatmul.mubr.msk.f32.gmra.mrb[54].mxu0 %vm80_vm3, %v5042_v56  ;;  %1476 = vmatprep.mubr.f32.mxu1 %v6516_v3 }
  0x79   :  { %476 = vmatprep.mubr.f32.mxu0 %v6516_v3 }
  0x7b   :  { %3470 = vmatmul.mubr.msk.f32.gmra.mrb[46].mxu1 %vm80_vm3, %v5018_v53 }
  0x7c   :  { %3332 = vmatmul.mubr.msk.f32.vlgmr.msra.gmra.mrb[56].mxu0 %vm80_vm3, %v4804_v19  ;;  %1482 = vmatprep.mubr.f32.mxu1 %v6516_v3 }
  0x7d   :  { %4180 = vmatpush1.bf16.msra.mxu0 %v4179_v61  ;;  %480 = vmatprep.mubr.f32.mxu0 %v6516_v3  ;;  %v1681_v61 = vld [vmem:[%s6504_s3] sm:$0xff] }
  0x7e   :  { %4183 = vmatprep.subr.msk.bf16.mxu0 %vm4775_vm2, %v4181_v62  ;;  %v1682_v62 = vld [vmem:[%s6504_s3 + $0x8] sm:$0xff] }
  0x7f   :  { %3471 = vmatmul.mubr.msk.f32.gmra.mrb[48].mxu1 %vm80_vm3, %v5026_v54  ;;  %v4208_v0 = vpack.c.bf16 %v1682_v62, %v1681_v61 }
  0x80   :  { %3333 = vmatmul.mubr.msk.f32.gmra.mrb[0].mxu0 %vm80_vm3, %v4824_v26  ;;  %1488 = vmatprep.mubr.f32.mxu1 %v6516_v3 }
  0x81   :  { %486 = vmatprep.mubr.f32.mxu0 %v6516_v3  ;;  %4186 = vmatpush1.bf16.msk.msra.mxu0 %vm4775_vm2, %v4184_v4 }
  0x82   :  { %4188 = vmatprep.subr.bf16.mxu0 %v4187_v5  ;;  %4209 = vmatpush1.bf16.msra.mxu1 %v4208_v0  ;;  %v4211_v5 = vpack.c.bf16 %v1684_v1, %v1683_v63 }
  0x83   :  { %3472 = vmatmul.mubr.msk.f32.gmra.mrb[50].mxu1 %vm80_vm3, %v5034_v55  ;;  %4210 = vmatprep.subr.bf16.mxu1 %v6518_v60 }
  0x84   :  { %3334 = vmatmul.mubr.msk.f32.gmra.mrb[2].mxu0 %vm80_vm3, %v4840_v30  ;;  %1494 = vmatprep.mubr.f32.mxu1 %v6516_v3 }
  0x85   :  { %492 = vmatprep.mubr.f32.mxu0 %v6516_v3 }
  0x86   :  { %4212 = vmatpush1.bf16.msra.mxu1 %v4211_v5 }
  0x87   :  { %3473 = vmatmul.mubr.msk.f32.gmra.mrb[52].mxu1 %vm80_vm3, %v5042_v56  ;;  %4213 = vmatprep.subr.bf16.mxu1 %v6518_v60 }
  0x88   :  { %3335 = vmatmul.mubr.msk.f32.gmra.mrb[4].mxu0 %vm80_vm3, %v4850_v32 }
  0x89   :  { %498 = vmatprep.mubr.f32.mxu0 %v6516_v3 }
  0x8a   :  { %4215 = vmatpush1.bf16.msra.mxu1 %v4214_v11 }
  0x8b   :  { %4216 = vmatprep.subr.bf16.mxu1 %v6518_v60 }
  0x8c   :  { %3336 = vmatmul.mubr.msk.f32.gmra.mrb[6].mxu0 %vm80_vm3, %v4858_v33 }
  0x8d   :  { %504 = vmatprep.mubr.f32.mxu0 %v6516_v3 }
  0x90   :  { %3337 = vmatmul.mubr.msk.f32.gmra.mrb[8].mxu0 %vm80_vm3, %v4866_v34 }
  0x91   :  { %510 = vmatprep.mubr.f32.mxu0 %v6516_v3 }
  0x94   :  { %3338 = vmatmul.mubr.msk.f32.gmra.mrb[10].mxu0 %vm80_vm3, %v4874_v35 }
  0x95   :  { %516 = vmatprep.mubr.f32.mxu0 %v6516_v3 }
  0x98   :  { %3339 = vmatmul.mubr.msk.f32.gmra.mrb[12].mxu0 %vm80_vm3, %v4882_v36 }
  0x99   :  { %522 = vmatprep.mubr.f32.mxu0 %v6516_v3 }
  0x9c   :  { %3340 = vmatmul.mubr.msk.f32.gmra.mrb[14].mxu0 %vm80_vm3, %v4890_v37 }
  0x9d   :  { %528 = vmatprep.mubr.f32.mxu0 %v6516_v3 }
  0xa0   :  { %3341 = vmatmul.mubr.msk.f32.gmra.mrb[16].mxu0 %vm80_vm3, %v4898_v38 }
  0xa1   :  { %534 = vmatprep.mubr.f32.mxu0 %v6516_v3 }
  0xa4   :  { %3342 = vmatmul.mubr.msk.f32.gmra.mrb[18].mxu0 %vm80_vm3, %v4906_v39 }
  0xa5   :  { %540 = vmatprep.mubr.f32.mxu0 %v6516_v3 }
  0xa8   :  { %3343 = vmatmul.mubr.msk.f32.gmra.mrb[20].mxu0 %vm80_vm3, %v4914_v40 }
  0xa9   :  { %546 = vmatprep.mubr.f32.mxu0 %v6516_v3 }
  0xac   :  { %3344 = vmatmul.mubr.msk.f32.gmra.mrb[22].mxu0 %vm80_vm3, %v4922_v41 }
  0xad   :  { %552 = vmatprep.mubr.f32.mxu0 %v6516_v3 }
  0xb0   :  { %3345 = vmatmul.mubr.msk.f32.gmra.mrb[24].mxu0 %vm80_vm3, %v4930_v42 }
  0xb1   :  { %558 = vmatprep.mubr.f32.mxu0 %v6516_v3 }
  0xb4   :  { %3346 = vmatmul.mubr.msk.f32.gmra.mrb[26].mxu0 %vm80_vm3, %v4938_v43 }
  0xb5   :  { %564 = vmatprep.mubr.f32.mxu0 %v6516_v3 }
  0xb8   :  { %3347 = vmatmul.mubr.msk.f32.gmra.mrb[28].mxu0 %vm80_vm3, %v4946_v44 }
  0xb9   :  { %570 = vmatprep.mubr.f32.mxu0 %v6516_v3 }
  0xbc   :  { %3348 = vmatmul.mubr.msk.f32.gmra.mrb[30].mxu0 %vm80_vm3, %v4954_v45 }
  0xbd   :  { %576 = vmatprep.mubr.f32.mxu0 %v6516_v3 }
  0xc0   :  { %3349 = vmatmul.mubr.msk.f32.gmra.mrb[32].mxu0 %vm80_vm3, %v4962_v46 }
  0xc1   :  { %582 = vmatprep.mubr.f32.mxu0 %v6516_v3 }
  0xc4   :  { %3350 = vmatmul.mubr.msk.f32.gmra.mrb[34].mxu0 %vm80_vm3, %v4970_v47 }
  0xc5   :  { %588 = vmatprep.mubr.f32.mxu0 %v6516_v3 }
  0xc8   :  { %3351 = vmatmul.mubr.msk.f32.gmra.mrb[36].mxu0 %vm80_vm3, %v4978_v48 }
  0xc9   :  { %594 = vmatprep.mubr.f32.mxu0 %v6516_v3 }
  0xcc   :  { %3352 = vmatmul.mubr.msk.f32.gmra.mrb[38].mxu0 %vm80_vm3, %v4986_v49 }
  0xcd   :  { %600 = vmatprep.mubr.f32.mxu0 %v6516_v3 }
  0xd0   :  { %3353 = vmatmul.mubr.msk.f32.gmra.mrb[40].mxu0 %vm80_vm3, %v4994_v50 }
  0xd1   :  { %606 = vmatprep.mubr.f32.mxu0 %v6516_v3 }
  0xd4   :  { %3354 = vmatmul.mubr.msk.f32.gmra.mrb[42].mxu0 %vm80_vm3, %v5002_v51 }
  0xd5   :  { %612 = vmatprep.mubr.f32.mxu0 %v6516_v3 }
  0xd8   :  { %3355 = vmatmul.mubr.msk.f32.gmra.mrb[44].mxu0 %vm80_vm3, %v5010_v52 }
  0xd9   :  { %618 = vmatprep.mubr.f32.mxu0 %v6516_v3 }
  0xdc   :  { %3356 = vmatmul.mubr.msk.f32.gmra.mrb[46].mxu0 %vm80_vm3, %v5018_v53 }
  0xdd   :  { %624 = vmatprep.mubr.f32.mxu0 %v6516_v3 }
  0xe0   :  { %3357 = vmatmul.mubr.msk.f32.gmra.mrb[58].mxu0 %vm80_vm3, %v5026_v54 }
  0xe1   :  { %628 = vmatprep.mubr.f32.mxu0 %v6516_v3 }
  0xe4   :  { %3358 = vmatmul.mubr.msk.f32.gmra.mrb[60].mxu0 %vm80_vm3, %v5034_v55 }
  0xe5   :  { %632 = vmatprep.mubr.f32.mxu0 %v6516_v3 }
  0xe8   :  { %3359 = vmatmul.mubr.msk.f32.gmra.mrb[62].mxu0 %vm80_vm3, %v5042_v56 }
  0xe9   :  { %764 = vmatprep.mubr.f32.mxu0 %v6516_v3 }
  0xec   :  { %3370 = vmatmul.mubr.msk.f32.vlgmr.msra.gmra.mrb[64].mxu0 %vm80_vm3, %v4804_v19 }
  0xed   :  { %4190 = vmatpush1.bf16.msra.mxu0 %v4189_v24  ;;  %768 = vmatprep.mubr.f32.mxu0 %v6516_v3 }
  0xee   :  { %4193 = vmatprep.subr.msk.bf16.mxu0 %vm4775_vm2, %v4191_v25 }
  0xf0   :  { %3371 = vmatmul.mubr.msk.f32.gmra.mrb[66].mxu0 %vm80_vm3, %v4824_v26 }
  0xf1   :  { %772 = vmatprep.mubr.f32.mxu0 %v6516_v3  ;;  %4196 = vmatpush1.bf16.msk.msra.mxu0 %vm4775_vm2, %v4194_v29  ;;  %v4232_v29 = vpack.c.bf16 %v1698_v28, %v1697_v27 }
  0xf2   :  { %4198 = vmatprep.subr.bf16.mxu0 %v4197_v8  ;;  %v1346_v10 = vpop.f32.mrb[0].mxu1 }
  0xf4   :  { %3372 = vmatmul.mubr.msk.f32.gmra.mrb[0].mxu0 %vm80_vm3, %v4840_v30 }
  0xf5   :  { %778 = vmatprep.mubr.f32.mxu0 %v6516_v3 }
  0xf8   :  { %3373 = vmatmul.mubr.msk.f32.gmra.mrb[2].mxu0 %vm80_vm3, %v4850_v32 }
  0xf9   :  { %784 = vmatprep.mubr.f32.mxu0 %v6516_v3 }
  0xfc   :  { %3374 = vmatmul.mubr.msk.f32.gmra.mrb[4].mxu0 %vm80_vm3, %v4858_v33 }
  0xfd   :  { %790 = vmatprep.mubr.f32.mxu0 %v6516_v3 }
 0x100   :  { %3375 = vmatmul.mubr.msk.f32.gmra.mrb[6].mxu0 %vm80_vm3, %v4866_v34 }
 0x101   :  { %796 = vmatprep.mubr.f32.mxu0 %v6516_v3 }
 0x104   :  { %3376 = vmatmul.mubr.msk.f32.gmra.mrb[8].mxu0 %vm80_vm3, %v4874_v35 }
 0x105   :  { %802 = vmatprep.mubr.f32.mxu0 %v6516_v3 }
 0x108   :  { %3377 = vmatmul.mubr.msk.f32.gmra.mrb[10].mxu0 %vm80_vm3, %v4882_v36 }
 0x109   :  { %808 = vmatprep.mubr.f32.mxu0 %v6516_v3 }
 0x10c   :  { %3378 = vmatmul.mubr.msk.f32.gmra.mrb[12].mxu0 %vm80_vm3, %v4890_v37 }
 0x10d   :  { %814 = vmatprep.mubr.f32.mxu0 %v6516_v3 }
 0x110   :  { %3379 = vmatmul.mubr.msk.f32.gmra.mrb[14].mxu0 %vm80_vm3, %v4898_v38 }
 0x111   :  { %820 = vmatprep.mubr.f32.mxu0 %v6516_v3 }
 0x114   :  { %3380 = vmatmul.mubr.msk.f32.gmra.mrb[16].mxu0 %vm80_vm3, %v4906_v39 }
 0x115   :  { %826 = vmatprep.mubr.f32.mxu0 %v6516_v3 }
 0x118   :  { %3381 = vmatmul.mubr.msk.f32.gmra.mrb[18].mxu0 %vm80_vm3, %v4914_v40 }
 0x119   :  { %832 = vmatprep.mubr.f32.mxu0 %v6516_v3 }
 0x11c   :  { %3382 = vmatmul.mubr.msk.f32.gmra.mrb[20].mxu0 %vm80_vm3, %v4922_v41 }
 0x11d   :  { %838 = vmatprep.mubr.f32.mxu0 %v6516_v3 }
 0x120   :  { %3383 = vmatmul.mubr.msk.f32.gmra.mrb[22].mxu0 %vm80_vm3, %v4930_v42 }
 0x121   :  { %844 = vmatprep.mubr.f32.mxu0 %v6516_v3 }
 0x124   :  { %3384 = vmatmul.mubr.msk.f32.gmra.mrb[24].mxu0 %vm80_vm3, %v4938_v43 }
 0x125   :  { %850 = vmatprep.mubr.f32.mxu0 %v6516_v3 }
 0x128   :  { %3385 = vmatmul.mubr.msk.f32.gmra.mrb[26].mxu0 %vm80_vm3, %v4946_v44 }
 0x129   :  { %856 = vmatprep.mubr.f32.mxu0 %v6516_v3 }
 0x12c   :  { %3386 = vmatmul.mubr.msk.f32.gmra.mrb[28].mxu0 %vm80_vm3, %v4954_v45 }
 0x12d   :  { %862 = vmatprep.mubr.f32.mxu0 %v6516_v3 }
 0x130   :  { %3387 = vmatmul.mubr.msk.f32.gmra.mrb[30].mxu0 %vm80_vm3, %v4962_v46 }
 0x131   :  { %868 = vmatprep.mubr.f32.mxu0 %v6516_v3 }
 0x134   :  { %3388 = vmatmul.mubr.msk.f32.gmra.mrb[32].mxu0 %vm80_vm3, %v4970_v47 }
 0x135   :  { %874 = vmatprep.mubr.f32.mxu0 %v6516_v3 }
 0x138   :  { %3389 = vmatmul.mubr.msk.f32.gmra.mrb[34].mxu0 %vm80_vm3, %v4978_v48 }
 0x139   :  { %880 = vmatprep.mubr.f32.mxu0 %v6516_v3 }
 0x13c   :  { %3390 = vmatmul.mubr.msk.f32.gmra.mrb[36].mxu0 %vm80_vm3, %v4986_v49 }
 0x13d   :  { %886 = vmatprep.mubr.f32.mxu0 %v6516_v3 }
 0x13f   :  { %v382_v31 = vpop.f32.mrb[48].mxu0 }
 0x140   :  { %v383_v57 = vpop.f32.mrb[49].mxu0  ;;  %3391 = vmatmul.mubr.msk.f32.gmra.mrb[38].mxu0 %vm80_vm3, %v4994_v50 }
 0x141   :  { %892 = vmatprep.mubr.f32.mxu0 %v6516_v3 }
 0x143   :  { %v386_v58 = vpop.f32.mrb[50].mxu0 }
 0x144   :  { %v387_v59 = vpop.f32.mrb[51].mxu0  ;;  %3392 = vmatmul.mubr.msk.f32.gmra.mrb[40].mxu0 %vm80_vm3, %v5002_v51 }
 0x145   :  { %898 = vmatprep.mubr.f32.mxu0 %v6516_v3 }
 0x147   :  { %v390_v2 = vpop.f32.mrb[52].mxu0 }
 0x148   :  { %v391_v4 = vpop.f32.mrb[53].mxu0  ;;  %3393 = vmatmul.mubr.msk.f32.gmra.mrb[42].mxu0 %vm80_vm3, %v5010_v52 }
 0x149   :  { %904 = vmatprep.mubr.f32.mxu0 %v6516_v3 }
 0x14b   :  { %v394_v8 = vpop.f32.mrb[54].mxu0 }
 0x14c   :  { %v395_v9 = vpop.f32.mrb[55].mxu0  ;;  %3394 = vmatmul.mubr.msk.f32.gmra.mrb[44].mxu0 %vm80_vm3, %v5018_v53 }
 0x14d   :  { %910 = vmatprep.mubr.f32.mxu0 %v6516_v3 }
 0x14f   :  { %v478_v13 = vpop.f32.mrb[56].mxu0 }
 0x150   :  { %v479_v14 = vpop.f32.mrb[57].mxu0  ;;  %3395 = vmatmul.mubr.msk.f32.gmra.mrb[46].mxu0 %vm80_vm3, %v5026_v54 }
 0x151   :  { %916 = vmatprep.mubr.f32.mxu0 %v6516_v3 }
 0x154   :  { %3396 = vmatmul.mubr.msk.f32.gmra.mrb[68].mxu0 %vm80_vm3, %v5034_v55 }
 0x155   :  { %920 = vmatprep.mubr.f32.mxu0 %v6516_v3 }
 0x158   :  { %3397 = vmatmul.mubr.msk.f32.gmra.mrb[70].mxu0 %vm80_vm3, %v5042_v56 }
 0x159   :  { %1052 = vmatprep.mubr.f32.mxu0 %v6516_v3 }
 0x15c   :  { %3408 = vmatmul.mubr.msk.f32.vlgmr.msra.gmra.mrb[72].mxu0 %vm80_vm3, %v4804_v19 }
 0x15d   :  { %1056 = vmatprep.mubr.f32.mxu0 %v6516_v3  ;;  %4200 = vmatpush1.bf16.msra.mxu0 %v5153_v12  ;;  %v1694_v12 = vld [vmem:[%s6504_s3 + $0x68] sm:$0xff] }
 0x15e   :  { %4203 = vmatprep.subr.msk.bf16.mxu0 %vm4775_vm2, %v5165_v15 }
 0x160   :  { %3409 = vmatmul.mubr.msk.f32.gmra.mrb[74].mxu0 %vm80_vm3, %v4824_v26  ;;  %v1687_v26 = vld [vmem:[%s6504_s3 + $0x30] sm:$0xff] }
 0x161   :  { %1060 = vmatprep.mubr.f32.mxu0 %v6516_v3  ;;  %4206 = vmatpush1.bf16.msk.msra.mxu0 %vm4775_vm2, %v5173_v18 }
 0x164   :  { %3410 = vmatmul.mubr.msk.f32.gmra.mrb[76].mxu0 %vm80_vm3, %v4840_v30  ;;  %v1688_v30 = vld [vmem:[%s6504_s3 + $0x38] sm:$0xff] }
 0x165   :  { %1064 = vmatprep.mubr.f32.mxu0 %v6516_v3 }
 0x168   :  { %3411 = vmatmul.mubr.msk.f32.gmra.mrb[0].mxu0 %vm80_vm3, %v4850_v32  ;;  %v1347_v32 = vpop.f32.mrb[1].mxu1 }
 0x169   :  { %1070 = vmatprep.mubr.f32.mxu0 %v6516_v3 }
 0x16c   :  { %3412 = vmatmul.mubr.msk.f32.gmra.mrb[2].mxu0 %vm80_vm3, %v4858_v33  ;;  %v4217_v33 = vpack.c.bf16 %v1688_v30, %v1687_v26 }
 0x16d   :  { %1076 = vmatprep.mubr.f32.mxu0 %v6516_v3 }
 0x16e   :  { %4218 = vmatpush1.bf16.msra.mxu1 %v4217_v33 }
 0x16f   :  { %4219 = vmatprep.subr.bf16.mxu1 %v6518_v60 }
 0x170   :  { %3413 = vmatmul.mubr.msk.f32.gmra.mrb[4].mxu0 %vm80_vm3, %v4866_v34  ;;  %v1350_v34 = vpop.f32.mrb[2].mxu1 }
 0x171   :  { %1082 = vmatprep.mubr.f32.mxu0 %v6516_v3 }
 0x174   :  { %3414 = vmatmul.mubr.msk.f32.gmra.mrb[6].mxu0 %vm80_vm3, %v4874_v35 }
 0x175   :  { %1088 = vmatprep.mubr.f32.mxu0 %v6516_v3 }
 0x178   :  { %3415 = vmatmul.mubr.msk.f32.gmra.mrb[8].mxu0 %vm80_vm3, %v4882_v36  ;;  %v1351_v36 = vpop.f32.mrb[3].mxu1 }
 0x179   :  { %1094 = vmatprep.mubr.f32.mxu0 %v6516_v3 }
 0x17c   :  { %3416 = vmatmul.mubr.msk.f32.gmra.mrb[10].mxu0 %vm80_vm3, %v4890_v37 }
 0x17d   :  { %1100 = vmatprep.mubr.f32.mxu0 %v6516_v3 }
 0x180   :  { %3417 = vmatmul.mubr.msk.f32.gmra.mrb[12].mxu0 %vm80_vm3, %v4898_v38  ;;  %v1689_v38 = vld [vmem:[%s6504_s3 + $0x40] sm:$0xff] }
 0x181   :  { %1106 = vmatprep.mubr.f32.mxu0 %v6516_v3 }
 0x184   :  { %3418 = vmatmul.mubr.msk.f32.gmra.mrb[14].mxu0 %vm80_vm3, %v4906_v39  ;;  %v1690_v39 = vld [vmem:[%s6504_s3 + $0x48] sm:$0xff] }
 0x185   :  { %1112 = vmatprep.mubr.f32.mxu0 %v6516_v3 }
 0x188   :  { %3419 = vmatmul.mubr.msk.f32.gmra.mrb[16].mxu0 %vm80_vm3, %v4914_v40  ;;  %v4220_v40 = vpack.c.bf16 %v1690_v39, %v1689_v38 }
 0x189   :  { %1118 = vmatprep.mubr.f32.mxu0 %v6516_v3 }
 0x18a   :  { %4221 = vmatpush1.bf16.msra.mxu1 %v4220_v40 }
 0x18b   :  { %4222 = vmatprep.subr.bf16.mxu1 %v6518_v60 }
 0x18c   :  { %3420 = vmatmul.mubr.msk.f32.gmra.mrb[18].mxu0 %vm80_vm3, %v4922_v41  ;;  %v1354_v41 = vpop.f32.mrb[4].mxu1 }
 0x18d   :  { %1124 = vmatprep.mubr.f32.mxu0 %v6516_v3 }
 0x190   :  { %3421 = vmatmul.mubr.msk.f32.gmra.mrb[20].mxu0 %vm80_vm3, %v4930_v42 }
 0x191   :  { %1130 = vmatprep.mubr.f32.mxu0 %v6516_v3 }
 0x194   :  { %3422 = vmatmul.mubr.msk.f32.gmra.mrb[22].mxu0 %vm80_vm3, %v4938_v43  ;;  %v1355_v43 = vpop.f32.mrb[5].mxu1 }
 0x195   :  { %1136 = vmatprep.mubr.f32.mxu0 %v6516_v3 }
 0x198   :  { %3423 = vmatmul.mubr.msk.f32.gmra.mrb[24].mxu0 %vm80_vm3, %v4946_v44 }
 0x199   :  { %1142 = vmatprep.mubr.f32.mxu0 %v6516_v3 }
 0x19c   :  { %3424 = vmatmul.mubr.msk.f32.gmra.mrb[26].mxu0 %vm80_vm3, %v4954_v45  ;;  %v1691_v45 = vld [vmem:[%s6504_s3 + $0x50] sm:$0xff] }
 0x19d   :  { %1148 = vmatprep.mubr.f32.mxu0 %v6516_v3 }
 0x1a0   :  { %3425 = vmatmul.mubr.msk.f32.gmra.mrb[28].mxu0 %vm80_vm3, %v4962_v46  ;;  %v1692_v46 = vld [vmem:[%s6504_s3 + $0x58] sm:$0xff] }
 0x1a1   :  { %1154 = vmatprep.mubr.f32.mxu0 %v6516_v3 }
 0x1a4   :  { %3426 = vmatmul.mubr.msk.f32.gmra.mrb[30].mxu0 %vm80_vm3, %v4970_v47  ;;  %v4223_v47 = vpack.c.bf16 %v1692_v46, %v1691_v45 }
 0x1a5   :  { %1160 = vmatprep.mubr.f32.mxu0 %v6516_v3 }
 0x1a6   :  { %4224 = vmatpush1.bf16.msra.mxu1 %v4223_v47 }
 0x1a7   :  { %4225 = vmatprep.subr.bf16.mxu1 %v6518_v60 }
 0x1a8   :  { %3427 = vmatmul.mubr.msk.f32.gmra.mrb[32].mxu0 %vm80_vm3, %v4978_v48  ;;  %v5503_v48 = vpop.f32.mrb[6].mxu1 }
 0x1a9   :  { %1166 = vmatprep.mubr.f32.mxu0 %v6516_v3 }
 0x1ac   :  { %3428 = vmatmul.mubr.msk.f32.gmra.mrb[34].mxu0 %vm80_vm3, %v4986_v49 }
 0x1ad   :  { %1172 = vmatprep.mubr.f32.mxu0 %v6516_v3 }
 0x1b0   :  { %3429 = vmatmul.mubr.msk.f32.gmra.mrb[36].mxu0 %vm80_vm3, %v4994_v50  ;;  %v5505_v50 = vpop.f32.mrb[7].mxu1 }
 0x1b1   :  { %1178 = vmatprep.mubr.f32.mxu0 %v6516_v3  ;;  %v5517_v16 = vpop.f32.mrb[8].mxu1 }
 0x1b2   :  { %v5519_v18 = vpop.f32.mrb[9].mxu1 }
 0x1b3   :  { %v626_v35 = vpop.f32.mrb[58].mxu0  ;;  %v5531_v23 = vpop.f32.mrb[10].mxu1 }
 0x1b4   :  { %v627_v37 = vpop.f32.mrb[59].mxu0  ;;  %3430 = vmatmul.mubr.msk.f32.gmra.mrb[38].mxu0 %vm80_vm3, %v5002_v51  ;;  %v5533_v25 = vpop.f32.mrb[11].mxu1 }
 0x1b5   :  { %1184 = vmatprep.mubr.f32.mxu0 %v6516_v3  ;;  %v5545_v31 = vpop.f32.mrb[12].mxu1 }
 0x1b6   :  { %v5547_v57 = vpop.f32.mrb[13].mxu1 }
 0x1b7   :  { %v630_v42 = vpop.f32.mrb[60].mxu0 }
 0x1b8   :  { %v631_v44 = vpop.f32.mrb[61].mxu0  ;;  %3431 = vmatmul.mubr.msk.f32.gmra.mrb[40].mxu0 %vm80_vm3, %v5010_v52  ;;  %v1693_v52 = vld [vmem:[%s6504_s3 + $0x60] sm:$0xff] }
 0x1b9   :  { %1190 = vmatprep.mubr.f32.mxu0 %v6516_v3  ;;  %v4226_v15 = vpack.c.bf16 %v1694_v12, %v1693_v52 }
 0x1bb   :  { %v634_v49 = vpop.f32.mrb[62].mxu0  ;;  %4227 = vmatpush1.bf16.msra.mxu1 %v4226_v15 }
 0x1bc   :  { %v635_v51 = vpop.f32.mrb[63].mxu0  ;;  %3432 = vmatmul.mubr.msk.f32.gmra.mrb[42].mxu0 %vm80_vm3, %v5018_v53  ;;  %4228 = vmatprep.subr.bf16.mxu1 %v6518_v60 }
 0x1bd   :  { %1196 = vmatprep.mubr.f32.mxu0 %v6516_v3 }
 0x1bf   :  { %v766_v17 = vpop.f32.mrb[64].mxu0  ;;  %4230 = vmatpush1.bf16.msra.mxu1 %v4229_v22 }
 0x1c0   :  { %v767_v53 = vpop.f32.mrb[65].mxu0  ;;  %3433 = vmatmul.mubr.msk.f32.gmra.mrb[44].mxu0 %vm80_vm3, %v5026_v54  ;;  %4231 = vmatprep.subr.bf16.mxu1 %v6518_v60 }
 0x1c1   :  { %1202 = vmatprep.mubr.f32.mxu0 %v6516_v3 }
 0x1c3   :  { %v770_v24 = vpop.f32.mrb[66].mxu0  ;;  %4233 = vmatpush1.bf16.msra.mxu1 %v4232_v29  ;;  %v1549_v29 = vld [vmem:[%s6505_s2] sm:$0x3] }
 0x1c4   :  { %v771_v54 = vpop.f32.mrb[67].mxu0  ;;  %3434 = vmatmul.mubr.msk.f32.gmra.mrb[46].mxu0 %vm80_vm3, %v5034_v55  ;;  %4234 = vmatprep.subr.bf16.mxu1 %v6518_v60  ;;  %v5553_v55 = vpop.f32.mrb[14].mxu1  ;;  %v1552_v24 = vshrl.u32 %v1551_v20, 7 }
 0x1c5   :  { %1208 = vmatprep.mubr.f32.mxu0 %v6516_v3  ;;  %v5555_v58 = vpop.f32.mrb[15].mxu1 }
 0x1c6   :  { %v5559_v59 = vpop.f32.mrb[16].mxu1  ;;  %v1553_v28 = vsub.s32 0, %v1552_v24 }
 0x1c7   :  { %v5561_v61 = vpop.f32.mrb[17].mxu1 }
 0x1c8   :  { %3435 = vmatmul.mubr.msk.f32.gmra.mrb[78].mxu0 %vm80_vm3, %v5042_v56  ;;  %v5563_v62 = vpop.f32.mrb[18].mxu1 }
 0x1c9   :  { %1340 = vmatprep.mubr.f32.mxu0 %v6516_v3  ;;  %v5565_v63 = vpop.f32.mrb[19].mxu1  ;;  %v1557_v3 = vsub.s32 1, %v1552_v24 }
 0x1ca   :  { %v5567_v0 = vpop.f32.mrb[20].mxu1 }
 0x1cb   :  { %v5569_v56 = vpop.f32.mrb[21].mxu1 }
 0x1cc   :  { %3446 = vmatmul.mubr.msk.f32.vlgmr.msra.gmra.mrb[80].mxu0 %vm80_vm3, %v4804_v19  ;;  %v5571_v1 = vpop.f32.mrb[22].mxu1 }
 0x1cd   :  { %v5573_v2 = vpop.f32.mrb[23].mxu1 }
 0x1ce   :  { %v5575_v4 = vpop.f32.mrb[24].mxu1 }
 0x1cf   :  { %v5577_v5 = vpop.f32.mrb[25].mxu1 }
 0x1d0   :  { %v5579_v19 = vpop.f32.mrb[26].mxu1 }
 0x1d1   :  { %v5581_v6 = vpop.f32.mrb[27].mxu1 }
 0x1d2   :  { %v5583_v7 = vpop.f32.mrb[28].mxu1 }
 0x1d3   :  { %v5585_v8 = vpop.f32.mrb[29].mxu1 }
 0x1d4   :  { %v5587_v9 = vpop.f32.mrb[30].mxu1 }
 0x1d5   :  { %v5589_v11 = vpop.f32.mrb[31].mxu1 }
 0x1d6   :  { %v5591_v13 = vpop.f32.mrb[32].mxu1 }
 0x1d7   :  { %v5593_v14 = vpop.f32.mrb[33].mxu1 }
 0x1d8   :  { %v5595_v10 = vpop.f32.mrb[34].mxu1 }
 0x1d9   :  { %v5597_v26 = vpop.f32.mrb[35].mxu1 }
 0x1da   :  { %v5599_v30 = vpop.f32.mrb[36].mxu1 }
 0x1db   :  { %v5601_v32 = vpop.f32.mrb[37].mxu1 }
 0x1dc   :  { %v5603_v33 = vpop.f32.mrb[38].mxu1 }
 0x1dd   :  { %v5605_v34 = vpop.f32.mrb[39].mxu1 }
 0x1de   :  { %v5607_v35 = vpop.f32.mrb[40].mxu1 }
 0x1df   :  { %v5609_v36 = vpop.f32.mrb[41].mxu1 }
 0x1e0   :  { %v5611_v37 = vpop.f32.mrb[42].mxu1 }
 0x1e1   :  { %v5613_v38 = vpop.f32.mrb[43].mxu1 }
 0x1e2   :  { %v5615_v39 = vpop.f32.mrb[44].mxu1 }
 0x1e3   :  { %v5617_v40 = vpop.f32.mrb[45].mxu1 }
 0x1e4   :  { %v5619_v41 = vpop.f32.mrb[46].mxu1 }
 0x1e5   :  { %v5621_v42 = vpop.f32.mrb[47].mxu1 }
 0x1e6   :  { %v5623_v43 = vpop.f32.mrb[48].mxu1 }
 0x1e7   :  { %v5625_v44 = vpop.f32.mrb[49].mxu1 }
 0x1e8   :  { %v5627_v45 = vpop.f32.mrb[50].mxu1 }
 0x1e9   :  { %v5629_v46 = vpop.f32.mrb[51].mxu1 }
 0x1ea   :  { %v5631_v47 = vpop.f32.mrb[52].mxu1 }
 0x1eb   :  { %v5633_v49 = vpop.f32.mrb[53].mxu1 }
 0x1ec   :  { %6522 = vst [vmem:[#allocation2_spill] sm:$0xff] %v5633_v49 }
 0x227   :  { %v918_v51 = vpop.f32.mrb[68].mxu0 }
 0x228   :  { %v919_v52 = vpop.f32.mrb[69].mxu0 }
 0x229   :  { %v5639_v52 = vrot.slane %v1549_v29, %v1553_v28 }
 0x22b   :  { %v922_v12 = vpop.f32.mrb[70].mxu0 }
 0x22c   :  { %v923_v15 = vpop.f32.mrb[71].mxu0 }
 0x22f   :  { %v1054_v17 = vpop.f32.mrb[72].mxu0 }
 0x230   :  { %v1055_v53 = vpop.f32.mrb[73].mxu0  ;;  %v5642_v17 = vrot.slane %v1549_v29, %v1557_v3  ;;  %v3486_v29 = vld [vmem:[%s6504_s3 + $0x90] sm:$0xff] }
 0x233   :  { %v1058_v21 = vpop.f32.mrb[74].mxu0 }
 0x234   :  { %v1059_v22 = vpop.f32.mrb[75].mxu0 }
 0x237   :  { %v1062_v54 = vpop.f32.mrb[76].mxu0 }
 0x238   :  { %v1063_v27 = vpop.f32.mrb[77].mxu0 }
 0x23b   :  { %v1066_v60 = vpop.f32.mrb[0].mxu0 }
 0x23c   :  { %v4477_v51 = vadd.f32 %v5503_v48, %v1066_v60  ;;  %v1068_v12 = vpop.f32.mrb[1].mxu0 }
 0x23d   :  { %v4478_v15 = vadd.f32 %v5505_v50, %v1068_v12 }
 0x23e   :  { %v1561_v20 = vadd.f32 %v4477_v51, %v5639_v52 }
 0x23f   :  { %v1072_v53 = vpop.f32.mrb[2].mxu0  ;;  %v1562_v54 = vadd.f32 %v4478_v15, %v5642_v17 }
 0x240   :  { %v4479_v21 = vadd.f32 %v5517_v16, %v1072_v53  ;;  %v1074_v22 = vpop.f32.mrb[3].mxu0  ;;  %v1609_v28 = vmax.f32 %v1561_v20, 0.0  ;;  %v3487_v16 = vld [vmem:[%s6504_s3 + $0x98] sm:$0xff] }
 0x241   :  { %v4480_v24 = vadd.f32 %v5519_v18, %v1074_v22  ;;  %v1610_v51 = vmax.f32 %v1562_v54, 0.0 }
 0x242   :  { %v1563_v27 = vadd.f32 %v4479_v21, %v5639_v52 }
 0x243   :  { %v1564_v60 = vadd.f32 %v4480_v24, %v5642_v17  ;;  %v1078_v48 = vpop.f32.mrb[4].mxu0 }
 0x244   :  { %v1611_v49 = vmax.f32 %v1563_v27, 0.0  ;;  %v4481_v3 = vadd.f32 %v5531_v23, %v1078_v48  ;;  %v1080_v50 = vpop.f32.mrb[5].mxu0  ;;  %v4235_v23 = vpack.c.bf16 %v3487_v16, %v3486_v29  ;;  %v3488_v27 = vld [vmem:[%s6504_s3 + $0xa0] sm:$0xff] }
 0x245   :  { %v1612_v18 = vmax.f32 %v1564_v60, 0.0  ;;  %v4482_v12 = vadd.f32 %v5533_v25, %v1080_v50  ;;  %v3489_v25 = vld [vmem:[%s6504_s3 + $0xa8] sm:$0xff] }
 0x246   :  { %v5658_v15 = vmax.f32 %v1609_v28, %v1611_v49  ;;  %v1565_v21 = vadd.f32 %v4481_v3, %v5639_v52  ;;  %v4238_v28 = vpack.c.bf16 %v3489_v25, %v3488_v27 }
 0x247   :  { %v5660_v53 = vmax.f32 %v1610_v51, %v1612_v18  ;;  %v1084_v20 = vpop.f32.mrb[6].mxu0  ;;  %v1566_v49 = vadd.f32 %v4482_v12, %v5642_v17  ;;  %v6523_v51 = vmov 0.0|0.0   ;;  %v3491_v18 = vld [vmem:[%s6504_s3 + $0xb8] sm:$0xff] }
 0x248   :  { %v4483_v22 = vadd.f32 %v5545_v31, %v1084_v20  ;;  %v1086_v24 = vpop.f32.mrb[7].mxu0  ;;  %v1613_v3 = vmax.f32 %v1565_v21, 0.0 }
 0x249   :  { %v4484_v54 = vadd.f32 %v5547_v57, %v1086_v24  ;;  %3474 = vmatprep.mubr.msk.f32.mxu1 %vm1699_vm4, %v5660_v53  ;;  %v3490_v57 = vld [vmem:[%s6504_s3 + $0xb0] sm:$0xff]  ;;  %v1614_v12 = vmax.f32 %v1566_v49, 0.0  ;;  %v3492_v49 = vld [vmem:[%s6504_s3 + $0xc0] sm:$0xff] }
 0x24a   :  { %v1567_v60 = vadd.f32 %v4483_v22, %v5639_v52  ;;  %1801 = vmatmul.mubr.f32.vlgmr.msra.gmra.mrb[54].mxu1 %v5658_v15  ;;  %v4241_v24 = vpack.c.bf16 %v3491_v18, %v3490_v57  ;;  %v3495_v18 = vld [vmem:[%s6504_s3 + $0xd8] sm:$0xff] }
 0x24b   :  { %v1568_v31 = vadd.f32 %v4484_v54, %v5642_v17  ;;  %v1090_v48 = vpop.f32.mrb[8].mxu0  ;;  %4236 = vmatpush1.bf16.msra.mxu1 %v4235_v23 }
 0x24c   :  { %v1615_v50 = vmax.f32 %v1567_v60, 0.0  ;;  %v4485_v29 = vadd.f32 %v5553_v55, %v1090_v48  ;;  %v1092_v16 = vpop.f32.mrb[9].mxu0  ;;  %4237 = vmatprep.subr.bf16.mxu1 %v6523_v51 }
 0x24d   :  { %v1616_v20 = vmax.f32 %v1568_v31, 0.0  ;;  %v4486_v23 = vadd.f32 %v5555_v58, %v1092_v16  ;;  %v3493_v58 = vld [vmem:[%s6504_s3 + $0xc8] sm:$0xff] }
 0x24e   :  { %v5686_v22 = vmax.f32 %v1613_v3, %v1615_v50  ;;  %v1569_v27 = vadd.f32 %v4485_v29, %v5639_v52  ;;  %v4244_v3 = vpack.c.bf16 %v3493_v58, %v3492_v49  ;;  %v3496_v58 = vld [vmem:[%s6504_s3 + $0xe0] sm:$0xff] }
 0x24f   :  { %v5688_v21 = vmax.f32 %v1614_v12, %v1616_v20  ;;  %v1096_v55 = vpop.f32.mrb[10].mxu0  ;;  %4239 = vmatpush1.bf16.msra.mxu1 %v4238_v28  ;;  %v1570_v60 = vadd.f32 %v4486_v23, %v5642_v17 }
 0x250   :  { %v4487_v25 = vadd.f32 %v5559_v59, %v1096_v55  ;;  %v1098_v54 = vpop.f32.mrb[11].mxu0  ;;  %4240 = vmatprep.subr.bf16.mxu1 %v6523_v51  ;;  %v1617_v50 = vmax.f32 %v1569_v27, 0.0 }
 0x251   :  { %v4488_v31 = vadd.f32 %v5561_v61, %v1098_v54  ;;  %3475 = vmatprep.mubr.msk.f32.mxu1 %vm1699_vm4, %v5688_v21  ;;  %v3494_v61 = vld [vmem:[%s6504_s3 + $0xd0] sm:$0xff]  ;;  %v1618_v12 = vmax.f32 %v1570_v60, 0.0 }
 0x252   :  { %v1571_v59 = vadd.f32 %v4487_v25, %v5639_v52  ;;  %1806 = vmatmul.mubr.f32.gmra.mrb[56].mxu1 %v5686_v22  ;;  %v4247_v27 = vpack.c.bf16 %v3495_v18, %v3494_v61 }
 0x253   :  { %v1572_v48 = vadd.f32 %v4488_v31, %v5642_v17  ;;  %v1102_v28 = vpop.f32.mrb[12].mxu0  ;;  %4242 = vmatpush1.bf16.msra.mxu1 %v4241_v24 }
 0x254   :  { %v1619_v29 = vmax.f32 %v1571_v59, 0.0  ;;  %v4489_v16 = vadd.f32 %v5563_v62, %v1102_v28  ;;  %v1104_v57 = vpop.f32.mrb[13].mxu0  ;;  %4243 = vmatprep.subr.bf16.mxu1 %v6523_v51 }
 0x255   :  { %v1620_v20 = vmax.f32 %v1572_v48, 0.0  ;;  %v4490_v23 = vadd.f32 %v5565_v63, %v1104_v57  ;;  %v3497_v63 = vld [vmem:[%s6504_s3 + $0xe8] sm:$0xff]  ;;  %v3499_v57 = vld [vmem:[%s6504_s3 + $0xf8] sm:$0xff] }
 0x256   :  { %v5715_v55 = vmax.f32 %v1617_v50, %v1619_v29  ;;  %v1573_v25 = vadd.f32 %v4489_v16, %v5639_v52  ;;  %v4250_v28 = vpack.c.bf16 %v3497_v63, %v3496_v58 }
 0x257   :  { %v5717_v24 = vmax.f32 %v1618_v12, %v1620_v20  ;;  %v1108_v62 = vpop.f32.mrb[14].mxu0  ;;  %4245 = vmatpush1.bf16.msra.mxu1 %v4244_v3  ;;  %v1574_v60 = vadd.f32 %v4490_v23, %v5642_v17 }
 0x258   :  { %v4491_v54 = vadd.f32 %v5567_v0, %v1108_v62  ;;  %v1110_v49 = vpop.f32.mrb[15].mxu0  ;;  %4246 = vmatprep.subr.bf16.mxu1 %v6523_v51  ;;  %v1621_v3 = vmax.f32 %v1573_v25, 0.0 }
 0x259   :  { %v4492_v31 = vadd.f32 %v5569_v56, %v1110_v49  ;;  %3476 = vmatprep.mubr.msk.f32.mxu1 %vm1699_vm4, %v5717_v24  ;;  %v3498_v56 = vld [vmem:[%s6504_s3 + $0xf0] sm:$0xff]  ;;  %v1622_v61 = vmax.f32 %v1574_v60, 0.0  ;;  %v3500_v49 = vld [vmem:[%s6504_s3 + $0x100] sm:$0xff] }
 0x25a   :  { %v1575_v0 = vadd.f32 %v4491_v54, %v5639_v52  ;;  %1811 = vmatmul.mubr.f32.gmra.mrb[58].mxu1 %v5715_v55  ;;  %v4253_v62 = vpack.c.bf16 %v3499_v57, %v3498_v56 }
 0x25b   :  { %v1576_v59 = vadd.f32 %v4492_v31, %v5642_v17  ;;  %v1114_v48 = vpop.f32.mrb[16].mxu0  ;;  %4248 = vmatpush1.bf16.msra.mxu1 %v4247_v27 }
 0x25c   :  { %v1623_v50 = vmax.f32 %v1575_v0, 0.0  ;;  %v4493_v29 = vadd.f32 %v5571_v1, %v1114_v48  ;;  %v1116_v16 = vpop.f32.mrb[17].mxu0  ;;  %4249 = vmatprep.subr.bf16.mxu1 %v6523_v51 }
 0x25d   :  { %v1624_v18 = vmax.f32 %v1576_v59, 0.0  ;;  %v4494_v12 = vadd.f32 %v5573_v2, %v1116_v16  ;;  %v3501_v2 = vld [vmem:[%s6504_s3 + $0x108] sm:$0xff] }
 0x25e   :  { %v5744_v20 = vmax.f32 %v1621_v3, %v1623_v50  ;;  %v1577_v27 = vadd.f32 %v4493_v29, %v5639_v52  ;;  %v4256_v0 = vpack.c.bf16 %v3501_v2, %v3500_v49  ;;  %v3503_v50 = vld [vmem:[%s6504_s3 + $0x118] sm:$0xff] }
 0x25f   :  { %v5746_v23 = vmax.f32 %v1622_v61, %v1624_v18  ;;  %v1120_v1 = vpop.f32.mrb[18].mxu0  ;;  %4251 = vmatpush1.bf16.msra.mxu1 %v4250_v28  ;;  %v1578_v58 = vadd.f32 %v4494_v12, %v5642_v17 }
 0x260   :  { %v4495_v25 = vadd.f32 %v5575_v4, %v1120_v1  ;;  %v1122_v54 = vpop.f32.mrb[19].mxu0  ;;  %4252 = vmatprep.subr.bf16.mxu1 %v6523_v51  ;;  %v1625_v59 = vmax.f32 %v1577_v27, 0.0 }
 0x261   :  { %v4496_v63 = vadd.f32 %v5577_v5, %v1122_v54  ;;  %3477 = vmatprep.mubr.msk.f32.mxu1 %vm1699_vm4, %v5746_v23  ;;  %v3502_v5 = vld [vmem:[%s6504_s3 + $0x110] sm:$0xff]  ;;  %v1626_v29 = vmax.f32 %v1578_v58, 0.0 }
 0x262   :  { %v1579_v4 = vadd.f32 %v4495_v25, %v5639_v52  ;;  %1816 = vmatmul.mubr.f32.gmra.mrb[60].mxu1 %v5744_v20  ;;  %v4259_v18 = vpack.c.bf16 %v3503_v50, %v3502_v5 }
 0x263   :  { %v1580_v60 = vadd.f32 %v4496_v63, %v5642_v17  ;;  %v1126_v31 = vpop.f32.mrb[20].mxu0  ;;  %4254 = vmatpush1.bf16.msra.mxu1 %v4253_v62 }
 0x264   :  { %v1627_v48 = vmax.f32 %v1579_v4, 0.0  ;;  %v4497_v28 = vadd.f32 %v5579_v19, %v1126_v31  ;;  %v1128_v3 = vpop.f32.mrb[21].mxu0  ;;  %4255 = vmatprep.subr.bf16.mxu1 %v6523_v51 }
 0x265   :  { %v1628_v16 = vmax.f32 %v1580_v60, 0.0  ;;  %v4498_v56 = vadd.f32 %v5581_v6, %v1128_v3 }
 0x266   :  { %v5773_v57 = vmax.f32 %v1625_v59, %v1627_v48  ;;  %v1581_v12 = vadd.f32 %v4497_v28, %v5639_v52 }
 0x267   :  { %v5775_v61 = vmax.f32 %v1626_v29, %v1628_v16  ;;  %v1132_v19 = vpop.f32.mrb[22].mxu0  ;;  %4257 = vmatpush1.bf16.msra.mxu1 %v4256_v0  ;;  %v1582_v27 = vadd.f32 %v4498_v56, %v5642_v17 }
 0x268   :  { %v4499_v1 = vadd.f32 %v5583_v7, %v1132_v19  ;;  %v1134_v62 = vpop.f32.mrb[23].mxu0  ;;  %4258 = vmatprep.subr.bf16.mxu1 %v6523_v51  ;;  %v1629_v2 = vmax.f32 %v1581_v12, 0.0 }
 0x269   :  { %v4500_v25 = vadd.f32 %v5585_v8, %v1134_v62  ;;  %3478 = vmatprep.mubr.msk.f32.mxu1 %vm1699_vm4, %v5775_v61  ;;  %v1630_v4 = vmax.f32 %v1582_v27, 0.0 }
 0x26a   :  { %v1583_v6 = vadd.f32 %v4499_v1, %v5639_v52  ;;  %1821 = vmatmul.mubr.f32.gmra.mrb[62].mxu1 %v5773_v57 }
 0x26b   :  { %v1584_v54 = vadd.f32 %v4500_v25, %v5642_v17  ;;  %v1138_v49 = vpop.f32.mrb[24].mxu0  ;;  %4260 = vmatpush1.bf16.msra.mxu1 %v4259_v18 }
 0x26c   :  { %v1631_v7 = vmax.f32 %v1583_v6, 0.0  ;;  %v4501_v58 = vadd.f32 %v5587_v9, %v1138_v49  ;;  %v1140_v63 = vpop.f32.mrb[25].mxu0 }
 0x26d   :  { %v1632_v60 = vmax.f32 %v1584_v54, 0.0  ;;  %v4502_v8 = vadd.f32 %v5589_v11, %v1140_v63 }
 0x26e   :  { %v5789_v31 = vmax.f32 %v1629_v2, %v1631_v7  ;;  %v1585_v48 = vadd.f32 %v4501_v58, %v5639_v52 }
 0x26f   :  { %v5791_v0 = vmax.f32 %v1630_v4, %v1632_v60  ;;  %v1144_v59 = vpop.f32.mrb[26].mxu0  ;;  %v1586_v5 = vadd.f32 %v4502_v8, %v5642_v17 }
 0x270   :  { %v4503_v28 = vadd.f32 %v5591_v13, %v1144_v59  ;;  %v1146_v3 = vpop.f32.mrb[27].mxu0  ;;  %v1633_v16 = vmax.f32 %v1585_v48, 0.0 }
 0x271   :  { %v4504_v50 = vadd.f32 %v5593_v14, %v1146_v3  ;;  %3479 = vmatprep.mubr.msk.f32.mxu1 %vm1699_vm4, %v5791_v0  ;;  %v1634_v18 = vmax.f32 %v1586_v5, 0.0 }
 0x272   :  { %v1587_v9 = vadd.f32 %v4503_v28, %v5639_v52  ;;  %1826 = vmatmul.mubr.f32.gmra.mrb[64].mxu1 %v5789_v31 }
 0x273   :  { %v1588_v11 = vadd.f32 %v4504_v50, %v5642_v17  ;;  %v1150_v29 = vpop.f32.mrb[28].mxu0 }
 0x274   :  { %v1635_v56 = vmax.f32 %v1587_v9, 0.0  ;;  %v4505_v19 = vadd.f32 %v5595_v10, %v1150_v29  ;;  %v1152_v13 = vpop.f32.mrb[29].mxu0 }
 0x275   :  { %v1636_v12 = vmax.f32 %v1588_v11, 0.0  ;;  %v4506_v1 = vadd.f32 %v5597_v26, %v1152_v13 }
 0x276   :  { %v5804_v14 = vmax.f32 %v1633_v16, %v1635_v56  ;;  %v1589_v25 = vadd.f32 %v4505_v19, %v5639_v52 }
 0x277   :  { %v5806_v62 = vmax.f32 %v1634_v18, %v1636_v12  ;;  %v1156_v27 = vpop.f32.mrb[30].mxu0  ;;  %v1590_v49 = vadd.f32 %v4506_v1, %v5642_v17 }
 0x278   :  { %v4507_v6 = vadd.f32 %v5599_v30, %v1156_v27  ;;  %v1158_v54 = vpop.f32.mrb[31].mxu0  ;;  %v1637_v58 = vmax.f32 %v1589_v25, 0.0 }
 0x279   :  { %v4508_v2 = vadd.f32 %v5601_v32, %v1158_v54  ;;  %3480 = vmatprep.mubr.msk.f32.mxu1 %vm1699_vm4, %v5806_v62  ;;  %v1638_v60 = vmax.f32 %v1590_v49, 0.0 }
 0x27a   :  { %v1591_v10 = vadd.f32 %v4507_v6, %v5639_v52  ;;  %1831 = vmatmul.mubr.f32.gmra.mrb[66].mxu1 %v5804_v14 }
 0x27b   :  { %v1592_v26 = vadd.f32 %v4508_v2, %v5642_v17  ;;  %v1162_v7 = vpop.f32.mrb[32].mxu0 }
 0x27c   :  { %v1639_v63 = vmax.f32 %v1591_v10, 0.0  ;;  %v4509_v4 = vadd.f32 %v5603_v33, %v1162_v7  ;;  %v1164_v30 = vpop.f32.mrb[33].mxu0 }
 0x27d   :  { %v1640_v8 = vmax.f32 %v1592_v26, 0.0  ;;  %v4510_v59 = vadd.f32 %v5605_v34, %v1164_v30 }
 0x27e   :  { %v5819_v32 = vmax.f32 %v1637_v58, %v1639_v63  ;;  %v1593_v3 = vadd.f32 %v4509_v4, %v5639_v52 }
 0x27f   :  { %v5821_v48 = vmax.f32 %v1638_v60, %v1640_v8  ;;  %v1168_v28 = vpop.f32.mrb[34].mxu0  ;;  %v1594_v9 = vadd.f32 %v4510_v59, %v5642_v17 }
 0x280   :  { %v4511_v5 = vadd.f32 %v5607_v35, %v1168_v28  ;;  %v1170_v50 = vpop.f32.mrb[35].mxu0  ;;  %v1641_v16 = vmax.f32 %v1593_v3, 0.0 }
 0x281   :  { %v4512_v11 = vadd.f32 %v5609_v36, %v1170_v50  ;;  %3481 = vmatprep.mubr.msk.f32.mxu1 %vm1699_vm4, %v5821_v48  ;;  %v1642_v13 = vmax.f32 %v1594_v9, 0.0 }
 0x282   :  { %v1595_v33 = vadd.f32 %v4511_v5, %v5639_v52  ;;  %1836 = vmatmul.mubr.f32.gmra.mrb[68].mxu1 %v5819_v32 }
 0x283   :  { %v1596_v34 = vadd.f32 %v4512_v11, %v5642_v17  ;;  %v1174_v29 = vpop.f32.mrb[36].mxu0 }
 0x284   :  { %v1643_v56 = vmax.f32 %v1595_v33, 0.0  ;;  %v4513_v19 = vadd.f32 %v5611_v37, %v1174_v29  ;;  %v1176_v35 = vpop.f32.mrb[37].mxu0 }
 0x285   :  { %v1644_v18 = vmax.f32 %v1596_v34, 0.0  ;;  %v4514_v12 = vadd.f32 %v5613_v38, %v1176_v35 }
 0x286   :  { %v5834_v36 = vmax.f32 %v1641_v16, %v1643_v56  ;;  %v1597_v25 = vadd.f32 %v4513_v19, %v5639_v52 }
 0x287   :  { %v5836_v1 = vmax.f32 %v1642_v13, %v1644_v18  ;;  %v1180_v27 = vpop.f32.mrb[38].mxu0  ;;  %v1598_v49 = vadd.f32 %v4514_v12, %v5642_v17 }
 0x288   :  { %v4515_v6 = vadd.f32 %v5615_v39, %v1180_v27  ;;  %v1182_v54 = vpop.f32.mrb[39].mxu0  ;;  %v1645_v26 = vmax.f32 %v1597_v25, 0.0  ;;  %v6524_v25 = vld [vmem:[#allocation2_spill] sm:$0xff] }
 0x289   :  { %v4516_v2 = vadd.f32 %v5617_v40, %v1182_v54  ;;  %3482 = vmatprep.mubr.msk.f32.mxu1 %vm1699_vm4, %v5836_v1  ;;  %v1646_v63 = vmax.f32 %v1598_v49, 0.0 }
 0x28a   :  { %v1599_v37 = vadd.f32 %v4515_v6, %v5639_v52  ;;  %1841 = vmatmul.mubr.f32.gmra.mrb[70].mxu1 %v5834_v36 }
 0x28b   :  { %v1600_v38 = vadd.f32 %v4516_v2, %v5642_v17  ;;  %v1186_v10 = vpop.f32.mrb[40].mxu0 }
 0x28c   :  { %v1647_v7 = vmax.f32 %v1599_v37, 0.0  ;;  %v4517_v58 = vadd.f32 %v5619_v41, %v1186_v10  ;;  %v1188_v39 = vpop.f32.mrb[41].mxu0 }
 0x28d   :  { %v1648_v4 = vmax.f32 %v1600_v38, 0.0  ;;  %v4518_v30 = vadd.f32 %v5621_v42, %v1188_v39 }
 0x28e   :  { %v5849_v40 = vmax.f32 %v1645_v26, %v1647_v7  ;;  %v1601_v59 = vadd.f32 %v4517_v58, %v5639_v52 }
 0x28f   :  { %v1676_v60 = vmax.f32 %v1646_v63, %v1648_v4  ;;  %v1192_v8 = vpop.f32.mrb[42].mxu0  ;;  %v1602_v5 = vadd.f32 %v4518_v30, %v5642_v17 }
 0x290   :  { %v4519_v28 = vadd.f32 %v5623_v43, %v1192_v8  ;;  %v1194_v3 = vpop.f32.mrb[43].mxu0  ;;  %v1649_v11 = vmax.f32 %v1601_v59, 0.0 }
 0x291   :  { %v4520_v50 = vadd.f32 %v5625_v44, %v1194_v3  ;;  %3483 = vmatprep.mubr.msk.f32.mxu1 %vm1699_vm4, %v1676_v60  ;;  %v1650_v43 = vmax.f32 %v1602_v5, 0.0 }
 0x292   :  { %v1603_v41 = vadd.f32 %v4519_v28, %v5639_v52  ;;  %1846 = vmatmul.mubr.f32.gmra.mrb[72].mxu1 %v5849_v40 }
 0x293   :  { %v1604_v42 = vadd.f32 %v4520_v50, %v5642_v17  ;;  %v1198_v9 = vpop.f32.mrb[44].mxu0 }
 0x294   :  { %v1651_v33 = vmax.f32 %v1603_v41, 0.0  ;;  %v4521_v34 = vadd.f32 %v5627_v45, %v1198_v9  ;;  %v1200_v29 = vpop.f32.mrb[45].mxu0 }
 0x295   :  { %v1652_v16 = vmax.f32 %v1604_v42, 0.0  ;;  %v4522_v56 = vadd.f32 %v5629_v46, %v1200_v29 }
 0x296   :  { %v1677_v19 = vmax.f32 %v1649_v11, %v1651_v33  ;;  %v1605_v13 = vadd.f32 %v4521_v34, %v5639_v52 }
 0x297   :  { %v1678_v44 = vmax.f32 %v1650_v43, %v1652_v16  ;;  %v1204_v35 = vpop.f32.mrb[46].mxu0  ;;  %v1606_v27 = vadd.f32 %v4522_v56, %v5642_v17 }
 0x298   :  { %v4523_v18 = vadd.f32 %v5631_v47, %v1204_v35  ;;  %v1206_v12 = vpop.f32.mrb[47].mxu0  ;;  %v1653_v49 = vmax.f32 %v1605_v13, 0.0  ;;  %v3531_v35 = vld [vmem:[%s6506_s4 + $0x60] sm:$0xff] }
 0x299   :  { %v4524_v6 = vadd.f32 %v6524_v25, %v1206_v12  ;;  %3484 = vmatprep.mubr.msk.f32.mxu1 %vm1699_vm4, %v1678_v44  ;;  %v1654_v38 = vmax.f32 %v1606_v27, 0.0  ;;  %v3532_v25 = vld [vmem:[%s6506_s4 + $0x68] sm:$0xff] }
 0x29a   :  { %v1607_v45 = vadd.f32 %v4523_v18, %v5639_v52  ;;  %1851 = vmatmul.mubr.f32.gmra.mrb[74].mxu1 %v1677_v19  ;;  %v2017_v52 = vld [vmem:[%s6506_s4] sm:$0xff] }
 0x29b   :  { %v1608_v54 = vadd.f32 %v4524_v6, %v5642_v17  ;;  %v1210_v46 = vpop.f32.mrb[78].mxu0  ;;  %v2018_v17 = vld [vmem:[%s6506_s4 + $0x8] sm:$0xff]  ;;  %v3533_v6 = vld [vmem:[%s6506_s4 + $0x70] sm:$0xff] }
 0x29c   :  { %v1655_v2 = vmax.f32 %v1607_v45, 0.0  ;;  %v1211_v37 = vpop.f32.mrb[79].mxu0 }
 0x29d   :  { %v1656_v10 = vmax.f32 %v1608_v54, 0.0  ;;  %v3535_v37 = vld [vmem:[%s6506_s4 + $0x80] sm:$0xff] }
 0x29e   :  { %v1679_v26 = vmax.f32 %v1653_v49, %v1655_v2  ;;  %v4285_v49 = vpack.c.bf16 %v3533_v6, %v3532_v25  ;;  %v3534_v2 = vld [vmem:[%s6506_s4 + $0x78] sm:$0xff] }
 0x29f   :  { %v1680_v47 = vmax.f32 %v1654_v38, %v1656_v10  ;;  %v1342_v7 = vpop.f32.mrb[80].mxu0  ;;  %v3578_v6 = vld [vmem:[%s6506_s4 + $0x118] sm:$0xff] }
 0x2a0   :  { %v1343_v58 = vpop.f32.mrb[81].mxu0 }
 0x2a1   :  { %3485 = vmatprep.mubr.msk.f32.mxu1 %vm1699_vm4, %v1680_v47 }
 0x2a2   :  { %1856 = vmatmul.mubr.f32.gmra.mrb[76].mxu1 %v1679_v26 }
 0x2a3   :  { %3504 = vmatprep.mubr.msk.f32.mxu1 %vm1699_vm4, %v5660_v53  ;;  %v2019_v53 = vld [vmem:[%s6506_s4 + $0x10] sm:$0xff] }
 0x2a6   :  { %1945 = vmatmul.mubr.f32.vlgmr.msra.gmra.mrb[78].mxu1 %v5658_v15  ;;  %v4261_v15 = vpack.c.bf16 %v2018_v17, %v2017_v52  ;;  %v3536_v17 = vld [vmem:[%s6506_s4 + $0x88] sm:$0xff] }
 0x2a7   :  { %3505 = vmatprep.mubr.msk.f32.mxu1 %vm1699_vm4, %v5688_v21 }
 0x2a8   :  { %4262 = vmatprep.subr.bf16.mxu1 %v4261_v15 }
 0x2a9   :  { %4264 = vmatpush3.bf16.msra.mxu1 %v4261_v15  ;;  %v3549_v15 = vld [vmem:[%s6506_s4 + $0x90] sm:$0xff] }
 0x2aa   :  { %1950 = vmatmul.mubr.f32.gmra.mrb[80].mxu1 %v5686_v22  ;;  %v2020_v22 = vld [vmem:[%s6506_s4 + $0x18] sm:$0xff] }
 0x2ab   :  { %3506 = vmatprep.mubr.msk.f32.mxu1 %vm1699_vm4, %v5717_v24  ;;  %v4265_v21 = vpack.c.bf16 %v2020_v22, %v2019_v53  ;;  %v2022_v24 = vld [vmem:[%s6506_s4 + $0x28] sm:$0xff]  ;;  %v3550_v53 = vld [vmem:[%s6506_s4 + $0x98] sm:$0xff] }
 0x2ad   :  { %4266 = vmatprep.subr.bf16.mxu1 %v4265_v21 }
 0x2ae   :  { %1955 = vmatmul.mubr.f32.gmra.mrb[82].mxu1 %v5715_v55  ;;  %v2021_v55 = vld [vmem:[%s6506_s4 + $0x20] sm:$0xff] }
 0x2af   :  { %3507 = vmatprep.mubr.msk.f32.mxu1 %vm1699_vm4, %v5746_v23  ;;  %4268 = vmatpush3.bf16.msra.mxu1 %v4265_v21  ;;  %v2023_v23 = vld [vmem:[%s6506_s4 + $0x30] sm:$0xff] }
 0x2b2   :  { %1960 = vmatmul.mubr.f32.gmra.mrb[84].mxu1 %v5744_v20  ;;  %v4269_v20 = vpack.c.bf16 %v2022_v24, %v2021_v55  ;;  %v4293_v24 = vpack.c.bf16 %v3550_v53, %v3549_v15  ;;  %v3599_v53 = vld [vmem:[%s6506_s4 + $0x160] sm:$0xff] }
 0x2b3   :  { %3508 = vmatprep.mubr.msk.f32.mxu1 %vm1699_vm4, %v5775_v61 }
 0x2b4   :  { %4270 = vmatprep.subr.bf16.mxu1 %v4269_v20 }
 0x2b5   :  { %4272 = vmatpush3.bf16.msra.mxu1 %v4269_v20 }
 0x2b6   :  { %1965 = vmatmul.mubr.f32.gmra.mrb[86].mxu1 %v5773_v57  ;;  %v2024_v57 = vld [vmem:[%s6506_s4 + $0x38] sm:$0xff] }
 0x2b7   :  { %3509 = vmatprep.mubr.msk.f32.mxu1 %vm1699_vm4, %v5791_v0  ;;  %v4273_v61 = vpack.c.bf16 %v2024_v57, %v2023_v23  ;;  %v3528_v0 = vld [vmem:[%s6506_s4 + $0x48] sm:$0xff] }
 0x2b9   :  { %4274 = vmatprep.subr.bf16.mxu1 %v4273_v61 }
 0x2ba   :  { %1970 = vmatmul.mubr.f32.gmra.mrb[88].mxu1 %v5789_v31  ;;  %v2025_v31 = vld [vmem:[%s6506_s4 + $0x40] sm:$0xff] }
 0x2bb   :  { %3510 = vmatprep.mubr.msk.f32.mxu1 %vm1699_vm4, %v5806_v62  ;;  %4276 = vmatpush3.bf16.msra.mxu1 %v4273_v61 }
 0x2bc   :  { %3859 = vmatprep.subr.mxu1 %v2025_v31 }
 0x2be   :  { %1975 = vmatmul.mubr.f32.gmra.mrb[90].mxu1 %v5804_v14  ;;  %v3529_v14 = vld [vmem:[%s6506_s4 + $0x50] sm:$0xff] }
 0x2bf   :  { %3511 = vmatprep.mubr.msk.f32.mxu1 %vm1699_vm4, %v5821_v48  ;;  %3860 = vmatpush3.msra.mxu1 %v2025_v31  ;;  %v4277_v62 = vpack.c.bf16 %v3529_v14, %v3528_v0 }
 0x2c1   :  { %4278 = vmatprep.subr.bf16.mxu1 %v4277_v62 }
 0x2c2   :  { %1980 = vmatmul.mubr.f32.gmra.mrb[92].mxu1 %v5819_v32 }
 0x2c3   :  { %3512 = vmatprep.mubr.msk.f32.mxu1 %vm1699_vm4, %v5836_v1 }
 0x2c6   :  { %1985 = vmatmul.mubr.f32.gmra.mrb[94].mxu1 %v5834_v36 }
 0x2c7   :  { %3513 = vmatprep.mubr.msk.f32.mxu1 %vm1699_vm4, %v1676_v60 }
 0x2ca   :  { %1990 = vmatmul.mubr.f32.gmra.mrb[96].mxu1 %v5849_v40 }
 0x2cb   :  { %3514 = vmatprep.mubr.msk.f32.mxu1 %vm1699_vm4, %v1678_v44  ;;  %v3530_v44 = vld [vmem:[%s6506_s4 + $0x58] sm:$0xff] }
 0x2cc   :  { %v4281_v27 = vpack.c.bf16 %v3531_v35, %v3530_v44  ;;  %v3574_v44 = vld [vmem:[%s6506_s4 + $0xf8] sm:$0xff]  ;;  %v3575_v35 = vld [vmem:[%s6506_s4 + $0x100] sm:$0xff] }
 0x2ce   :  { %1995 = vmatmul.mubr.f32.gmra.mrb[98].mxu1 %v1677_v19 }
 0x2cf   :  { %3515 = vmatprep.mubr.msk.f32.mxu1 %vm1699_vm4, %v1680_v47  ;;  %v4289_v47 = vpack.c.bf16 %v3535_v37, %v3534_v2  ;;  %v3593_v2 = vld [vmem:[%s6506_s4 + $0x130] sm:$0xff]  ;;  %v3594_v37 = vld [vmem:[%s6506_s4 + $0x138] sm:$0xff] }
 0x2d2   :  { %2000 = vmatmul.mubr.f32.gmra.mrb[100].mxu1 %v1679_v26 }
 0x31d   :  { %v1802_v32 = vpop.f32.mrb[54].mxu1 }
 0x31e   :  { %v1804_v48 = vpop.f32.mrb[55].mxu1 }
 0x325   :  { %v1807_v36 = vpop.f32.mrb[56].mxu1 }
 0x326   :  { %v1809_v1 = vpop.f32.mrb[57].mxu1 }
 0x32d   :  { %v1812_v39 = vpop.f32.mrb[58].mxu1 }
 0x32e   :  { %v1814_v63 = vpop.f32.mrb[59].mxu1 }
 0x335   :  { %v1817_v4 = vpop.f32.mrb[60].mxu1 }
 0x336   :  { %v1819_v30 = vpop.f32.mrb[61].mxu1 }
 0x33d   :  { %v1822_v40 = vpop.f32.mrb[62].mxu1 }
 0x33e   :  { %v1824_v60 = vpop.f32.mrb[63].mxu1 }
 0x345   :  { %v1827_v8 = vpop.f32.mrb[64].mxu1 }
 0x346   :  { %v1829_v59 = vpop.f32.mrb[65].mxu1 }
 0x347   :  { %v3552_v59 = vld [vmem:[%s6506_s4 + $0xa8] sm:$0xff] }
 0x34d   :  { %v1832_v28 = vpop.f32.mrb[66].mxu1 }
 0x34e   :  { %v1834_v3 = vpop.f32.mrb[67].mxu1 }
 0x34f   :  { %v3553_v3 = vld [vmem:[%s6506_s4 + $0xb0] sm:$0xff] }
 0x355   :  { %v5933_v5 = vpop.f32.mrb[68].mxu1 }
 0x356   :  { %v1839_v50 = vpop.f32.mrb[69].mxu1 }
 0x35d   :  { %v5935_v41 = vpop.f32.mrb[70].mxu1 }
 0x35e   :  { %v1844_v42 = vpop.f32.mrb[71].mxu1 }
 0x35f   :  { %v3556_v42 = vld [vmem:[%s6506_s4 + $0xc8] sm:$0xff] }
 0x365   :  { %v5937_v9 = vpop.f32.mrb[72].mxu1 }
 0x366   :  { %v1849_v11 = vpop.f32.mrb[73].mxu1 }
 0x367   :  { %v3557_v11 = vld [vmem:[%s6506_s4 + $0xd0] sm:$0xff] }
 0x36d   :  { %v5939_v33 = vpop.f32.mrb[74].mxu1 }
 0x36e   :  { %v1854_v34 = vpop.f32.mrb[75].mxu1 }
 0x36f   :  { %v3571_v34 = vld [vmem:[%s6506_s4 + $0xe0] sm:$0xff] }
 0x375   :  { %v5941_v29 = vpop.f32.mrb[76].mxu1 }
 0x376   :  { %v1859_v43 = vpop.f32.mrb[77].mxu1 }
 0x377   :  { %v3572_v43 = vld [vmem:[%s6506_s4 + $0xe8] sm:$0xff] }
 0x379   :  { %v1946_v16 = vpop.f32.mrb[78].mxu1 }
 0x37a   :  { %v5943_v56 = vmax.f32 %v1802_v32, %v1946_v16  ;;  %v1948_v19 = vpop.f32.mrb[79].mxu1  ;;  %v3573_v16 = vld [vmem:[%s6506_s4 + $0xf0] sm:$0xff] }
 0x37b   :  { %v4313_v19 = vpack.c.bf16 %v3573_v16, %v3572_v43 }
 0x37c   :  { %3861 = vmatprep.mubr.msk.f32.mxu1 %vm2026_vm5, %v5943_v56 }
 0x37d   :  { %v1951_v13 = vpop.f32.mrb[80].mxu1 }
 0x37e   :  { %v5953_v18 = vmax.f32 %v1807_v36, %v1951_v13  ;;  %v1953_v12 = vpop.f32.mrb[81].mxu1  ;;  %v4317_v13 = vpack.c.bf16 %v3575_v35, %v3574_v44 }
 0x37f   :  { %v3576_v12 = vld [vmem:[%s6506_s4 + $0x108] sm:$0xff] }
 0x380   :  { %3862 = vmatmul.mubr.msk.f32.vlgmr.msra.gmra.mrb[102].mxu1 %vm2026_vm5, %v5953_v18 }
 0x381   :  { %v1956_v45 = vpop.f32.mrb[82].mxu1  ;;  %4280 = vmatpush3.bf16.msra.mxu1 %v4277_v62 }
 0x382   :  { %v5963_v54 = vmax.f32 %v1812_v39, %v1956_v45  ;;  %v1958_v46 = vpop.f32.mrb[83].mxu1  ;;  %4282 = vmatprep.subr.bf16.mxu1 %v4281_v27  ;;  %v3591_v45 = vld [vmem:[%s6506_s4 + $0x120] sm:$0xff] }
 0x383   :  { %v3592_v46 = vld [vmem:[%s6506_s4 + $0x128] sm:$0xff] }
 0x384   :  { %3864 = vmatprep.mubr.msk.f32.mxu1 %vm2026_vm5, %v5963_v54 }
 0x385   :  { %v1961_v38 = vpop.f32.mrb[84].mxu1  ;;  %4284 = vmatpush3.bf16.msra.mxu1 %v4281_v27  ;;  %v3577_v27 = vld [vmem:[%s6506_s4 + $0x110] sm:$0xff] }
 0x386   :  { %v5973_v10 = vmax.f32 %v1817_v4, %v1961_v38  ;;  %v1963_v26 = vpop.f32.mrb[85].mxu1  ;;  %4286 = vmatprep.subr.bf16.mxu1 %v4285_v49  ;;  %v4321_v25 = vpack.c.bf16 %v3577_v27, %v3576_v12  ;;  %v4329_v38 = vpack.c.bf16 %v3594_v37, %v3593_v2 }
 0x387   :  { %v3595_v26 = vld [vmem:[%s6506_s4 + $0x140] sm:$0xff] }
 0x388   :  { %3865 = vmatmul.mubr.msk.f32.gmra.mrb[104].mxu1 %vm2026_vm5, %v5973_v10 }
 0x389   :  { %v1966_v7 = vpop.f32.mrb[86].mxu1  ;;  %4288 = vmatpush3.bf16.msra.mxu1 %v4285_v49  ;;  %v4325_v49 = vpack.c.bf16 %v3592_v46, %v3591_v45 }
 0x38a   :  { %v5977_v58 = vmax.f32 %v1822_v40, %v1966_v7  ;;  %v1968_v52 = vpop.f32.mrb[87].mxu1  ;;  %4290 = vmatprep.subr.bf16.mxu1 %v4289_v47 }
 0x38b   :  { %v3597_v52 = vld [vmem:[%s6506_s4 + $0x150] sm:$0xff] }
 0x38c   :  { %3867 = vmatprep.mubr.msk.f32.mxu1 %vm2026_vm5, %v5977_v58 }
 0x38d   :  { %v1971_v22 = vpop.f32.mrb[88].mxu1  ;;  %4292 = vmatpush3.bf16.msra.mxu1 %v4289_v47  ;;  %v3596_v47 = vld [vmem:[%s6506_s4 + $0x148] sm:$0xff] }
 0x38e   :  { %v5990_v21 = vmax.f32 %v1827_v8, %v1971_v22  ;;  %v1973_v55 = vpop.f32.mrb[89].mxu1  ;;  %3895 = vmatprep.subr.mxu1 %v3536_v17  ;;  %v3551_v8 = vld [vmem:[%s6506_s4 + $0xa0] sm:$0xff]  ;;  %v4333_v7 = vpack.c.bf16 %v3596_v47, %v3595_v26 }
 0x38f   :  { %v2772_v55 = vld [vmem:[%s6507_s6 + $0x28] sm:$0xff] }
 0x390   :  { %3868 = vmatmul.mubr.msk.f32.gmra.mrb[106].mxu1 %vm2026_vm5, %v5990_v21 }
 0x391   :  { %v1976_v20 = vpop.f32.mrb[90].mxu1  ;;  %3896 = vmatpush3.msra.mxu1 %v3536_v17  ;;  %v3598_v17 = vld [vmem:[%s6506_s4 + $0x158] sm:$0xff] }
 0x392   :  { %v5994_v23 = vmax.f32 %v1832_v28, %v1976_v20  ;;  %v1978_v57 = vpop.f32.mrb[91].mxu1  ;;  %4294 = vmatprep.subr.bf16.mxu1 %v4293_v24  ;;  %v4297_v28 = vpack.c.bf16 %v3552_v59, %v3551_v8  ;;  %v4337_v15 = vpack.c.bf16 %v3598_v17, %v3597_v52  ;;  %v2773_v20 = vld [vmem:[%s6507_s6 + $0x30] sm:$0xff]  ;;  %v3614_v8 = vld [vmem:[%s6507_s6 + $0x88] sm:$0xff] }
 0x394   :  { %3870 = vmatprep.mubr.msk.f32.mxu1 %vm2026_vm5, %v5994_v23 }
 0x395   :  { %v1981_v61 = vpop.f32.mrb[92].mxu1 }
 0x396   :  { %v5999_v31 = vmax.f32 %v5933_v5, %v1981_v61  ;;  %v1983_v0 = vpop.f32.mrb[93].mxu1  ;;  %v3554_v5 = vld [vmem:[%s6506_s4 + $0xb8] sm:$0xff]  ;;  %v2775_v61 = vld [vmem:[%s6507_s6 + $0x40] sm:$0xff] }
 0x397   :  { %v4301_v50 = vpack.c.bf16 %v3554_v5, %v3553_v3 }
 0x398   :  { %3871 = vmatmul.mubr.msk.f32.gmra.mrb[108].mxu1 %vm2026_vm5, %v5999_v31 }
 0x399   :  { %v1986_v14 = vpop.f32.mrb[94].mxu1 }
 0x39a   :  { %v6004_v62 = vmax.f32 %v5935_v41, %v1986_v14  ;;  %v1988_v32 = vpop.f32.mrb[95].mxu1  ;;  %v3555_v41 = vld [vmem:[%s6506_s4 + $0xc0] sm:$0xff]  ;;  %v2777_v14 = vld [vmem:[%s6507_s6 + $0x50] sm:$0xff] }
 0x39c   :  { %3873 = vmatprep.mubr.msk.f32.mxu1 %vm2026_vm5, %v6004_v62 }
 0x39d   :  { %v1991_v48 = vpop.f32.mrb[96].mxu1 }
 0x39e   :  { %v6009_v36 = vmax.f32 %v5937_v9, %v1991_v48  ;;  %v1993_v1 = vpop.f32.mrb[97].mxu1  ;;  %v4305_v9 = vpack.c.bf16 %v3556_v42, %v3555_v41  ;;  %v2779_v48 = vld [vmem:[%s6507_s6 + $0x60] sm:$0xff] }
 0x3a0   :  { %3874 = vmatmul.mubr.msk.f32.gmra.mrb[110].mxu1 %vm2026_vm5, %v6009_v36 }
 0x3a1   :  { %v1996_v39 = vpop.f32.mrb[98].mxu1 }
 0x3a2   :  { %v6014_v63 = vmax.f32 %v5939_v33, %v1996_v39  ;;  %v1998_v4 = vpop.f32.mrb[99].mxu1  ;;  %v3570_v33 = vld [vmem:[%s6506_s4 + $0xd8] sm:$0xff] }
 0x3a3   :  { %v2781_v4 = vld [vmem:[%s6507_s6 + $0x70] sm:$0xff] }
 0x3a4   :  { %3876 = vmatprep.mubr.msk.f32.mxu1 %vm2026_vm5, %v6014_v63 }
 0x3a5   :  { %v2001_v30 = vpop.f32.mrb[100].mxu1 }
 0x3a6   :  { %v6019_v40 = vmax.f32 %v5941_v29, %v2001_v30  ;;  %v2003_v60 = vpop.f32.mrb[101].mxu1  ;;  %v4309_v29 = vpack.c.bf16 %v3571_v34, %v3570_v33  ;;  %v2782_v30 = vld [vmem:[%s6507_s6 + $0x78] sm:$0xff] }
 0x3a7   :  { %v3613_v60 = vld [vmem:[%s6507_s6 + $0x80] sm:$0xff] }
 0x3a8   :  { %3877 = vmatmul.mubr.msk.f32.gmra.mrb[112].mxu1 %vm2026_vm5, %v6019_v40  ;;  %v6248_v59 = vpack.c.bf16 %v3614_v8, %v3613_v60 }
 0x3a9   :  { %3897 = vmatprep.mubr.msk.f32.mxu1 %vm2026_vm5, %v5943_v56 }
 0x3ac   :  { %3898 = vmatmul.mubr.msk.f32.vlgmr.msra.gmra.mrb[114].mxu1 %vm2026_vm5, %v5953_v18 }
 0x3ad   :  { %3900 = vmatprep.mubr.msk.f32.mxu1 %vm2026_vm5, %v5963_v54  ;;  %4296 = vmatpush3.bf16.msra.mxu1 %v4293_v24 }
 0x3ae   :  { %4298 = vmatprep.subr.bf16.mxu1 %v4297_v28 }
 0x3b0   :  { %3901 = vmatmul.mubr.msk.f32.gmra.mrb[116].mxu1 %vm2026_vm5, %v5973_v10 }
 0x3b1   :  { %3903 = vmatprep.mubr.msk.f32.mxu1 %vm2026_vm5, %v5977_v58  ;;  %4300 = vmatpush3.bf16.msra.mxu1 %v4297_v28 }
 0x3b2   :  { %4302 = vmatprep.subr.bf16.mxu1 %v4301_v50 }
 0x3b4   :  { %3904 = vmatmul.mubr.msk.f32.gmra.mrb[118].mxu1 %vm2026_vm5, %v5990_v21 }
 0x3b5   :  { %3906 = vmatprep.mubr.msk.f32.mxu1 %vm2026_vm5, %v5994_v23  ;;  %4304 = vmatpush3.bf16.msra.mxu1 %v4301_v50 }
 0x3b6   :  { %4306 = vmatprep.subr.bf16.mxu1 %v4305_v9 }
 0x3b8   :  { %3907 = vmatmul.mubr.msk.f32.gmra.mrb[120].mxu1 %vm2026_vm5, %v5999_v31 }
 0x3b9   :  { %3909 = vmatprep.mubr.msk.f32.mxu1 %vm2026_vm5, %v6004_v62  ;;  %4308 = vmatpush3.bf16.msra.mxu1 %v4305_v9 }
 0x3ba   :  { %3931 = vmatprep.subr.mxu1 %v3557_v11 }
 0x3bc   :  { %3910 = vmatmul.mubr.msk.f32.gmra.mrb[122].mxu1 %vm2026_vm5, %v6009_v36 }
 0x3bd   :  { %3912 = vmatprep.mubr.msk.f32.mxu1 %vm2026_vm5, %v6014_v63  ;;  %3932 = vmatpush3.msra.mxu1 %v3557_v11 }
 0x3be   :  { %4310 = vmatprep.subr.bf16.mxu1 %v4309_v29 }
 0x3c0   :  { %3913 = vmatmul.mubr.msk.f32.gmra.mrb[124].mxu1 %vm2026_vm5, %v6019_v40 }
 0x3c1   :  { %3933 = vmatprep.mubr.msk.f32.mxu1 %vm2026_vm5, %v5943_v56 }
 0x3c4   :  { %3934 = vmatmul.mubr.msk.f32.vlgmr.msra.gmra.mrb[126].mxu1 %vm2026_vm5, %v5953_v18 }
 0x3c5   :  { %3936 = vmatprep.mubr.msk.f32.mxu1 %vm2026_vm5, %v5963_v54  ;;  %4312 = vmatpush3.bf16.msra.mxu1 %v4309_v29 }
 0x3c6   :  { %4314 = vmatprep.subr.bf16.mxu1 %v4313_v19 }
 0x3c8   :  { %3937 = vmatmul.mubr.msk.f32.gmra.mrb[128].mxu1 %vm2026_vm5, %v5973_v10 }
 0x3c9   :  { %3939 = vmatprep.mubr.msk.f32.mxu1 %vm2026_vm5, %v5977_v58  ;;  %4316 = vmatpush3.bf16.msra.mxu1 %v4313_v19 }
 0x3ca   :  { %4318 = vmatprep.subr.bf16.mxu1 %v4317_v13 }
 0x3cc   :  { %3940 = vmatmul.mubr.msk.f32.gmra.mrb[130].mxu1 %vm2026_vm5, %v5990_v21 }
 0x3cd   :  { %3942 = vmatprep.mubr.msk.f32.mxu1 %vm2026_vm5, %v5994_v23  ;;  %4320 = vmatpush3.bf16.msra.mxu1 %v4317_v13 }
 0x3ce   :  { %4322 = vmatprep.subr.bf16.mxu1 %v4321_v25 }
 0x3d0   :  { %3943 = vmatmul.mubr.msk.f32.gmra.mrb[132].mxu1 %vm2026_vm5, %v5999_v31 }
 0x3d1   :  { %3945 = vmatprep.mubr.msk.f32.mxu1 %vm2026_vm5, %v6004_v62  ;;  %4324 = vmatpush3.bf16.msra.mxu1 %v4321_v25 }
 0x3d2   :  { %3967 = vmatprep.subr.mxu1 %v3578_v6 }
 0x3d4   :  { %3946 = vmatmul.mubr.msk.f32.gmra.mrb[134].mxu1 %vm2026_vm5, %v6009_v36 }
 0x3d5   :  { %3948 = vmatprep.mubr.msk.f32.mxu1 %vm2026_vm5, %v6014_v63  ;;  %3968 = vmatpush3.msra.mxu1 %v3578_v6 }
 0x3d6   :  { %4326 = vmatprep.subr.bf16.mxu1 %v4325_v49 }
 0x3d8   :  { %3949 = vmatmul.mubr.msk.f32.gmra.mrb[136].mxu1 %vm2026_vm5, %v6019_v40 }
 0x3d9   :  { %3969 = vmatprep.mubr.msk.f32.mxu1 %vm2026_vm5, %v5943_v56 }
 0x3dc   :  { %3970 = vmatmul.mubr.msk.f32.vlgmr.msra.gmra.mrb[138].mxu1 %vm2026_vm5, %v5953_v18 }
 0x3dd   :  { %3972 = vmatprep.mubr.msk.f32.mxu1 %vm2026_vm5, %v5963_v54  ;;  %4328 = vmatpush3.bf16.msra.mxu1 %v4325_v49 }
 0x3de   :  { %4330 = vmatprep.subr.bf16.mxu1 %v4329_v38 }
 0x3e0   :  { %3973 = vmatmul.mubr.msk.f32.gmra.mrb[140].mxu1 %vm2026_vm5, %v5973_v10 }
 0x3e1   :  { %3975 = vmatprep.mubr.msk.f32.mxu1 %vm2026_vm5, %v5977_v58  ;;  %4332 = vmatpush3.bf16.msra.mxu1 %v4329_v38 }
 0x3e2   :  { %4334 = vmatprep.subr.bf16.mxu1 %v4333_v7 }
 0x3e4   :  { %3976 = vmatmul.mubr.msk.f32.gmra.mrb[142].mxu1 %vm2026_vm5, %v5990_v21 }
 0x3e5   :  { %3978 = vmatprep.mubr.msk.f32.mxu1 %vm2026_vm5, %v5994_v23  ;;  %4336 = vmatpush3.bf16.msra.mxu1 %v4333_v7 }
 0x3e6   :  { %4338 = vmatprep.subr.bf16.mxu1 %v4337_v15 }
 0x3e8   :  { %3979 = vmatmul.mubr.msk.f32.gmra.mrb[144].mxu1 %vm2026_vm5, %v5999_v31 }
 0x3e9   :  { %3981 = vmatprep.mubr.msk.f32.mxu1 %vm2026_vm5, %v6004_v62  ;;  %4340 = vmatpush3.bf16.msra.mxu1 %v4337_v15 }
 0x3ea   :  { %4003 = vmatprep.subr.mxu1 %v3599_v53 }
 0x3ec   :  { %3982 = vmatmul.mubr.msk.f32.gmra.mrb[146].mxu1 %vm2026_vm5, %v6009_v36 }
 0x3ed   :  { %3984 = vmatprep.mubr.msk.f32.mxu1 %vm2026_vm5, %v6014_v63  ;;  %4004 = vmatpush3.msra.mxu1 %v3599_v53 }
 0x3f0   :  { %3985 = vmatmul.mubr.msk.f32.gmra.mrb[148].mxu1 %vm2026_vm5, %v6019_v40 }
 0x3f1   :  { %4005 = vmatprep.mubr.msk.f32.mxu1 %vm2026_vm5, %v5943_v56  ;;  %v2767_v56 = vld [vmem:[%s6507_s6] sm:$0xff] }
 0x3f4   :  { %4006 = vmatmul.mubr.msk.f32.vlgmr.msra.gmra.mrb[150].mxu1 %vm2026_vm5, %v5953_v18  ;;  %v2768_v18 = vld [vmem:[%s6507_s6 + $0x8] sm:$0xff] }
 0x3f5   :  { %4008 = vmatprep.mubr.msk.f32.mxu1 %vm2026_vm5, %v5963_v54  ;;  %v4341_v54 = vpack.c.bf16 %v2768_v18, %v2767_v56 }
 0x3f7   :  { %4342 = vmatprep.subr.bf16.mxu1 %v4341_v54 }
 0x3f8   :  { %4009 = vmatmul.mubr.msk.f32.gmra.mrb[152].mxu1 %vm2026_vm5, %v5973_v10  ;;  %v2769_v10 = vld [vmem:[%s6507_s6 + $0x10] sm:$0xff] }
 0x3f9   :  { %4011 = vmatprep.mubr.msk.f32.mxu1 %vm2026_vm5, %v5977_v58  ;;  %4344 = vmatpush3.bf16.msra.mxu1 %v4341_v54  ;;  %v2770_v58 = vld [vmem:[%s6507_s6 + $0x18] sm:$0xff] }
 0x3fa   :  { %v4345_v22 = vpack.c.bf16 %v2770_v58, %v2769_v10 }
 0x3fc   :  { %4012 = vmatmul.mubr.msk.f32.gmra.mrb[154].mxu1 %vm2026_vm5, %v5990_v21  ;;  %4346 = vmatprep.subr.bf16.mxu1 %v4345_v22  ;;  %v2771_v21 = vld [vmem:[%s6507_s6 + $0x20] sm:$0xff] }
 0x3fd   :  { %4014 = vmatprep.mubr.msk.f32.mxu1 %vm2026_vm5, %v5994_v23  ;;  %4348 = vmatpush3.bf16.msra.mxu1 %v4345_v22  ;;  %v4349_v24 = vpack.c.bf16 %v2772_v55, %v2771_v21  ;;  %v2774_v23 = vld [vmem:[%s6507_s6 + $0x38] sm:$0xff] }
 0x3fe   :  { %v4353_v57 = vpack.c.bf16 %v2774_v23, %v2773_v20 }
 0x3ff   :  { %4350 = vmatprep.subr.bf16.mxu1 %v4349_v24 }
 0x400   :  { %4015 = vmatmul.mubr.msk.f32.gmra.mrb[156].mxu1 %vm2026_vm5, %v5999_v31  ;;  %v2776_v31 = vld [vmem:[%s6507_s6 + $0x48] sm:$0xff] }
 0x401   :  { %4017 = vmatprep.mubr.msk.f32.mxu1 %vm2026_vm5, %v6004_v62  ;;  %4352 = vmatpush3.bf16.msra.mxu1 %v4349_v24  ;;  %v4357_v0 = vpack.c.bf16 %v2776_v31, %v2775_v61  ;;  %v2778_v62 = vld [vmem:[%s6507_s6 + $0x58] sm:$0xff] }
 0x402   :  { %4354 = vmatprep.subr.bf16.mxu1 %v4353_v57  ;;  %v4361_v32 = vpack.c.bf16 %v2778_v62, %v2777_v14 }
 0x404   :  { %4018 = vmatmul.mubr.msk.f32.gmra.mrb[158].mxu1 %vm2026_vm5, %v6009_v36  ;;  %v2780_v36 = vld [vmem:[%s6507_s6 + $0x68] sm:$0xff] }
 0x405   :  { %4020 = vmatprep.mubr.msk.f32.mxu1 %vm2026_vm5, %v6014_v63  ;;  %4356 = vmatpush3.bf16.msra.mxu1 %v4353_v57  ;;  %v4365_v1 = vpack.c.bf16 %v2780_v36, %v2779_v48 }
 0x406   :  { %4358 = vmatprep.subr.bf16.mxu1 %v4357_v0 }
 0x408   :  { %4021 = vmatmul.mubr.msk.f32.gmra.mrb[160].mxu1 %vm2026_vm5, %v6019_v40  ;;  %v4369_v40 = vpack.c.bf16 %v2782_v30, %v2781_v4 }
 0x409   :  { %4360 = vmatpush3.bf16.msra.mxu1 %v4357_v0 }
 0x40a   :  { %4362 = vmatprep.subr.bf16.mxu1 %v4361_v32 }
 0x40d   :  { %4364 = vmatpush3.bf16.msra.mxu1 %v4361_v32 }
 0x40e   :  { %4366 = vmatprep.subr.bf16.mxu1 %v4365_v1 }
 0x411   :  { %4368 = vmatpush3.bf16.msra.mxu1 %v4365_v1 }
 0x412   :  { %4370 = vmatprep.subr.bf16.mxu1 %v4369_v40 }
 0x415   :  { %4372 = vmatpush3.bf16.msra.mxu1 %v4369_v40 }
 0x416   :  { %4374 = vmatprep.subr.bf16.mxu1 %v6248_v59 }
 0x453   :  { %v3863_v39 = vpop.f32.mrb[102].mxu1 }
 0x454   :  { %v2129_v63 = vpop.f32.mrb[103].mxu1 }
 0x45b   :  { %v3866_v28 = vpop.f32.mrb[104].mxu1 }
 0x45c   :  { %v2139_v3 = vpop.f32.mrb[105].mxu1 }
 0x463   :  { %v3869_v5 = vpop.f32.mrb[106].mxu1 }
 0x464   :  { %v2149_v50 = vpop.f32.mrb[107].mxu1 }
 0x46b   :  { %v3872_v41 = vpop.f32.mrb[108].mxu1 }
 0x46c   :  { %v2159_v42 = vpop.f32.mrb[109].mxu1 }
 0x473   :  { %v3875_v9 = vpop.f32.mrb[110].mxu1 }
 0x474   :  { %v2169_v11 = vpop.f32.mrb[111].mxu1 }
 0x47b   :  { %v3878_v33 = vpop.f32.mrb[112].mxu1 }
 0x47c   :  { %v2177_v34 = vpop.f32.mrb[113].mxu1 }
 0x47f   :  { %v3899_v29 = vpop.f32.mrb[114].mxu1 }
 0x480   :  { %v2315_v43 = vadd.f32 %v3899_v29, %v2129_v63  ;;  %v2260_v16 = vpop.f32.mrb[115].mxu1 }
 0x483   :  { %v3902_v19 = vpop.f32.mrb[116].mxu1 }
 0x484   :  { %v2317_v44 = vadd.f32 %v3902_v19, %v2139_v3  ;;  %v2269_v35 = vpop.f32.mrb[117].mxu1  ;;  %v3612_v19 = vld [vmem:[%s6508_s5] ss:$0 sm:$0xff] }
 0x485   :  { %v2316_v13 = vadd.f32 %v3863_v39, %v2269_v35 }
 0x487   :  { %v3905_v12 = vpop.f32.mrb[118].mxu1 }
 0x488   :  { %v2319_v27 = vadd.f32 %v3905_v12, %v2149_v50  ;;  %v2279_v25 = vpop.f32.mrb[119].mxu1 }
 0x489   :  { %v2318_v6 = vadd.f32 %v3866_v28, %v2279_v25 }
 0x48b   :  { %v3908_v45 = vpop.f32.mrb[120].mxu1 }
 0x48c   :  { %v2321_v46 = vadd.f32 %v3908_v45, %v2159_v42  ;;  %v2289_v49 = vpop.f32.mrb[121].mxu1 }
 0x48d   :  { %v2320_v2 = vadd.f32 %v3869_v5, %v2289_v49 }
 0x48f   :  { %v3911_v37 = vpop.f32.mrb[122].mxu1 }
 0x490   :  { %v2299_v38 = vpop.f32.mrb[123].mxu1 }
 0x491   :  { %v2322_v26 = vadd.f32 %v3872_v41, %v2299_v38 }
 0x493   :  { %v3914_v47 = vpop.f32.mrb[124].mxu1 }
 0x494   :  { %v2308_v7 = vpop.f32.mrb[125].mxu1 }
 0x497   :  { %v3935_v52 = vpop.f32.mrb[126].mxu1 }
 0x498   :  { %v2399_v17 = vpop.f32.mrb[127].mxu1 }
 0x49b   :  { %v3938_v15 = vpop.f32.mrb[128].mxu1 }
 0x49c   :  { %v2455_v53 = vadd.f32 %v3938_v15, %v2316_v13  ;;  %v2407_v56 = vpop.f32.mrb[129].mxu1  ;;  %v3615_v15 = vld [vmem:[%s6507_s6 + $0x90] sm:$0xff] }
 0x49d   :  { %v2454_v18 = vadd.f32 %v2407_v56, %v2315_v43 }
 0x49f   :  { %v3941_v54 = vpop.f32.mrb[130].mxu1 }
 0x4a0   :  { %v2457_v10 = vadd.f32 %v3941_v54, %v2318_v6  ;;  %v2417_v58 = vpop.f32.mrb[131].mxu1 }
 0x4a1   :  { %v2456_v22 = vadd.f32 %v2417_v58, %v2317_v44 }
 0x4a3   :  { %v3944_v21 = vpop.f32.mrb[132].mxu1 }
 0x4a4   :  { %v2459_v55 = vadd.f32 %v3944_v21, %v2320_v2  ;;  %v2427_v24 = vpop.f32.mrb[133].mxu1 }
 0x4a5   :  { %v2458_v20 = vadd.f32 %v2427_v24, %v2319_v27 }
 0x4a7   :  { %v3947_v23 = vpop.f32.mrb[134].mxu1 }
 0x4a8   :  { %v2461_v57 = vadd.f32 %v3947_v23, %v2322_v26  ;;  %v2437_v61 = vpop.f32.mrb[135].mxu1  ;;  %v3617_v23 = vld [vmem:[%s6507_s6 + $0xa0] sm:$0xff] }
 0x4a9   :  { %v2460_v31 = vadd.f32 %v2437_v61, %v2321_v46 }
 0x4ab   :  { %v3950_v0 = vpop.f32.mrb[136].mxu1 }
 0x4ac   :  { %v2447_v14 = vpop.f32.mrb[137].mxu1 }
 0x4af   :  { %v3971_v62 = vpop.f32.mrb[138].mxu1 }
 0x4b0   :  { %v2538_v32 = vpop.f32.mrb[139].mxu1 }
 0x4b3   :  { %v3974_v48 = vpop.f32.mrb[140].mxu1 }
 0x4b4   :  { %v2593_v36 = vadd.f32 %v3974_v48, %v2454_v18  ;;  %v2546_v1 = vpop.f32.mrb[141].mxu1 }
 0x4b5   :  { %v3620_v1 = vld [vmem:[%s6507_s6 + $0xb8] sm:$0xff] }
 0x4b7   :  { %v3977_v39 = vpop.f32.mrb[142].mxu1 }
 0x4b8   :  { %v2595_v63 = vadd.f32 %v3977_v39, %v2456_v22  ;;  %v2555_v4 = vpop.f32.mrb[143].mxu1 }
 0x4b9   :  { %v2594_v30 = vadd.f32 %v2555_v4, %v2455_v53  ;;  %v3616_v53 = vld [vmem:[%s6507_s6 + $0x98] sm:$0xff] }
 0x4ba   :  { %v4377_v21 = vpack.c.bf16 %v3616_v53, %v3615_v15 }
 0x4bb   :  { %v3980_v40 = vpop.f32.mrb[144].mxu1 }
 0x4bc   :  { %v2597_v60 = vadd.f32 %v3980_v40, %v2458_v20  ;;  %v2565_v8 = vpop.f32.mrb[145].mxu1 }
 0x4bd   :  { %v2596_v28 = vadd.f32 %v2565_v8, %v2457_v10  ;;  %v3624_v8 = vld [vmem:[%s6507_s6 + $0xd8] sm:$0xff] }
 0x4bf   :  { %v3983_v3 = vpop.f32.mrb[146].mxu1 }
 0x4c0   :  { %v2599_v5 = vadd.f32 %v3983_v3, %v2460_v31  ;;  %v2575_v50 = vpop.f32.mrb[147].mxu1  ;;  %v3625_v3 = vld [vmem:[%s6507_s6 + $0xe0] sm:$0xff] }
 0x4c1   :  { %v2598_v41 = vadd.f32 %v2575_v50, %v2459_v55 }
 0x4c3   :  { %v3986_v42 = vpop.f32.mrb[148].mxu1 }
 0x4c4   :  { %v2585_v9 = vpop.f32.mrb[149].mxu1  ;;  %v3628_v42 = vld [vmem:[%s6507_s6 + $0xf8] sm:$0xff] }
 0x4c5   :  { %v2600_v11 = vadd.f32 %v2585_v9, %v2461_v57  ;;  %v3618_v57 = vld [vmem:[%s6507_s6 + $0xa8] sm:$0xff] }
 0x4c6   :  { %v4381_v32 = vpack.c.bf16 %v3618_v57, %v3617_v23 }
 0x4c7   :  { %v4007_v33 = vpop.f32.mrb[150].mxu1 }
 0x4c8   :  { %v2677_v34 = vpop.f32.mrb[151].mxu1  ;;  %v3002_v33 = vld [vmem:[%s6509_s7 + $0x88] sm:$0xff] }
 0x4c9   :  { %v2985_v34 = vld [vmem:[%s6509_s7] sm:$0xff] }
 0x4cb   :  { %v4010_v29 = vpop.f32.mrb[152].mxu1 }
 0x4cc   :  { %v2685_v43 = vpop.f32.mrb[153].mxu1 }
 0x4cd   :  { %v2986_v43 = vld [vmem:[%s6509_s7 + $0x8] sm:$0xff] }
 0x4cf   :  { %v4013_v16 = vpop.f32.mrb[154].mxu1 }
 0x4d0   :  { %v2733_v44 = vadd.f32 %v4013_v16, %v2594_v30  ;;  %v2693_v35 = vpop.f32.mrb[155].mxu1  ;;  %v3622_v30 = vld [vmem:[%s6507_s6 + $0xc8] sm:$0xff]  ;;  %v3003_v16 = vld [vmem:[%s6509_s7 + $0x90] sm:$0xff] }
 0x4d1   :  { %v2732_v13 = vadd.f32 %v2693_v35, %v2593_v36  ;;  %v3619_v36 = vld [vmem:[%s6507_s6 + $0xb0] sm:$0xff] }
 0x4d2   :  { %v2748_v12 = vadd.f32 %v3612_v19, %v2733_v44  ;;  %v4385_v4 = vpack.c.bf16 %v3620_v1, %v3619_v36  ;;  %v4407_v44 = vpack.c.bf16 %v2986_v43, %v2985_v34  ;;  %v3015_v36 = vld [vmem:[%s6509_s7 + $0xf0] sm:$0xff]  ;;  %v3016_v1 = vld [vmem:[%s6509_s7 + $0xf8] sm:$0xff] }
 0x4d3   :  { %v2747_v27 = vadd.f32 %v3612_v19, %v2732_v13  ;;  %v4016_v25 = vpop.f32.mrb[156].mxu1  ;;  %v2987_v13 = vld [vmem:[%s6509_s7 + $0x10] sm:$0xff] }
 0x4d4   :  { %v2756_v6 = vmax.f32 %v2748_v12, 0.0  ;;  %v2735_v45 = vadd.f32 %v4016_v25, %v2596_v28  ;;  %v2703_v46 = vpop.f32.mrb[157].mxu1  ;;  %v2988_v12 = vld [vmem:[%s6509_s7 + $0x18] sm:$0xff]  ;;  %v3006_v25 = vld [vmem:[%s6509_s7 + $0xa8] sm:$0xff] }
 0x4d5   :  { %v2755_v49 = vmax.f32 %v2747_v27, 0.0  ;;  %v2734_v2 = vadd.f32 %v2703_v46, %v2595_v63  ;;  %v3005_v27 = vld [vmem:[%s6509_s7 + $0xa0] sm:$0xff] }
 0x4d6   :  { %v2750_v37 = vadd.f32 %v3612_v19, %v2735_v45  ;;  %v4413_v45 = vpack.c.bf16 %v3006_v25, %v3005_v27  ;;  %v2989_v46 = vld [vmem:[%s6509_s7 + $0x20] sm:$0xff]  ;;  %v3101_v25 = vld [vmem:[%s6510_s9 + $0x30] sm:$0xff] }
 0x4d7   :  { %v2749_v38 = vadd.f32 %v3612_v19, %v2734_v2  ;;  %v4019_v26 = vpop.f32.mrb[158].mxu1  ;;  %v2763_v47 = vmax.f32 %v2755_v49, %v2756_v6  ;;  %v4411_v6 = vpack.c.bf16 %v2988_v12, %v2987_v13  ;;  %v2990_v49 = vld [vmem:[%s6509_s7 + $0x28] sm:$0xff]  ;;  %v3007_v2 = vld [vmem:[%s6509_s7 + $0xb0] sm:$0xff]  ;;  %v3099_v13 = vld [vmem:[%s6510_s9 + $0x20] sm:$0xff] }
 0x4d8   :  { %v2758_v7 = vmax.f32 %v2750_v37, 0.0  ;;  %v2737_v52 = vadd.f32 %v4019_v26, %v2598_v41  ;;  %v2713_v17 = vpop.f32.mrb[159].mxu1  ;;  %v3627_v41 = vld [vmem:[%s6507_s6 + $0xf0] sm:$0xff]  ;;  %v3008_v37 = vld [vmem:[%s6509_s7 + $0xb8] sm:$0xff]  ;;  %v3100_v12 = vld [vmem:[%s6510_s9 + $0x28] sm:$0xff] }
 0x4d9   :  { %v2757_v56 = vmax.f32 %v2749_v38, 0.0  ;;  %v2736_v18 = vadd.f32 %v2713_v17, %v2597_v60  ;;  %4055 = vmatprep.mubr.f32.mxu1 %v2763_v47  ;;  %v3623_v60 = vld [vmem:[%s6507_s6 + $0xd0] sm:$0xff]  ;;  %v4401_v9 = vpack.c.bf16 %v3628_v42, %v3627_v41  ;;  %v4415_v38 = vpack.c.bf16 %v2990_v49, %v2989_v46  ;;  %v3010_v17 = vld [vmem:[%s6509_s7 + $0xc8] sm:$0xff]  ;;  %v3095_v42 = vld [vmem:[%s6510_s9] sm:$0xff] }
 0x4da   :  { %v2752_v54 = vadd.f32 %v3612_v19, %v2737_v52  ;;  %v4393_v28 = vpack.c.bf16 %v3624_v8, %v3623_v60  ;;  %v4417_v26 = vpack.c.bf16 %v3008_v37, %v3007_v2  ;;  %v3009_v52 = vld [vmem:[%s6509_s7 + $0xc0] sm:$0xff]  ;;  %v4444_v27 = vpack.c.bf16 %v3100_v12, %v3099_v13  ;;  %v3104_v49 = vld [vmem:[%s6510_s9 + $0x48] sm:$0xff]  ;;  %v3105_v37 = vld [vmem:[%s6510_s9 + $0x50] sm:$0xff] }
 0x4db   :  { %v2764_v10 = vmax.f32 %v2757_v56, %v2758_v7  ;;  %v2751_v58 = vadd.f32 %v3612_v19, %v2736_v18  ;;  %v4022_v22 = vpop.f32.mrb[160].mxu1  ;;  %v2992_v7 = vld [vmem:[%s6509_s7 + $0x38] sm:$0xff]  ;;  %v4421_v53 = vpack.c.bf16 %v3010_v17, %v3009_v52  ;;  %v2993_v56 = vld [vmem:[%s6509_s7 + $0x40] sm:$0xff]  ;;  %v2994_v18 = vld [vmem:[%s6509_s7 + $0x48] sm:$0xff]  ;;  %v6525_v17 = vmov 0.0  }
 0x4dc   :  { %v2760_v55 = vmax.f32 %v2752_v54, 0.0  ;;  %v2739_v24 = vadd.f32 %v4022_v22, %v2600_v11  ;;  %v2723_v20 = vpop.f32.mrb[161].mxu1  ;;  %v3001_v11 = vld [vmem:[%s6509_s7 + $0x80] sm:$0xff]  ;;  %v3011_v54 = vld [vmem:[%s6509_s7 + $0xd0] sm:$0xff] }
 0x4dd   :  { %v2759_v61 = vmax.f32 %v2751_v58, 0.0  ;;  %v2738_v31 = vadd.f32 %v2723_v20, %v2599_v5  ;;  %4056 = vmatmul.mubr.f32.vlgmr.msra.gmra.mrb[162].mxu1 %v2764_v10  ;;  %v3626_v5 = vld [vmem:[%s6507_s6 + $0xe8] sm:$0xff]  ;;  %v4405_v29 = vpack.c.bf16 %v3002_v33, %v3001_v11  ;;  %v4423_v58 = vpack.c.bf16 %v2994_v18, %v2993_v56  ;;  %v3103_v46 = vld [vmem:[%s6510_s9 + $0x40] sm:$0xff] }
 0x4de   :  { %v2754_v0 = vadd.f32 %v3612_v19, %v2739_v24  ;;  %4376 = vmatpush3.bf16.msra.mxu1 %v6248_v59  ;;  %v3621_v59 = vld [vmem:[%s6507_s6 + $0xc0] sm:$0xff]  ;;  %v4397_v50 = vpack.c.bf16 %v3626_v5, %v3625_v3  ;;  %v3014_v20 = vld [vmem:[%s6509_s7 + $0xe8] sm:$0xff]  ;;  %v4450_v2 = vpack.c.bf16 %v3104_v49, %v3103_v46 }
 0x4df   :  { %v2753_v14 = vadd.f32 %v3612_v19, %v2738_v31  ;;  %4378 = vmatprep.subr.bf16.mxu1 %v4377_v21  ;;  %v2765_v62 = vmax.f32 %v2759_v61, %v2760_v55  ;;  %v4389_v40 = vpack.c.bf16 %v3622_v30, %v3621_v59  ;;  %v3004_v19 = vld [vmem:[%s6509_s7 + $0x98] sm:$0xff]  ;;  %v3013_v24 = vld [vmem:[%s6509_s7 + $0xe0] sm:$0xff]  ;;  %v2998_v31 = vld [vmem:[%s6509_s7 + $0x68] sm:$0xff] }
 0x4e0   :  { %v2762_v48 = vmax.f32 %v2754_v0, 0.0  ;;  %v4409_v35 = vpack.c.bf16 %v3004_v19, %v3003_v16  ;;  %v2996_v55 = vld [vmem:[%s6509_s7 + $0x58] sm:$0xff]  ;;  %v4429_v57 = vpack.c.bf16 %v3014_v20, %v3013_v24  ;;  %v2997_v61 = vld [vmem:[%s6509_s7 + $0x60] sm:$0xff]  ;;  %v3097_v19 = vld [vmem:[%s6510_s9 + $0x10] sm:$0xff] }
 0x4e1   :  { %v2761_v39 = vmax.f32 %v2753_v14, 0.0  ;;  %4058 = vmatprep.mubr.f32.mxu1 %v2765_v62  ;;  %v4431_v0 = vpack.c.bf16 %v2998_v31, %v2997_v61  ;;  %v3629_v56 = vld [vmem:[%s6511_s8] ss:$0 sm:$0xff]  ;;  %v3194_v24 = vld [vmem:[%s6512_s11 + $0x10] sm:$0xff]  ;;  %v3195_v20 = vld [vmem:[%s6512_s11 + $0x18] sm:$0xff] }
 0x4e2   :  { %4380 = vmatpush3.bf16.msra.mxu1 %v4377_v21  ;;  %v2995_v21 = vld [vmem:[%s6509_s7 + $0x50] sm:$0xff]  ;;  %v3197_v61 = vld [vmem:[%s6512_s11 + $0x28] sm:$0xff] }
 0x4e3   :  { %4382 = vmatprep.subr.bf16.mxu1 %v4381_v32  ;;  %v2766_v63 = vmax.f32 %v2761_v39, %v2762_v48  ;;  %v4427_v23 = vpack.c.bf16 %v2996_v55, %v2995_v21  ;;  %v4433_v39 = vpack.c.bf16 %v3016_v1, %v3015_v36  ;;  %v3202_v1 = vld [vmem:[%s6512_s11 + $0x50] sm:$0xf] }
 0x4e5   :  { %4059 = vmatmul.mubr.f32.gmra.mrb[164].mxu1 %v2766_v63 }
 0x4e6   :  { %4384 = vmatpush3.bf16.msra.mxu1 %v4381_v32  ;;  %4093 = vmatprep.mubr.f32.mxu1 %v2763_v47  ;;  %v2991_v47 = vld [vmem:[%s6509_s7 + $0x30] sm:$0xff] }
 0x4e7   :  { %4386 = vmatprep.subr.bf16.mxu1 %v4385_v4  ;;  %v4419_v15 = vpack.c.bf16 %v2992_v7, %v2991_v47  ;;  %v3107_v47 = vld [vmem:[%s6510_s9 + $0x60] sm:$0xff]  ;;  %v3108_v7 = vld [vmem:[%s6510_s9 + $0x68] sm:$0xff] }
 0x4e8   :  { %v4456_v52 = vpack.c.bf16 %v3108_v7, %v3107_v47 }
 0x4ea   :  { %4388 = vmatpush3.bf16.msra.mxu1 %v4385_v4  ;;  %v3000_v4 = vld [vmem:[%s6509_s7 + $0x78] sm:$0xff] }
 0x4eb   :  { %4390 = vmatprep.subr.bf16.mxu1 %v4389_v40 }
 0x4ee   :  { %4392 = vmatpush3.bf16.msra.mxu1 %v4389_v40 }
 0x4ef   :  { %4394 = vmatprep.subr.bf16.mxu1 %v4393_v28 }
 0x4f2   :  { %4396 = vmatpush3.bf16.msra.mxu1 %v4393_v28 }
 0x4f3   :  { %4398 = vmatprep.subr.bf16.mxu1 %v4397_v50 }
 0x4f6   :  { %4400 = vmatpush3.bf16.msra.mxu1 %v4397_v50 }
 0x4f7   :  { %4402 = vmatprep.subr.bf16.mxu1 %v4401_v9 }
 0x4fa   :  { %4404 = vmatpush3.bf16.msra.mxu1 %v4401_v9  ;;  %v3096_v9 = vld [vmem:[%s6510_s9 + $0x8] sm:$0xff] }
 0x4fb   :  { %4406 = vmatprep.subr.bf16.mxu1 %v4405_v29  ;;  %v4438_v29 = vpack.c.bf16 %v3096_v9, %v3095_v42 }
 0x4fd   :  { %4094 = vmatmul.mubr.f32.vlgmr.msra.gmra.mrb[166].mxu1 %v2764_v10  ;;  %v3012_v10 = vld [vmem:[%s6509_s7 + $0xd8] sm:$0xff] }
 0x4fe   :  { %4096 = vmatprep.mubr.f32.mxu1 %v2765_v62  ;;  %4408 = vmatpush3.bf16.msra.mxu1 %v4407_v44  ;;  %v4425_v22 = vpack.c.bf16 %v3012_v10, %v3011_v54  ;;  %v3098_v44 = vld [vmem:[%s6510_s9 + $0x18] sm:$0xff]  ;;  %v3192_v10 = vld [vmem:[%s6512_s11] sm:$0xff] }
 0x4ff   :  { %4410 = vmatprep.subr.bf16.mxu1 %v4409_v35  ;;  %v4441_v35 = vpack.c.bf16 %v3098_v44, %v3097_v19 }
 0x501   :  { %4097 = vmatmul.mubr.f32.gmra.mrb[168].mxu1 %v2766_v63  ;;  %v2999_v63 = vld [vmem:[%s6509_s7 + $0x70] sm:$0xff] }
 0x502   :  { %4412 = vmatpush3.bf16.msra.mxu1 %v4411_v6  ;;  %v4435_v59 = vpack.c.bf16 %v3000_v4, %v2999_v63  ;;  %v3102_v6 = vld [vmem:[%s6510_s9 + $0x38] sm:$0xff] }
 0x503   :  { %4414 = vmatprep.subr.bf16.mxu1 %v4413_v45  ;;  %v4447_v45 = vpack.c.bf16 %v3102_v6, %v3101_v25 }
 0x506   :  { %4416 = vmatpush3.bf16.msra.mxu1 %v4415_v38  ;;  %v3106_v38 = vld [vmem:[%s6510_s9 + $0x58] sm:$0xff] }
 0x507   :  { %4418 = vmatprep.subr.bf16.mxu1 %v4417_v26  ;;  %v4453_v26 = vpack.c.bf16 %v3106_v38, %v3105_v37 }
 0x50a   :  { %4420 = vmatpush3.bf16.msra.mxu1 %v4419_v15  ;;  %v3109_v15 = vld [vmem:[%s6510_s9 + $0x70] sm:$0xff] }
 0x50b   :  { %4422 = vmatprep.subr.bf16.mxu1 %v4421_v53 }
 0x50e   :  { %4424 = vmatpush3.bf16.msra.mxu1 %v4423_v58  ;;  %v3193_v58 = vld [vmem:[%s6512_s11 + $0x8] sm:$0xff] }
 0x50f   :  { %4426 = vmatprep.subr.bf16.mxu1 %v4425_v22  ;;  %v4459_v21 = vpack.c.bf16 %v3193_v58, %v3192_v10 }
 0x512   :  { %4428 = vmatpush3.bf16.msra.mxu1 %v4427_v23  ;;  %v4462_v23 = vpack.c.bf16 %v3195_v20, %v3194_v24 }
 0x513   :  { %4430 = vmatprep.subr.bf16.mxu1 %v4429_v57  ;;  %v3196_v57 = vld [vmem:[%s6512_s11 + $0x20] sm:$0xff] }
 0x514   :  { %v4465_v31 = vpack.c.bf16 %v3197_v61, %v3196_v57 }
 0x516   :  { %4432 = vmatpush3.bf16.msra.mxu1 %v4431_v0  ;;  %v3198_v0 = vld [vmem:[%s6512_s11 + $0x30] sm:$0xff] }
 0x517   :  { %4434 = vmatprep.subr.bf16.mxu1 %v4433_v39 }
 0x51a   :  { %4436 = vmatpush3.bf16.msra.mxu1 %v4435_v59 }
 0x51b   :  { %4437 = vmatprep.subr.bf16.mxu1 %v6523_v51 }
 0x5b0   :  { %v4057_v14 = vpop.f32.mrb[162].mxu1 }
 0x5b1   :  { %v2849_v62 = vpop.f32.mrb[163].mxu1 }
 0x5b8   :  { %v4060_v32 = vpop.f32.mrb[164].mxu1 }
 0x5b9   :  { %v2859_v48 = vpop.f32.mrb[165].mxu1 }
 0x5d0   :  { %v4095_v30 = vpop.f32.mrb[166].mxu1 }
 0x5d1   :  { %v2971_v40 = vmax.f32 %v4057_v14, %v4095_v30  ;;  %v2951_v60 = vpop.f32.mrb[167].mxu1  ;;  %v3199_v14 = vld [vmem:[%s6512_s11 + $0x38] sm:$0xff]  ;;  %v3632_v30 = vld [vmem:[%s6514_s12] ss:$0 sm:$0xff] }
 0x5d2   :  { %v2970_v8 = vmax.f32 %v2849_v62, %v2951_v60  ;;  %v4468_v62 = vpack.c.bf16 %v3199_v14, %v3198_v0 }
 0x5d4   :  { %v4098_v28 = vpop.f32.mrb[168].mxu1 }
 0x5d5   :  { %v2973_v3 = vmax.f32 %v4060_v32, %v4098_v28  ;;  %v2961_v5 = vpop.f32.mrb[169].mxu1  ;;  %v3200_v32 = vld [vmem:[%s6512_s11 + $0x40] sm:$0xff] }
 0x5d6   :  { %v2972_v50 = vmax.f32 %v2859_v48, %v2961_v5  ;;  %v3201_v48 = vld [vmem:[%s6512_s11 + $0x48] sm:$0xff] }
 0x5d7   :  { %v4674_v41 = vpack.i.bf16 %v2971_v40, %v2973_v3  ;;  %v4471_v36 = vpack.c.bf16 %v3201_v48, %v3200_v32 }
 0x5d9   :  { %4675 = vrot.lane.b32.xlu0 %v4674_v41, %s4682_s16 }
 0x64b   :  { %v4676_v11 = vpop.permute.xlu0 %4675 }
 0x64c   :  { %v4678_v33 = vunpack.i.h.bf16 %v4676_v11  ;;  %v4677_v34 = vunpack.i.l.bf16 %v4676_v11 }
 0x64e   :  { %v2984_v43 = vsel %vm2982_vm6, %v2972_v50, %v4677_v34  ;;  %v2983_v16 = vsel %vm2982_vm6, %v2970_v8, %v4678_v33 }
 0x64f   :  { %3088 = vmatprep.mubr.f32.mxu1 %v2984_v43 }
 0x650   :  { %3089 = vmatmul.mubr.f32.vlgmr.msra.gmra.mrb[170].mxu1 %v2983_v16 }
 0x651   :  { %4439 = vmatpush3.bf16.msra.mxu1 %v4438_v29  ;;  %4129 = vmatprep.mubr.msk.f32.mxu1 %vm4683_vm7, %v6525_v17 }
 0x652   :  { %4440 = vmatprep.subr.bf16.mxu1 %v6523_v51 }
 0x655   :  { %4442 = vmatpush3.bf16.msra.mxu1 %v4441_v35 }
 0x656   :  { %4443 = vmatprep.subr.bf16.mxu1 %v6523_v51 }
 0x659   :  { %4445 = vmatpush3.bf16.msra.mxu1 %v4444_v27 }
 0x65a   :  { %4446 = vmatprep.subr.bf16.mxu1 %v6523_v51 }
 0x65d   :  { %4448 = vmatpush3.bf16.msra.mxu1 %v4447_v45 }
 0x65e   :  { %4449 = vmatprep.subr.bf16.mxu1 %v6523_v51 }
 0x661   :  { %4451 = vmatpush3.bf16.msra.mxu1 %v4450_v2 }
 0x662   :  { %4452 = vmatprep.subr.bf16.mxu1 %v6523_v51 }
 0x665   :  { %4454 = vmatpush3.bf16.msra.mxu1 %v4453_v26 }
 0x666   :  { %4455 = vmatprep.subr.bf16.mxu1 %v6523_v51 }
 0x669   :  { %4457 = vmatpush3.bf16.msra.mxu1 %v4456_v52 }
 0x66a   :  { %4127 = vmatprep.subr.mxu1 %v6525_v17 }
 0x66d   :  { %4128 = vmatpush3.msra.mxu1 %v3109_v15 }
 0x66e   :  { %4458 = vmatprep.subr.bf16.mxu1 %v6523_v51 }
 0x723   :  { %v3812_v53 = vpop.f32.mrb[170].mxu1 }
 0x724   :  { %v3813_v18 = vpop.f32.mrb[171].mxu1 }
 0x725   :  { %v3814_v54 = vadd.f32 %v3813_v18, %v3812_v53 }
 0x727   :  { %v3091_v22 = vadd.f32 %v3814_v54, %v3629_v56 }
 0x729   :  { %v3094_v55 = vmax.f32 %v3091_v22, 0.0 }
 0x72b   :  { %4130 = vmatmul.mubr.msk.f32.vlgmr.msra.gmra.mrb[172].mxu1 %vm3117_vm8, %v3094_v55 }
 0x72c   :  { %4460 = vmatpush3.bf16.msra.mxu1 %v4459_v21  ;;  %4154 = vmatprep.mubr.msk.f32.mxu1 %vm4683_vm7, %v6525_v17 }
 0x72d   :  { %4461 = vmatprep.subr.bf16.mxu1 %v6523_v51 }
 0x730   :  { %4463 = vmatpush3.bf16.msra.mxu1 %v4462_v23 }
 0x731   :  { %4464 = vmatprep.subr.bf16.mxu1 %v6523_v51 }
 0x734   :  { %4466 = vmatpush3.bf16.msra.mxu1 %v4465_v31 }
 0x735   :  { %4467 = vmatprep.subr.bf16.mxu1 %v6523_v51 }
 0x738   :  { %4469 = vmatpush3.bf16.msra.mxu1 %v4468_v62 }
 0x739   :  { %4470 = vmatprep.subr.bf16.mxu1 %v6523_v51  ;;  %v3630_v51 = vld [vmem:[%s6513_s10] ss:$0 sm:$0xff] }
 0x73c   :  { %4472 = vmatpush3.bf16.msra.mxu1 %v4471_v36 }
 0x73d   :  { %4152 = vmatprep.subr.mxu1 %v6525_v17 }
 0x740   :  { %4153 = vmatpush3.msk.msra.mxu1 %vm165_vm0, %v3202_v1 }
 0x7fe   :  { %v3187_v39 = vpop.f32.mrb[172].mxu1 }
 0x7ff   :  { %v3188_v63 = vadd.f32 %v3630_v51, %v3187_v39  ;;  %v4131_v4 = vpop.f32.mrb[173].mxu1 }
 0x801   :  { %v3191_v59 = vmax.f32 %v3188_v63, 0.0 }
 0x803   :  { %4155 = vmatmul.mubr.msk.f32.vlgmr.msra.gmra.mrb[174].mxu1 %vm3210_vm9, %v3191_v59 }
 0x8d6   :  { %v3283_v40 = vpop.f32.mrb[174].mxu1 }
 0x8d7   :  { %v3284_v60 = vadd.f32 %v3632_v30, %v3283_v40  ;;  %v4156_v8 = vpop.f32.mrb[175].mxu1 }
 0x8d9   :  { %3287 = vst [vmem:[%s6515_s13] sm:$0xff] %v3284_v60 }

</bundles_post_ra>
